<compile_context>
chip_gen: v7x
topology: tpu7x:2x2x1
jax: 0.10.0
libtpu: 0.0.40
codegen_flags: <defaults>
</compile_context>

<pallas_src>
import functools

import jax
import jax.numpy as jnp
from jax.experimental import pallas as pl
from jax.experimental.pallas import tpu as pltpu

LEAKY_SLOPE = 0.2
EPS = 1e-5  # nn.InstanceNorm2d default


# ----------------------------- tiling helper ---------------------------------
def _pick_tile(dim, target, quantum):
    """Largest tile <= target that evenly divides `dim` and respects the TPU
    sublane/lane quantum; falls back to the full dim."""
    if dim <= target:
        return dim
    t = (target // quantum) * quantum
    while t >= quantum:
        if dim % t == 0:
            return t
        t -= quantum
    return dim


# ----------------------------- Pallas kernels --------------------------------
def _conv_kernel(x_ref, w_ref, *rest, use_norm, use_act, nk):
    # x_ref : (1, TP, TK) bf16 im2col patches
    # w_ref : (TK, Cout)  bf16 weight tile
    # y_ref : (1, TP, Cout)             conv output (f32 for norm layers, bf16 else)
    # stats_ref (norm layers only): (1, 2, Cout) f32, resident across P and K tiles
    # acc_ref : (TP, Cout) f32 scratch accumulator
    if use_norm:
        y_ref, stats_ref, acc_ref = rest
    else:
        y_ref, acc_ref = rest
        stats_ref = None

    p_idx = pl.program_id(1)
    k_idx = pl.program_id(2)

    @pl.when(k_idx == 0)
    def _():
        acc_ref[...] = jnp.zeros_like(acc_ref)

    if use_norm:
        @pl.when(jnp.logical_and(p_idx == 0, k_idx == 0))
        def _():
            stats_ref[0] = jnp.zeros_like(stats_ref[0])

    # bf16 x bf16 -> f32 accumulate on the MXU
    acc_ref[...] += jnp.dot(x_ref[0], w_ref[...],
                            preferred_element_type=jnp.float32)

    @pl.when(k_idx == nk - 1)
    def _():
        y = acc_ref[...]                                   # (TP, Cout) f32
        if use_act and not use_norm:
            y = jnp.where(y >= 0, y, LEAKY_SLOPE * y)      # LeakyReLU(0.2)
        y_ref[0] = y.astype(y_ref.dtype)
        if use_norm:
            # single-pass stats: accumulate sum / sum of squares over spatial rows
            s = jnp.sum(y, axis=0, keepdims=True)          # (1, Cout)
            ss = jnp.sum(y * y, axis=0, keepdims=True)     # (1, Cout)
            stats_ref[0] = stats_ref[0] + jnp.concatenate([s, ss], axis=0)


def _norm_act_kernel(y_ref, stats_ref, o_ref, *, inv_p):
    # y_ref : (1, TP, Cout) f32 raw conv output
    # stats_ref : (1, 2, Cout) f32 per-sample (sum, sumsq) over all P
    # o_ref : (1, TP, Cout) bf16
    y = y_ref[0]
    st = stats_ref[0]                                      # (2, Cout)
    mean = st[0:1, :] * inv_p                              # (1, Cout)
    var = jnp.maximum(st[1:2, :] * inv_p - mean * mean, 0.0)
    z = (y - mean) * jax.lax.rsqrt(var + EPS)              # InstanceNorm (affine=False)
    z = jnp.where(z >= 0, z, LEAKY_SLOPE * z)              # LeakyReLU(0.2)
    o_ref[0] = z.astype(o_ref.dtype)


def _final_kernel(x_ref, w_ref, o_ref, acc_ref, *, nk):
    # Final Cout=1 conv, computed transposed so P is the lane dimension.
    # x_ref : (1, P, TK) bf16; w_ref : (1, TK) bf16
    # o_ref : (1, 1, P) f32 ; acc_ref : (1, P) f32
    k_idx = pl.program_id(1)

    @pl.when(k_idx == 0)
    def _():
        acc_ref[...] = jnp.zeros_like(acc_ref)

    # (1, TK) contract (P, TK) over TK -> (1, P)  (lane-dense output)
    acc_ref[...] += jax.lax.dot_general(
        w_ref[...], x_ref[0],
        dimension_numbers=(((1,), (1,)), ((), ())),
        preferred_element_type=jnp.float32)

    @pl.when(k_idx == nk - 1)
    def _():
        o_ref[0] = acc_ref[...].astype(o_ref.dtype)


# ------------------------------- JAX glue -------------------------------------
def _im2col_reflect_nhwc(x, k, stride):
    # x: (N, H, W, C); reflect pad of 1 on each spatial side (padding_mode='reflect').
    # TODO(synk): gather the kxk windows in-kernel (manual DMA from the NHWC
    # activation) to avoid materializing the k^2-times-larger im2col in HBM.
    xp = jnp.pad(x, ((0, 0), (1, 1), (1, 1), (0, 0)), mode="reflect")
    N, Hp, Wp, C = xp.shape
    Ho = (Hp - k) // stride + 1
    Wo = (Wp - k) // stride + 1
    cols = []
    for i in range(k):
        for j in range(k):
            cols.append(xp[:, i:i + stride * Ho:stride, j:j + stride * Wo:stride, :])
    p = jnp.concatenate(cols, axis=-1)        # (N, Ho, Wo, k*k*C), K idx = (i*k+j)*C + c
    return p.reshape(N, Ho * Wo, k * k * C), Ho, Wo


def _weight_to_matmul(w):
    # PyTorch (Cout, Cin, kh, kw) -> (kh*kw*Cin, Cout), matching the patch K order.
    Cout, Cin, kh, kw = w.shape
    return jnp.transpose(w, (2, 3, 1, 0)).reshape(kh * kw * Cin, Cout).astype(jnp.bfloat16)


def conv_layer(x_nhwc, w, stride, *, use_norm, use_act):
    Cout, _, k, _ = w.shape
    patches, Ho, Wo = _im2col_reflect_nhwc(x_nhwc, k, stride)
    patches = patches.astype(jnp.bfloat16)
    N, P, K = patches.shape
    w2d = _weight_to_matmul(w)                             # (K, Cout) bf16

    TP = _pick_tile(P, 256, 16)
    TK = _pick_tile(K, 512, 128)
    n_p, n_k = P // TP, K // TK

    kernel = functools.partial(_conv_kernel, use_norm=use_norm,
                               use_act=use_act, nk=n_k)
    y_dtype = jnp.float32 if use_norm else jnp.bfloat16
    out_shape = [jax.ShapeDtypeStruct((N, P, Cout), y_dtype)]
    out_specs = [pl.BlockSpec((1, TP, Cout), lambda n, p, kk: (n, p, 0))]
    if use_norm:
        out_shape.append(jax.ShapeDtypeStruct((N, 2, Cout), jnp.float32))
        out_specs.append(pl.BlockSpec((1, 2, Cout), lambda n, p, kk: (n, 0, 0)))

    # Stats accumulate over the P axis for norm layers -> that axis must be
    # "arbitrary"; otherwise it is independent and can be megacore-parallel.
    semantics = ("parallel", "arbitrary" if use_norm else "parallel", "arbitrary")

    res = pl.pallas_call(
        kernel,
        out_shape=out_shape,
        grid_spec=pltpu.PrefetchScalarGridSpec(
            num_scalar_prefetch=0,
            grid=(N, n_p, n_k),
            in_specs=[
                pl.BlockSpec((1, TP, TK), lambda n, p, kk: (n, p, kk)),
                pl.BlockSpec((TK, Cout), lambda n, p, kk: (kk, 0)),
            ],
            out_specs=out_specs,
            scratch_shapes=[pltpu.VMEM((TP, Cout), jnp.float32)],
        ),
        compiler_params=pltpu.CompilerParams(dimension_semantics=semantics),
    )(patches, w2d)

    if not use_norm:
        y = res[0]
    else:
        y, stats = res
        # Second sweep: apply full-extent InstanceNorm stats + LeakyReLU(0.2).
        y = pl.pallas_call(
            functools.partial(_norm_act_kernel, inv_p=1.0 / P),
            out_shape=jax.ShapeDtypeStruct((N, P, Cout), jnp.bfloat16),
            grid_spec=pltpu.PrefetchScalarGridSpec(
                num_scalar_prefetch=0,
                grid=(N, n_p),
                in_specs=[
                    pl.BlockSpec((1, TP, Cout), lambda n, p: (n, p, 0)),
                    pl.BlockSpec((1, 2, Cout), lambda n, p: (n, 0, 0)),
                ],
                out_specs=pl.BlockSpec((1, TP, Cout), lambda n, p: (n, p, 0)),
            ),
            compiler_params=pltpu.CompilerParams(
                dimension_semantics=("parallel", "parallel")),
        )(y, stats)

    return y.reshape(N, Ho, Wo, Cout)          # NHWC bf16


def final_conv_layer(x_nhwc, w):
    # Cout == 1, stride 1, no norm/act. Output (N, 1, P) with P lane-dense.
    k = w.shape[2]
    patches, Ho, Wo = _im2col_reflect_nhwc(x_nhwc, k, 1)
    patches = patches.astype(jnp.bfloat16)
    N, P, K = patches.shape
    w_row = _weight_to_matmul(w).T                         # (1, K) bf16

    TK = _pick_tile(K, 512, 128)
    n_k = K // TK

    out = pl.pallas_call(
        functools.partial(_final_kernel, nk=n_k),
        out_shape=jax.ShapeDtypeStruct((N, 1, P), jnp.float32),
        grid_spec=pltpu.PrefetchScalarGridSpec(
            num_scalar_prefetch=0,
            grid=(N, n_k),
            in_specs=[
                pl.BlockSpec((1, P, TK), lambda n, kk: (n, 0, kk)),
                pl.BlockSpec((1, TK), lambda n, kk: (0, kk)),
            ],
            out_specs=pl.BlockSpec((1, 1, P), lambda n, kk: (n, 0, 0)),
            scratch_shapes=[pltpu.VMEM((1, P), jnp.float32)],
        ),
        compiler_params=pltpu.CompilerParams(
            dimension_semantics=("parallel", "arbitrary")),
    )(patches, w_row)

    return out.reshape(N, 1, Ho, Wo)           # NCHW f32 logits


def init_params(key, in_channels):
    # Deterministic synthetic init (kaiming-like scale); shapes from __init__.
    chans = [(in_channels, 64), (64, 128), (128, 256), (256, 512), (512, 1)]
    params = []
    for cin, cout in chans:
        key, sub = jax.random.split(key)
        fan_in = cin * 4 * 4
        w = jax.random.normal(sub, (cout, cin, 4, 4), jnp.float32) / jnp.sqrt(fan_in)
        params.append(w)
    return params


@jax.jit
def discriminator_forward(params, x):
    w1, w2, w3, w4, w5 = params
    h = jnp.transpose(x, (0, 2, 3, 1)).astype(jnp.bfloat16)   # NCHW -> NHWC bf16 once
    h = conv_layer(h, w1, 2, use_norm=False, use_act=True)    # Conv + LeakyReLU
    h = conv_layer(h, w2, 2, use_norm=True,  use_act=True)    # Conv + IN + LeakyReLU
    h = conv_layer(h, w3, 2, use_norm=True,  use_act=True)    # Conv + IN + LeakyReLU
    h = conv_layer(h, w4, 1, use_norm=True,  use_act=True)    # Conv + IN + LeakyReLU
    return final_conv_layer(h, w5)                            # Conv (logits), NCHW f32


if __name__ == "__main__":
    key = jax.random.PRNGKey(0)
    k_w, k_x = jax.random.split(key)

    # batch=2, in_channels=4, spatial=32 (spatial >= 32 keeps every reflect-pad
    # valid: 32 -> 16 -> 8 -> 4 -> 3 -> 2, final output (2, 1, 2, 2)).
    x = jax.random.normal(k_x, (2, 4, 32, 32), jnp.float32)
    params = init_params(k_w, in_channels=4)

    out = discriminator_forward(params, x)
    jax.block_until_ready(out)
    assert out.shape == (2, 1, 2, 2)
    print("KERNEL_OK")
</pallas_src>

<mosaic_0001>
module attributes {stable_mosaic.version = 11 : i64} {
  func.func @_conv_kernel(%arg0: i32, %arg1: i32, %arg2: i32, %arg3: memref<1x256x64xbf16, #tpu.memory_space<vmem>>, %arg4: memref<64x64xbf16, #tpu.memory_space<vmem>>, %arg5: memref<1x256x64xbf16, #tpu.memory_space<vmem>>, %arg6: memref<256x64xf32, #tpu.memory_space<vmem>>) attributes {dimension_semantics = [#tpu.dimension_semantics<parallel>, #tpu.dimension_semantics<parallel>, #tpu.dimension_semantics<arbitrary>], iteration_bounds = array<i64: 2, 1, 1>, scalar_prefetch = 0 : i64, scratch_operands = 1 : i64, tpu.core_type = #tpu.core_type<tc>, window_params = [{transform_indices = @transform_0, window_bounds = array<i64: 1, 256, 64>}, {transform_indices = @transform_1, window_bounds = array<i64: 64, 64>}, {transform_indices = @transform_2, window_bounds = array<i64: 1, 256, 64>}]} {
    %c0_i32 = arith.constant 0 : i32
    %0 = arith.cmpi eq, %arg2, %c0_i32 : i32
    %1 = arith.extui %0 : i1 to i32
    %c0_i32_0 = arith.constant 0 : i32
    %2 = arith.cmpi ne, %1, %c0_i32_0 : i32
    scf.if %2 {
      %cst_11 = arith.constant 0.000000e+00 : f32
      %13 = vector.broadcast %cst_11 : f32 to vector<256x64xf32>
      %c0_12 = arith.constant 0 : index
      %c0_13 = arith.constant 0 : index
      %14 = vector.load %arg6[%c0_12, %c0_13] : memref<256x64xf32, #tpu.memory_space<vmem>>, vector<256x64xf32>
      tpu.vector_store %arg6[%c0_12, %c0_13], %13 {strides = array<i32>} : memref<256x64xf32, #tpu.memory_space<vmem>>, vector<256x64xf32>,
    } else {
    }
    %c0 = arith.constant 0 : index
    %c0_1 = arith.constant 0 : index
    %3 = vector.load %arg6[%c0, %c0_1] : memref<256x64xf32, #tpu.memory_space<vmem>>, vector<256x64xf32>
    %c0_2 = arith.constant 0 : index
    %c0_3 = arith.constant 0 : index
    %c0_4 = arith.constant 0 : index
    %4 = vector.load %arg3[%c0_2, %c0_3, %c0_4] : memref<1x256x64xbf16, #tpu.memory_space<vmem>>, vector<1x256x64xbf16>
    %5 = vector.shape_cast %4 : vector<1x256x64xbf16> to vector<256x64xbf16>
    %c0_5 = arith.constant 0 : index
    %c0_6 = arith.constant 0 : index
    %6 = vector.load %arg4[%c0_5, %c0_6] : memref<64x64xbf16, #tpu.memory_space<vmem>>, vector<64x64xbf16>
    %cst = arith.constant dense<0.000000e+00> : vector<256x64xf32>
    %7 = tpu.matmul %5, %6, %cst {dimension_numbers = #tpu.dot_dimension_numbers<[1], [0], [0], [1], [0, 0, 1, 1], [], []>} : vector<256x64xbf16>, vector<64x64xbf16>, vector<256x64xf32> -> vector<256x64xf32>
    %8 = arith.addf %3, %7 : vector<256x64xf32>
    %c0_7 = arith.constant 0 : index
    %c0_8 = arith.constant 0 : index
    %9 = vector.load %arg6[%c0_7, %c0_8] : memref<256x64xf32, #tpu.memory_space<vmem>>, vector<256x64xf32>
    tpu.vector_store %arg6[%c0_7, %c0_8], %8 {strides = array<i32>} : memref<256x64xf32, #tpu.memory_space<vmem>>, vector<256x64xf32>,
    %c0_i32_9 = arith.constant 0 : i32
    %10 = arith.cmpi eq, %arg2, %c0_i32_9 : i32
    %11 = arith.extui %10 : i1 to i32
    %c0_i32_10 = arith.constant 0 : i32
    %12 = arith.cmpi ne, %11, %c0_i32_10 : i32
    scf.if %12 {
      %c0_11 = arith.constant 0 : index
      %c0_12 = arith.constant 0 : index
      %13 = vector.load %arg6[%c0_11, %c0_12] : memref<256x64xf32, #tpu.memory_space<vmem>>, vector<256x64xf32>
      %cst_13 = arith.constant 0.000000e+00 : f32
      %14 = vector.broadcast %cst_13 : f32 to vector<256x64xf32>
      %15 = arith.cmpf oge, %13, %14 : vector<256x64xf32>
      %cst_14 = arith.constant 2.000000e-01 : f32
      %16 = vector.broadcast %cst_14 : f32 to vector<256x64xf32>
      %17 = arith.mulf %16, %13 : vector<256x64xf32>
      %18 = arith.select %15, %13, %17 : vector<256x64xi1>, vector<256x64xf32>
      %19 = arith.truncf %18 : vector<256x64xf32> to vector<256x64xbf16>
      %c0_15 = arith.constant 0 : index
      %c0_16 = arith.constant 0 : index
      %c0_17 = arith.constant 0 : index
      %20 = vector.load %arg5[%c0_15, %c0_16, %c0_17] : memref<1x256x64xbf16, #tpu.memory_space<vmem>>, vector<1x256x64xbf16>
      %21 = vector.shape_cast %20 : vector<1x256x64xbf16> to vector<256x64xbf16>
      %22 = vector.shape_cast %19 : vector<256x64xbf16> to vector<1x256x64xbf16>
      tpu.vector_store %arg5[%c0_15, %c0_16, %c0_17], %22 {strides = array<i32>} : memref<1x256x64xbf16, #tpu.memory_space<vmem>>, vector<1x256x64xbf16>,
    } else {
    }
    return
  }
  func.func @transform_0(%arg0: i32, %arg1: i32, %arg2: i32) -> (i32, i32, i32) {
    %c0_i32 = arith.constant 0 : i32
    return %arg0, %arg1, %arg2 : i32, i32, i32
  }
  func.func @transform_1(%arg0: i32, %arg1: i32, %arg2: i32) -> (i32, i32) {
    %c0_i32 = arith.constant 0 : i32
    %c0_i32_0 = arith.constant 0 : i32
    return %arg2, %c0_i32 : i32, i32
  }
  func.func @transform_2(%arg0: i32, %arg1: i32, %arg2: i32) -> (i32, i32, i32) {
    %c0_i32 = arith.constant 0 : i32
    %c0_i32_0 = arith.constant 0 : i32
    return %arg0, %arg1, %c0_i32 : i32, i32, i32
  }
}

module attributes {stable_mosaic.version = 11 : i64} {
  func.func @_conv_kernel(%arg0: i32, %arg1: i32, %arg2: i32, %arg3: memref<1x64x512xbf16, #tpu.memory_space<vmem>>, %arg4: memref<512x128xbf16, #tpu.memory_space<vmem>>, %arg5: memref<1x64x128xf32, #tpu.memory_space<vmem>>, %arg6: memref<1x2x128xf32, #tpu.memory_space<vmem>>, %arg7: memref<64x128xf32, #tpu.memory_space<vmem>>) attributes {dimension_semantics = [#tpu.dimension_semantics<parallel>, #tpu.dimension_semantics<arbitrary>, #tpu.dimension_semantics<arbitrary>], iteration_bounds = array<i64: 2, 1, 2>, scalar_prefetch = 0 : i64, scratch_operands = 1 : i64, tpu.core_type = #tpu.core_type<tc>, window_params = [{transform_indices = @transform_0, window_bounds = array<i64: 1, 64, 512>}, {transform_indices = @transform_1, window_bounds = array<i64: 512, 128>}, {transform_indices = @transform_2, window_bounds = array<i64: 1, 64, 128>}, {transform_indices = @transform_3, window_bounds = array<i64: 1, 2, 128>}]} {
    %c0_i32 = arith.constant 0 : i32
    %0 = arith.cmpi eq, %arg2, %c0_i32 : i32
    %1 = arith.extui %0 : i1 to i32
    %c0_i32_0 = arith.constant 0 : i32
    %2 = arith.cmpi ne, %1, %c0_i32_0 : i32
    scf.if %2 {
      %cst_13 = arith.constant 0.000000e+00 : f32
      %18 = vector.broadcast %cst_13 : f32 to vector<64x128xf32>
      %c0_14 = arith.constant 0 : index
      %c0_15 = arith.constant 0 : index
      %19 = vector.load %arg7[%c0_14, %c0_15] : memref<64x128xf32, #tpu.memory_space<vmem>>, vector<64x128xf32>
      tpu.vector_store %arg7[%c0_14, %c0_15], %18 {strides = array<i32>} : memref<64x128xf32, #tpu.memory_space<vmem>>, vector<64x128xf32>,
    } else {
    }
    %c0_i32_1 = arith.constant 0 : i32
    %3 = arith.cmpi eq, %arg1, %c0_i32_1 : i32
    %c0_i32_2 = arith.constant 0 : i32
    %4 = arith.cmpi eq, %arg2, %c0_i32_2 : i32
    %5 = arith.andi %3, %4 : i1
    %6 = arith.extui %5 : i1 to i32
    %c0_i32_3 = arith.constant 0 : i32
    %7 = arith.cmpi ne, %6, %c0_i32_3 : i32
    scf.if %7 {
      %cst_13 = arith.constant 0.000000e+00 : f32
      %18 = vector.broadcast %cst_13 : f32 to vector<2x128xf32>
      %c0_14 = arith.constant 0 : index
      %c0_15 = arith.constant 0 : index
      %c0_16 = arith.constant 0 : index
      %19 = vector.load %arg6[%c0_14, %c0_15, %c0_16] : memref<1x2x128xf32, #tpu.memory_space<vmem>>, vector<1x2x128xf32>
      %20 = vector.shape_cast %19 : vector<1x2x128xf32> to vector<2x128xf32>
      %21 = vector.shape_cast %18 : vector<2x128xf32> to vector<1x2x128xf32>
      tpu.vector_store %arg6[%c0_14, %c0_15, %c0_16], %21 {strides = array<i32>} : memref<1x2x128xf32, #tpu.memory_space<vmem>>, vector<1x2x128xf32>,
    } else {
    }
    %c0 = arith.constant 0 : index
    %c0_4 = arith.constant 0 : index
    %8 = vector.load %arg7[%c0, %c0_4] : memref<64x128xf32, #tpu.memory_space<vmem>>, vector<64x128xf32>
    %c0_5 = arith.constant 0 : index
    %c0_6 = arith.constant 0 : index
    %c0_7 = arith.constant 0 : index
    %9 = vector.load %arg3[%c0_5, %c0_6, %c0_7] : memref<1x64x512xbf16, #tpu.memory_space<vmem>>, vector<1x64x512xbf16>
    %10 = vector.shape_cast %9 : vector<1x64x512xbf16> to vector<64x512xbf16>
    %c0_8 = arith.constant 0 : index
    %c0_9 = arith.constant 0 : index
    %11 = vector.load %arg4[%c0_8, %c0_9] : memref<512x128xbf16, #tpu.memory_space<vmem>>, vector<512x128xbf16>
    %cst = arith.constant dense<0.000000e+00> : vector<64x128xf32>
    %12 = tpu.matmul %10, %11, %cst {dimension_numbers = #tpu.dot_dimension_numbers<[1], [0], [0], [1], [0, 0, 1, 1], [], []>} : vector<64x512xbf16>, vector<512x128xbf16>, vector<64x128xf32> -> vector<64x128xf32>
    %13 = arith.addf %8, %12 : vector<64x128xf32>
    %c0_10 = arith.constant 0 : index
    %c0_11 = arith.constant 0 : index
    %14 = vector.load %arg7[%c0_10, %c0_11] : memref<64x128xf32, #tpu.memory_space<vmem>>, vector<64x128xf32>
    tpu.vector_store %arg7[%c0_10, %c0_11], %13 {strides = array<i32>} : memref<64x128xf32, #tpu.memory_space<vmem>>, vector<64x128xf32>,
    %c1_i32 = arith.constant 1 : i32
    %15 = arith.cmpi eq, %arg2, %c1_i32 : i32
    %16 = arith.extui %15 : i1 to i32
    %c0_i32_12 = arith.constant 0 : i32
    %17 = arith.cmpi ne, %16, %c0_i32_12 : i32
    scf.if %17 {
      %c0_13 = arith.constant 0 : index
      %c0_14 = arith.constant 0 : index
      %18 = vector.load %arg7[%c0_13, %c0_14] : memref<64x128xf32, #tpu.memory_space<vmem>>, vector<64x128xf32>
      %c0_15 = arith.constant 0 : index
      %c0_16 = arith.constant 0 : index
      %c0_17 = arith.constant 0 : index
      %19 = vector.load %arg5[%c0_15, %c0_16, %c0_17] : memref<1x64x128xf32, #tpu.memory_space<vmem>>, vector<1x64x128xf32>
      %20 = vector.shape_cast %19 : vector<1x64x128xf32> to vector<64x128xf32>
      %21 = vector.shape_cast %18 : vector<64x128xf32> to vector<1x64x128xf32>
      tpu.vector_store %arg5[%c0_15, %c0_16, %c0_17], %21 {strides = array<i32>} : memref<1x64x128xf32, #tpu.memory_space<vmem>>, vector<1x64x128xf32>,
      %cst_18 = arith.constant dense<0.000000e+00> : vector<128xf32>
      %22 = vector.multi_reduction <add>, %18, %cst_18 [0] : vector<64x128xf32> to vector<128xf32>
      %23 = vector.shape_cast %22 : vector<128xf32> to vector<1x128xf32>
      %24 = arith.mulf %18, %18 : vector<64x128xf32>
      %cst_19 = arith.constant dense<0.000000e+00> : vector<128xf32>
      %25 = vector.multi_reduction <add>, %24, %cst_19 [0] : vector<64x128xf32> to vector<128xf32>
      %26 = vector.shape_cast %25 : vector<128xf32> to vector<1x128xf32>
      %c0_20 = arith.constant 0 : index
      %c0_21 = arith.constant 0 : index
      %c0_22 = arith.constant 0 : index
      %27 = vector.load %arg6[%c0_20, %c0_21, %c0_22] : memref<1x2x128xf32, #tpu.memory_space<vmem>>, vector<1x2x128xf32>
      %28 = vector.shape_cast %27 : vector<1x2x128xf32> to vector<2x128xf32>
      %29 = tpu.concatenate %23, %26 in 0 : vector<1x128xf32>, vector<1x128xf32> -> vector<2x128xf32>
      %30 = arith.addf %28, %29 : vector<2x128xf32>
      %c0_23 = arith.constant 0 : index
      %c0_24 = arith.constant 0 : index
      %c0_25 = arith.constant 0 : index
      %31 = vector.load %arg6[%c0_23, %c0_24, %c0_25] : memref<1x2x128xf32, #tpu.memory_space<vmem>>, vector<1x2x128xf32>
      %32 = vector.shape_cast %31 : vector<1x2x128xf32> to vector<2x128xf32>
      %33 = vector.shape_cast %30 : vector<2x128xf32> to vector<1x2x128xf32>
      tpu.vector_store %arg6[%c0_23, %c0_24, %c0_25], %33 {strides = array<i32>} : memref<1x2x128xf32, #tpu.memory_space<vmem>>, vector<1x2x128xf32>,
    } else {
    }
    return
  }
  func.func @transform_0(%arg0: i32, %arg1: i32, %arg2: i32) -> (i32, i32, i32) {
    %c0_i32 = arith.constant 0 : i32
    return %arg0, %arg1, %arg2 : i32, i32, i32
  }
  func.func @transform_1(%arg0: i32, %arg1: i32, %arg2: i32) -> (i32, i32) {
    %c0_i32 = arith.constant 0 : i32
    %c0_i32_0 = arith.constant 0 : i32
    return %arg2, %c0_i32 : i32, i32
  }
  func.func @transform_2(%arg0: i32, %arg1: i32, %arg2: i32) -> (i32, i32, i32) {
    %c0_i32 = arith.constant 0 : i32
    %c0_i32_0 = arith.constant 0 : i32
    return %arg0, %arg1, %c0_i32 : i32, i32, i32
  }
  func.func @transform_3(%arg0: i32, %arg1: i32, %arg2: i32) -> (i32, i32, i32) {
    %c0_i32 = arith.constant 0 : i32
    %c0_i32_0 = arith.constant 0 : i32
    %c0_i32_1 = arith.constant 0 : i32
    return %arg0, %c0_i32, %c0_i32_0 : i32, i32, i32
  }
}

module attributes {stable_mosaic.version = 11 : i64} {
  func.func @_norm_act_kernel(%arg0: i32, %arg1: i32, %arg2: memref<1x64x128xf32, #tpu.memory_space<vmem>>, %arg3: memref<1x2x128xf32, #tpu.memory_space<vmem>>, %arg4: memref<1x64x128xbf16, #tpu.memory_space<vmem>>) attributes {dimension_semantics = [#tpu.dimension_semantics<parallel>, #tpu.dimension_semantics<parallel>], iteration_bounds = array<i64: 2, 1>, scalar_prefetch = 0 : i64, scratch_operands = 0 : i64, tpu.core_type = #tpu.core_type<tc>, window_params = [{transform_indices = @transform_0, window_bounds = array<i64: 1, 64, 128>}, {transform_indices = @transform_1, window_bounds = array<i64: 1, 2, 128>}, {transform_indices = @transform_2, window_bounds = array<i64: 1, 64, 128>}]} {
    %c0 = arith.constant 0 : index
    %c0_0 = arith.constant 0 : index
    %c0_1 = arith.constant 0 : index
    %0 = vector.load %arg2[%c0, %c0_0, %c0_1] : memref<1x64x128xf32, #tpu.memory_space<vmem>>, vector<1x64x128xf32>
    %1 = vector.shape_cast %0 : vector<1x64x128xf32> to vector<64x128xf32>
    %c0_2 = arith.constant 0 : index
    %c0_3 = arith.constant 0 : index
    %c0_4 = arith.constant 0 : index
    %2 = vector.load %arg3[%c0_2, %c0_3, %c0_4] : memref<1x2x128xf32, #tpu.memory_space<vmem>>, vector<1x2x128xf32>
    %3 = vector.shape_cast %2 : vector<1x2x128xf32> to vector<2x128xf32>
    %4 = vector.extract_strided_slice %3 {offsets = [0, 0], sizes = [1, 128], strides = [1, 1]} : vector<2x128xf32> to vector<1x128xf32>
    %cst = arith.constant 1.562500e-02 : f32
    %5 = vector.broadcast %cst : f32 to vector<1x128xf32>
    %6 = arith.mulf %4, %5 : vector<1x128xf32>
    %7 = vector.extract_strided_slice %3 {offsets = [1, 0], sizes = [1, 128], strides = [1, 1]} : vector<2x128xf32> to vector<1x128xf32>
    %cst_5 = arith.constant 1.562500e-02 : f32
    %8 = vector.broadcast %cst_5 : f32 to vector<1x128xf32>
    %9 = arith.mulf %7, %8 : vector<1x128xf32>
    %10 = arith.mulf %6, %6 : vector<1x128xf32>
    %11 = arith.subf %9, %10 : vector<1x128xf32>
    %cst_6 = arith.constant 0.000000e+00 : f32
    %12 = vector.broadcast %cst_6 : f32 to vector<1x128xf32>
    %13 = arith.maximumf %11, %12 : vector<1x128xf32>
    %14 = vector.broadcast %6 : vector<1x128xf32> to vector<64x128xf32>
    %15 = arith.subf %1, %14 : vector<64x128xf32>
    %cst_7 = arith.constant 9.99999974E-6 : f32
    %16 = vector.broadcast %cst_7 : f32 to vector<1x128xf32>
    %17 = arith.addf %13, %16 : vector<1x128xf32>
    %18 = math.rsqrt %17 : vector<1x128xf32>
    %19 = vector.broadcast %18 : vector<1x128xf32> to vector<64x128xf32>
    %20 = arith.mulf %15, %19 : vector<64x128xf32>
    %cst_8 = arith.constant 0.000000e+00 : f32
    %21 = vector.broadcast %cst_8 : f32 to vector<64x128xf32>
    %22 = arith.cmpf oge, %20, %21 : vector<64x128xf32>
    %cst_9 = arith.constant 2.000000e-01 : f32
    %23 = vector.broadcast %cst_9 : f32 to vector<64x128xf32>
    %24 = arith.mulf %23, %20 : vector<64x128xf32>
    %25 = arith.select %22, %20, %24 : vector<64x128xi1>, vector<64x128xf32>
    %26 = arith.truncf %25 : vector<64x128xf32> to vector<64x128xbf16>
    %c0_10 = arith.constant 0 : index
    %c0_11 = arith.constant 0 : index
    %c0_12 = arith.constant 0 : index
    %27 = vector.load %arg4[%c0_10, %c0_11, %c0_12] : memref<1x64x128xbf16, #tpu.memory_space<vmem>>, vector<1x64x128xbf16>
    %28 = vector.shape_cast %27 : vector<1x64x128xbf16> to vector<64x128xbf16>
    %29 = vector.shape_cast %26 : vector<64x128xbf16> to vector<1x64x128xbf16>
    tpu.vector_store %arg4[%c0_10, %c0_11, %c0_12], %29 {strides = array<i32>} : memref<1x64x128xbf16, #tpu.memory_space<vmem>>, vector<1x64x128xbf16>,
    return
  }
  func.func @transform_0(%arg0: i32, %arg1: i32) -> (i32, i32, i32) {
    %c0_i32 = arith.constant 0 : i32
    %c0_i32_0 = arith.constant 0 : i32
    return %arg0, %arg1, %c0_i32 : i32, i32, i32
  }
  func.func @transform_1(%arg0: i32, %arg1: i32) -> (i32, i32, i32) {
    %c0_i32 = arith.constant 0 : i32
    %c0_i32_0 = arith.constant 0 : i32
    %c0_i32_1 = arith.constant 0 : i32
    return %arg0, %c0_i32, %c0_i32_0 : i32, i32, i32
  }
  func.func @transform_2(%arg0: i32, %arg1: i32) -> (i32, i32, i32) {
    %c0_i32 = arith.constant 0 : i32
    %c0_i32_0 = arith.constant 0 : i32
    return %arg0, %arg1, %c0_i32 : i32, i32, i32
  }
}

module attributes {stable_mosaic.version = 11 : i64} {
  func.func @_conv_kernel(%arg0: i32, %arg1: i32, %arg2: i32, %arg3: memref<1x16x512xbf16, #tpu.memory_space<vmem>>, %arg4: memref<512x256xbf16, #tpu.memory_space<vmem>>, %arg5: memref<1x16x256xf32, #tpu.memory_space<vmem>>, %arg6: memref<1x2x256xf32, #tpu.memory_space<vmem>>, %arg7: memref<16x256xf32, #tpu.memory_space<vmem>>) attributes {dimension_semantics = [#tpu.dimension_semantics<parallel>, #tpu.dimension_semantics<arbitrary>, #tpu.dimension_semantics<arbitrary>], iteration_bounds = array<i64: 2, 1, 4>, scalar_prefetch = 0 : i64, scratch_operands = 1 : i64, tpu.core_type = #tpu.core_type<tc>, window_params = [{transform_indices = @transform_0, window_bounds = array<i64: 1, 16, 512>}, {transform_indices = @transform_1, window_bounds = array<i64: 512, 256>}, {transform_indices = @transform_2, window_bounds = array<i64: 1, 16, 256>}, {transform_indices = @transform_3, window_bounds = array<i64: 1, 2, 256>}]} {
    %c0_i32 = arith.constant 0 : i32
    %0 = arith.cmpi eq, %arg2, %c0_i32 : i32
    %1 = arith.extui %0 : i1 to i32
    %c0_i32_0 = arith.constant 0 : i32
    %2 = arith.cmpi ne, %1, %c0_i32_0 : i32
    scf.if %2 {
      %cst_13 = arith.constant 0.000000e+00 : f32
      %18 = vector.broadcast %cst_13 : f32 to vector<16x256xf32>
      %c0_14 = arith.constant 0 : index
      %c0_15 = arith.constant 0 : index
      %19 = vector.load %arg7[%c0_14, %c0_15] : memref<16x256xf32, #tpu.memory_space<vmem>>, vector<16x256xf32>
      tpu.vector_store %arg7[%c0_14, %c0_15], %18 {strides = array<i32>} : memref<16x256xf32, #tpu.memory_space<vmem>>, vector<16x256xf32>,
    } else {
    }
    %c0_i32_1 = arith.constant 0 : i32
    %3 = arith.cmpi eq, %arg1, %c0_i32_1 : i32
    %c0_i32_2 = arith.constant 0 : i32
    %4 = arith.cmpi eq, %arg2, %c0_i32_2 : i32
    %5 = arith.andi %3, %4 : i1
    %6 = arith.extui %5 : i1 to i32
    %c0_i32_3 = arith.constant 0 : i32
    %7 = arith.cmpi ne, %6, %c0_i32_3 : i32
    scf.if %7 {
      %cst_13 = arith.constant 0.000000e+00 : f32
      %18 = vector.broadcast %cst_13 : f32 to vector<2x256xf32>
      %c0_14 = arith.constant 0 : index
      %c0_15 = arith.constant 0 : index
      %c0_16 = arith.constant 0 : index
      %19 = vector.load %arg6[%c0_14, %c0_15, %c0_16] : memref<1x2x256xf32, #tpu.memory_space<vmem>>, vector<1x2x256xf32>
      %20 = vector.shape_cast %19 : vector<1x2x256xf32> to vector<2x256xf32>
      %21 = vector.shape_cast %18 : vector<2x256xf32> to vector<1x2x256xf32>
      tpu.vector_store %arg6[%c0_14, %c0_15, %c0_16], %21 {strides = array<i32>} : memref<1x2x256xf32, #tpu.memory_space<vmem>>, vector<1x2x256xf32>,
    } else {
    }
    %c0 = arith.constant 0 : index
    %c0_4 = arith.constant 0 : index
    %8 = vector.load %arg7[%c0, %c0_4] : memref<16x256xf32, #tpu.memory_space<vmem>>, vector<16x256xf32>
    %c0_5 = arith.constant 0 : index
    %c0_6 = arith.constant 0 : index
    %c0_7 = arith.constant 0 : index
    %9 = vector.load %arg3[%c0_5, %c0_6, %c0_7] : memref<1x16x512xbf16, #tpu.memory_space<vmem>>, vector<1x16x512xbf16>
    %10 = vector.shape_cast %9 : vector<1x16x512xbf16> to vector<16x512xbf16>
    %c0_8 = arith.constant 0 : index
    %c0_9 = arith.constant 0 : index
    %11 = vector.load %arg4[%c0_8, %c0_9] : memref<512x256xbf16, #tpu.memory_space<vmem>>, vector<512x256xbf16>
    %cst = arith.constant dense<0.000000e+00> : vector<16x256xf32>
    %12 = tpu.matmul %10, %11, %cst {dimension_numbers = #tpu.dot_dimension_numbers<[1], [0], [0], [1], [0, 0, 1, 1], [], []>} : vector<16x512xbf16>, vector<512x256xbf16>, vector<16x256xf32> -> vector<16x256xf32>
    %13 = arith.addf %8, %12 : vector<16x256xf32>
    %c0_10 = arith.constant 0 : index
    %c0_11 = arith.constant 0 : index
    %14 = vector.load %arg7[%c0_10, %c0_11] : memref<16x256xf32, #tpu.memory_space<vmem>>, vector<16x256xf32>
    tpu.vector_store %arg7[%c0_10, %c0_11], %13 {strides = array<i32>} : memref<16x256xf32, #tpu.memory_space<vmem>>, vector<16x256xf32>,
    %c3_i32 = arith.constant 3 : i32
    %15 = arith.cmpi eq, %arg2, %c3_i32 : i32
    %16 = arith.extui %15 : i1 to i32
    %c0_i32_12 = arith.constant 0 : i32
    %17 = arith.cmpi ne, %16, %c0_i32_12 : i32
    scf.if %17 {
      %c0_13 = arith.constant 0 : index
      %c0_14 = arith.constant 0 : index
      %18 = vector.load %arg7[%c0_13, %c0_14] : memref<16x256xf32, #tpu.memory_space<vmem>>, vector<16x256xf32>
      %c0_15 = arith.constant 0 : index
      %c0_16 = arith.constant 0 : index
      %c0_17 = arith.constant 0 : index
      %19 = vector.load %arg5[%c0_15, %c0_16, %c0_17] : memref<1x16x256xf32, #tpu.memory_space<vmem>>, vector<1x16x256xf32>
      %20 = vector.shape_cast %19 : vector<1x16x256xf32> to vector<16x256xf32>
      %21 = vector.shape_cast %18 : vector<16x256xf32> to vector<1x16x256xf32>
      tpu.vector_store %arg5[%c0_15, %c0_16, %c0_17], %21 {strides = array<i32>} : memref<1x16x256xf32, #tpu.memory_space<vmem>>, vector<1x16x256xf32>,
      %cst_18 = arith.constant dense<0.000000e+00> : vector<256xf32>
      %22 = vector.multi_reduction <add>, %18, %cst_18 [0] : vector<16x256xf32> to vector<256xf32>
      %23 = vector.shape_cast %22 : vector<256xf32> to vector<1x256xf32>
      %24 = arith.mulf %18, %18 : vector<16x256xf32>
      %cst_19 = arith.constant dense<0.000000e+00> : vector<256xf32>
      %25 = vector.multi_reduction <add>, %24, %cst_19 [0] : vector<16x256xf32> to vector<256xf32>
      %26 = vector.shape_cast %25 : vector<256xf32> to vector<1x256xf32>
      %c0_20 = arith.constant 0 : index
      %c0_21 = arith.constant 0 : index
      %c0_22 = arith.constant 0 : index
      %27 = vector.load %arg6[%c0_20, %c0_21, %c0_22] : memref<1x2x256xf32, #tpu.memory_space<vmem>>, vector<1x2x256xf32>
      %28 = vector.shape_cast %27 : vector<1x2x256xf32> to vector<2x256xf32>
      %29 = tpu.concatenate %23, %26 in 0 : vector<1x256xf32>, vector<1x256xf32> -> vector<2x256xf32>
      %30 = arith.addf %28, %29 : vector<2x256xf32>
      %c0_23 = arith.constant 0 : index
      %c0_24 = arith.constant 0 : index
      %c0_25 = arith.constant 0 : index
      %31 = vector.load %arg6[%c0_23, %c0_24, %c0_25] : memref<1x2x256xf32, #tpu.memory_space<vmem>>, vector<1x2x256xf32>
      %32 = vector.shape_cast %31 : vector<1x2x256xf32> to vector<2x256xf32>
      %33 = vector.shape_cast %30 : vector<2x256xf32> to vector<1x2x256xf32>
      tpu.vector_store %arg6[%c0_23, %c0_24, %c0_25], %33 {strides = array<i32>} : memref<1x2x256xf32, #tpu.memory_space<vmem>>, vector<1x2x256xf32>,
    } else {
    }
    return
  }
  func.func @transform_0(%arg0: i32, %arg1: i32, %arg2: i32) -> (i32, i32, i32) {
    %c0_i32 = arith.constant 0 : i32
    return %arg0, %arg1, %arg2 : i32, i32, i32
  }
  func.func @transform_1(%arg0: i32, %arg1: i32, %arg2: i32) -> (i32, i32) {
    %c0_i32 = arith.constant 0 : i32
    %c0_i32_0 = arith.constant 0 : i32
    return %arg2, %c0_i32 : i32, i32
  }
  func.func @transform_2(%arg0: i32, %arg1: i32, %arg2: i32) -> (i32, i32, i32) {
    %c0_i32 = arith.constant 0 : i32
    %c0_i32_0 = arith.constant 0 : i32
    return %arg0, %arg1, %c0_i32 : i32, i32, i32
  }
  func.func @transform_3(%arg0: i32, %arg1: i32, %arg2: i32) -> (i32, i32, i32) {
    %c0_i32 = arith.constant 0 : i32
    %c0_i32_0 = arith.constant 0 : i32
    %c0_i32_1 = arith.constant 0 : i32
    return %arg0, %c0_i32, %c0_i32_0 : i32, i32, i32
  }
}

module attributes {stable_mosaic.version = 11 : i64} {
  func.func @_norm_act_kernel(%arg0: i32, %arg1: i32, %arg2: memref<1x16x256xf32, #tpu.memory_space<vmem>>, %arg3: memref<1x2x256xf32, #tpu.memory_space<vmem>>, %arg4: memref<1x16x256xbf16, #tpu.memory_space<vmem>>) attributes {dimension_semantics = [#tpu.dimension_semantics<parallel>, #tpu.dimension_semantics<parallel>], iteration_bounds = array<i64: 2, 1>, scalar_prefetch = 0 : i64, scratch_operands = 0 : i64, tpu.core_type = #tpu.core_type<tc>, window_params = [{transform_indices = @transform_0, window_bounds = array<i64: 1, 16, 256>}, {transform_indices = @transform_1, window_bounds = array<i64: 1, 2, 256>}, {transform_indices = @transform_2, window_bounds = array<i64: 1, 16, 256>}]} {
    %c0 = arith.constant 0 : index
    %c0_0 = arith.constant 0 : index
    %c0_1 = arith.constant 0 : index
    %0 = vector.load %arg2[%c0, %c0_0, %c0_1] : memref<1x16x256xf32, #tpu.memory_space<vmem>>, vector<1x16x256xf32>
    %1 = vector.shape_cast %0 : vector<1x16x256xf32> to vector<16x256xf32>
    %c0_2 = arith.constant 0 : index
    %c0_3 = arith.constant 0 : index
    %c0_4 = arith.constant 0 : index
    %2 = vector.load %arg3[%c0_2, %c0_3, %c0_4] : memref<1x2x256xf32, #tpu.memory_space<vmem>>, vector<1x2x256xf32>
    %3 = vector.shape_cast %2 : vector<1x2x256xf32> to vector<2x256xf32>
    %4 = vector.extract_strided_slice %3 {offsets = [0, 0], sizes = [1, 256], strides = [1, 1]} : vector<2x256xf32> to vector<1x256xf32>
    %cst = arith.constant 6.250000e-02 : f32
    %5 = vector.broadcast %cst : f32 to vector<1x256xf32>
    %6 = arith.mulf %4, %5 : vector<1x256xf32>
    %7 = vector.extract_strided_slice %3 {offsets = [1, 0], sizes = [1, 256], strides = [1, 1]} : vector<2x256xf32> to vector<1x256xf32>
    %cst_5 = arith.constant 6.250000e-02 : f32
    %8 = vector.broadcast %cst_5 : f32 to vector<1x256xf32>
    %9 = arith.mulf %7, %8 : vector<1x256xf32>
    %10 = arith.mulf %6, %6 : vector<1x256xf32>
    %11 = arith.subf %9, %10 : vector<1x256xf32>
    %cst_6 = arith.constant 0.000000e+00 : f32
    %12 = vector.broadcast %cst_6 : f32 to vector<1x256xf32>
    %13 = arith.maximumf %11, %12 : vector<1x256xf32>
    %14 = vector.broadcast %6 : vector<1x256xf32> to vector<16x256xf32>
    %15 = arith.subf %1, %14 : vector<16x256xf32>
    %cst_7 = arith.constant 9.99999974E-6 : f32
    %16 = vector.broadcast %cst_7 : f32 to vector<1x256xf32>
    %17 = arith.addf %13, %16 : vector<1x256xf32>
    %18 = math.rsqrt %17 : vector<1x256xf32>
    %19 = vector.broadcast %18 : vector<1x256xf32> to vector<16x256xf32>
    %20 = arith.mulf %15, %19 : vector<16x256xf32>
    %cst_8 = arith.constant 0.000000e+00 : f32
    %21 = vector.broadcast %cst_8 : f32 to vector<16x256xf32>
    %22 = arith.cmpf oge, %20, %21 : vector<16x256xf32>
    %cst_9 = arith.constant 2.000000e-01 : f32
    %23 = vector.broadcast %cst_9 : f32 to vector<16x256xf32>
    %24 = arith.mulf %23, %20 : vector<16x256xf32>
    %25 = arith.select %22, %20, %24 : vector<16x256xi1>, vector<16x256xf32>
    %26 = arith.truncf %25 : vector<16x256xf32> to vector<16x256xbf16>
    %c0_10 = arith.constant 0 : index
    %c0_11 = arith.constant 0 : index
    %c0_12 = arith.constant 0 : index
    %27 = vector.load %arg4[%c0_10, %c0_11, %c0_12] : memref<1x16x256xbf16, #tpu.memory_space<vmem>>, vector<1x16x256xbf16>
    %28 = vector.shape_cast %27 : vector<1x16x256xbf16> to vector<16x256xbf16>
    %29 = vector.shape_cast %26 : vector<16x256xbf16> to vector<1x16x256xbf16>
    tpu.vector_store %arg4[%c0_10, %c0_11, %c0_12], %29 {strides = array<i32>} : memref<1x16x256xbf16, #tpu.memory_space<vmem>>, vector<1x16x256xbf16>,
    return
  }
  func.func @transform_0(%arg0: i32, %arg1: i32) -> (i32, i32, i32) {
    %c0_i32 = arith.constant 0 : i32
    %c0_i32_0 = arith.constant 0 : i32
    return %arg0, %arg1, %c0_i32 : i32, i32, i32
  }
  func.func @transform_1(%arg0: i32, %arg1: i32) -> (i32, i32, i32) {
    %c0_i32 = arith.constant 0 : i32
    %c0_i32_0 = arith.constant 0 : i32
    %c0_i32_1 = arith.constant 0 : i32
    return %arg0, %c0_i32, %c0_i32_0 : i32, i32, i32
  }
  func.func @transform_2(%arg0: i32, %arg1: i32) -> (i32, i32, i32) {
    %c0_i32 = arith.constant 0 : i32
    %c0_i32_0 = arith.constant 0 : i32
    return %arg0, %arg1, %c0_i32 : i32, i32, i32
  }
}

module attributes {stable_mosaic.version = 11 : i64} {
  func.func @_conv_kernel(%arg0: i32, %arg1: i32, %arg2: i32, %arg3: memref<1x9x512xbf16, #tpu.memory_space<vmem>>, %arg4: memref<512x512xbf16, #tpu.memory_space<vmem>>, %arg5: memref<1x9x512xf32, #tpu.memory_space<vmem>>, %arg6: memref<1x2x512xf32, #tpu.memory_space<vmem>>, %arg7: memref<9x512xf32, #tpu.memory_space<vmem>>) attributes {dimension_semantics = [#tpu.dimension_semantics<parallel>, #tpu.dimension_semantics<arbitrary>, #tpu.dimension_semantics<arbitrary>], iteration_bounds = array<i64: 2, 1, 8>, scalar_prefetch = 0 : i64, scratch_operands = 1 : i64, tpu.core_type = #tpu.core_type<tc>, window_params = [{transform_indices = @transform_0, window_bounds = array<i64: 1, 9, 512>}, {transform_indices = @transform_1, window_bounds = array<i64: 512, 512>}, {transform_indices = @transform_2, window_bounds = array<i64: 1, 9, 512>}, {transform_indices = @transform_3, window_bounds = array<i64: 1, 2, 512>}]} {
    %c0_i32 = arith.constant 0 : i32
    %0 = arith.cmpi eq, %arg2, %c0_i32 : i32
    %1 = arith.extui %0 : i1 to i32
    %c0_i32_0 = arith.constant 0 : i32
    %2 = arith.cmpi ne, %1, %c0_i32_0 : i32
    scf.if %2 {
      %cst_13 = arith.constant 0.000000e+00 : f32
      %18 = vector.broadcast %cst_13 : f32 to vector<9x512xf32>
      %c0_14 = arith.constant 0 : index
      %c0_15 = arith.constant 0 : index
      %19 = vector.load %arg7[%c0_14, %c0_15] : memref<9x512xf32, #tpu.memory_space<vmem>>, vector<9x512xf32>
      tpu.vector_store %arg7[%c0_14, %c0_15], %18 {strides = array<i32>} : memref<9x512xf32, #tpu.memory_space<vmem>>, vector<9x512xf32>,
    } else {
    }
    %c0_i32_1 = arith.constant 0 : i32
    %3 = arith.cmpi eq, %arg1, %c0_i32_1 : i32
    %c0_i32_2 = arith.constant 0 : i32
    %4 = arith.cmpi eq, %arg2, %c0_i32_2 : i32
    %5 = arith.andi %3, %4 : i1
    %6 = arith.extui %5 : i1 to i32
    %c0_i32_3 = arith.constant 0 : i32
    %7 = arith.cmpi ne, %6, %c0_i32_3 : i32
    scf.if %7 {
      %cst_13 = arith.constant 0.000000e+00 : f32
      %18 = vector.broadcast %cst_13 : f32 to vector<2x512xf32>
      %c0_14 = arith.constant 0 : index
      %c0_15 = arith.constant 0 : index
      %c0_16 = arith.constant 0 : index
      %19 = vector.load %arg6[%c0_14, %c0_15, %c0_16] : memref<1x2x512xf32, #tpu.memory_space<vmem>>, vector<1x2x512xf32>
      %20 = vector.shape_cast %19 : vector<1x2x512xf32> to vector<2x512xf32>
      %21 = vector.shape_cast %18 : vector<2x512xf32> to vector<1x2x512xf32>
      tpu.vector_store %arg6[%c0_14, %c0_15, %c0_16], %21 {strides = array<i32>} : memref<1x2x512xf32, #tpu.memory_space<vmem>>, vector<1x2x512xf32>,
    } else {
    }
    %c0 = arith.constant 0 : index
    %c0_4 = arith.constant 0 : index
    %8 = vector.load %arg7[%c0, %c0_4] : memref<9x512xf32, #tpu.memory_space<vmem>>, vector<9x512xf32>
    %c0_5 = arith.constant 0 : index
    %c0_6 = arith.constant 0 : index
    %c0_7 = arith.constant 0 : index
    %9 = vector.load %arg3[%c0_5, %c0_6, %c0_7] : memref<1x9x512xbf16, #tpu.memory_space<vmem>>, vector<1x9x512xbf16>
    %10 = vector.shape_cast %9 : vector<1x9x512xbf16> to vector<9x512xbf16>
    %c0_8 = arith.constant 0 : index
    %c0_9 = arith.constant 0 : index
    %11 = vector.load %arg4[%c0_8, %c0_9] : memref<512x512xbf16, #tpu.memory_space<vmem>>, vector<512x512xbf16>
    %cst = arith.constant dense<0.000000e+00> : vector<9x512xf32>
    %12 = tpu.matmul %10, %11, %cst {dimension_numbers = #tpu.dot_dimension_numbers<[1], [0], [0], [1], [0, 0, 1, 1], [], []>} : vector<9x512xbf16>, vector<512x512xbf16>, vector<9x512xf32> -> vector<9x512xf32>
    %13 = arith.addf %8, %12 : vector<9x512xf32>
    %c0_10 = arith.constant 0 : index
    %c0_11 = arith.constant 0 : index
    %14 = vector.load %arg7[%c0_10, %c0_11] : memref<9x512xf32, #tpu.memory_space<vmem>>, vector<9x512xf32>
    tpu.vector_store %arg7[%c0_10, %c0_11], %13 {strides = array<i32>} : memref<9x512xf32, #tpu.memory_space<vmem>>, vector<9x512xf32>,
    %c7_i32 = arith.constant 7 : i32
    %15 = arith.cmpi eq, %arg2, %c7_i32 : i32
    %16 = arith.extui %15 : i1 to i32
    %c0_i32_12 = arith.constant 0 : i32
    %17 = arith.cmpi ne, %16, %c0_i32_12 : i32
    scf.if %17 {
      %c0_13 = arith.constant 0 : index
      %c0_14 = arith.constant 0 : index
      %18 = vector.load %arg7[%c0_13, %c0_14] : memref<9x512xf32, #tpu.memory_space<vmem>>, vector<9x512xf32>
      %c0_15 = arith.constant 0 : index
      %c0_16 = arith.constant 0 : index
      %c0_17 = arith.constant 0 : index
      %19 = vector.load %arg5[%c0_15, %c0_16, %c0_17] : memref<1x9x512xf32, #tpu.memory_space<vmem>>, vector<1x9x512xf32>
      %20 = vector.shape_cast %19 : vector<1x9x512xf32> to vector<9x512xf32>
      %21 = vector.shape_cast %18 : vector<9x512xf32> to vector<1x9x512xf32>
      tpu.vector_store %arg5[%c0_15, %c0_16, %c0_17], %21 {strides = array<i32>} : memref<1x9x512xf32, #tpu.memory_space<vmem>>, vector<1x9x512xf32>,
      %cst_18 = arith.constant dense<0.000000e+00> : vector<512xf32>
      %22 = vector.multi_reduction <add>, %18, %cst_18 [0] : vector<9x512xf32> to vector<512xf32>
      %23 = vector.shape_cast %22 : vector<512xf32> to vector<1x512xf32>
      %24 = arith.mulf %18, %18 : vector<9x512xf32>
      %cst_19 = arith.constant dense<0.000000e+00> : vector<512xf32>
      %25 = vector.multi_reduction <add>, %24, %cst_19 [0] : vector<9x512xf32> to vector<512xf32>
      %26 = vector.shape_cast %25 : vector<512xf32> to vector<1x512xf32>
      %c0_20 = arith.constant 0 : index
      %c0_21 = arith.constant 0 : index
      %c0_22 = arith.constant 0 : index
      %27 = vector.load %arg6[%c0_20, %c0_21, %c0_22] : memref<1x2x512xf32, #tpu.memory_space<vmem>>, vector<1x2x512xf32>
      %28 = vector.shape_cast %27 : vector<1x2x512xf32> to vector<2x512xf32>
      %29 = tpu.concatenate %23, %26 in 0 : vector<1x512xf32>, vector<1x512xf32> -> vector<2x512xf32>
      %30 = arith.addf %28, %29 : vector<2x512xf32>
      %c0_23 = arith.constant 0 : index
      %c0_24 = arith.constant 0 : index
      %c0_25 = arith.constant 0 : index
      %31 = vector.load %arg6[%c0_23, %c0_24, %c0_25] : memref<1x2x512xf32, #tpu.memory_space<vmem>>, vector<1x2x512xf32>
      %32 = vector.shape_cast %31 : vector<1x2x512xf32> to vector<2x512xf32>
      %33 = vector.shape_cast %30 : vector<2x512xf32> to vector<1x2x512xf32>
      tpu.vector_store %arg6[%c0_23, %c0_24, %c0_25], %33 {strides = array<i32>} : memref<1x2x512xf32, #tpu.memory_space<vmem>>, vector<1x2x512xf32>,
    } else {
    }
    return
  }
  func.func @transform_0(%arg0: i32, %arg1: i32, %arg2: i32) -> (i32, i32, i32) {
    %c0_i32 = arith.constant 0 : i32
    return %arg0, %arg1, %arg2 : i32, i32, i32
  }
  func.func @transform_1(%arg0: i32, %arg1: i32, %arg2: i32) -> (i32, i32) {
    %c0_i32 = arith.constant 0 : i32
    %c0_i32_0 = arith.constant 0 : i32
    return %arg2, %c0_i32 : i32, i32
  }
  func.func @transform_2(%arg0: i32, %arg1: i32, %arg2: i32) -> (i32, i32, i32) {
    %c0_i32 = arith.constant 0 : i32
    %c0_i32_0 = arith.constant 0 : i32
    return %arg0, %arg1, %c0_i32 : i32, i32, i32
  }
  func.func @transform_3(%arg0: i32, %arg1: i32, %arg2: i32) -> (i32, i32, i32) {
    %c0_i32 = arith.constant 0 : i32
    %c0_i32_0 = arith.constant 0 : i32
    %c0_i32_1 = arith.constant 0 : i32
    return %arg0, %c0_i32, %c0_i32_0 : i32, i32, i32
  }
}

module attributes {stable_mosaic.version = 11 : i64} {
  func.func @_norm_act_kernel(%arg0: i32, %arg1: i32, %arg2: memref<1x9x512xf32, #tpu.memory_space<vmem>>, %arg3: memref<1x2x512xf32, #tpu.memory_space<vmem>>, %arg4: memref<1x9x512xbf16, #tpu.memory_space<vmem>>) attributes {dimension_semantics = [#tpu.dimension_semantics<parallel>, #tpu.dimension_semantics<parallel>], iteration_bounds = array<i64: 2, 1>, scalar_prefetch = 0 : i64, scratch_operands = 0 : i64, tpu.core_type = #tpu.core_type<tc>, window_params = [{transform_indices = @transform_0, window_bounds = array<i64: 1, 9, 512>}, {transform_indices = @transform_1, window_bounds = array<i64: 1, 2, 512>}, {transform_indices = @transform_2, window_bounds = array<i64: 1, 9, 512>}]} {
    %c0 = arith.constant 0 : index
    %c0_0 = arith.constant 0 : index
    %c0_1 = arith.constant 0 : index
    %0 = vector.load %arg2[%c0, %c0_0, %c0_1] : memref<1x9x512xf32, #tpu.memory_space<vmem>>, vector<1x9x512xf32>
    %1 = vector.shape_cast %0 : vector<1x9x512xf32> to vector<9x512xf32>
    %c0_2 = arith.constant 0 : index
    %c0_3 = arith.constant 0 : index
    %c0_4 = arith.constant 0 : index
    %2 = vector.load %arg3[%c0_2, %c0_3, %c0_4] : memref<1x2x512xf32, #tpu.memory_space<vmem>>, vector<1x2x512xf32>
    %3 = vector.shape_cast %2 : vector<1x2x512xf32> to vector<2x512xf32>
    %4 = vector.extract_strided_slice %3 {offsets = [0, 0], sizes = [1, 512], strides = [1, 1]} : vector<2x512xf32> to vector<1x512xf32>
    %cst = arith.constant 0.111111112 : f32
    %5 = vector.broadcast %cst : f32 to vector<1x512xf32>
    %6 = arith.mulf %4, %5 : vector<1x512xf32>
    %7 = vector.extract_strided_slice %3 {offsets = [1, 0], sizes = [1, 512], strides = [1, 1]} : vector<2x512xf32> to vector<1x512xf32>
    %cst_5 = arith.constant 0.111111112 : f32
    %8 = vector.broadcast %cst_5 : f32 to vector<1x512xf32>
    %9 = arith.mulf %7, %8 : vector<1x512xf32>
    %10 = arith.mulf %6, %6 : vector<1x512xf32>
    %11 = arith.subf %9, %10 : vector<1x512xf32>
    %cst_6 = arith.constant 0.000000e+00 : f32
    %12 = vector.broadcast %cst_6 : f32 to vector<1x512xf32>
    %13 = arith.maximumf %11, %12 : vector<1x512xf32>
    %14 = vector.broadcast %6 : vector<1x512xf32> to vector<9x512xf32>
    %15 = arith.subf %1, %14 : vector<9x512xf32>
    %cst_7 = arith.constant 9.99999974E-6 : f32
    %16 = vector.broadcast %cst_7 : f32 to vector<1x512xf32>
    %17 = arith.addf %13, %16 : vector<1x512xf32>
    %18 = math.rsqrt %17 : vector<1x512xf32>
    %19 = vector.broadcast %18 : vector<1x512xf32> to vector<9x512xf32>
    %20 = arith.mulf %15, %19 : vector<9x512xf32>
    %cst_8 = arith.constant 0.000000e+00 : f32
    %21 = vector.broadcast %cst_8 : f32 to vector<9x512xf32>
    %22 = arith.cmpf oge, %20, %21 : vector<9x512xf32>
    %cst_9 = arith.constant 2.000000e-01 : f32
    %23 = vector.broadcast %cst_9 : f32 to vector<9x512xf32>
    %24 = arith.mulf %23, %20 : vector<9x512xf32>
    %25 = arith.select %22, %20, %24 : vector<9x512xi1>, vector<9x512xf32>
    %26 = arith.truncf %25 : vector<9x512xf32> to vector<9x512xbf16>
    %c0_10 = arith.constant 0 : index
    %c0_11 = arith.constant 0 : index
    %c0_12 = arith.constant 0 : index
    %27 = vector.load %arg4[%c0_10, %c0_11, %c0_12] : memref<1x9x512xbf16, #tpu.memory_space<vmem>>, vector<1x9x512xbf16>
    %28 = vector.shape_cast %27 : vector<1x9x512xbf16> to vector<9x512xbf16>
    %29 = vector.shape_cast %26 : vector<9x512xbf16> to vector<1x9x512xbf16>
    tpu.vector_store %arg4[%c0_10, %c0_11, %c0_12], %29 {strides = array<i32>} : memref<1x9x512xbf16, #tpu.memory_space<vmem>>, vector<1x9x512xbf16>,
    return
  }
  func.func @transform_0(%arg0: i32, %arg1: i32) -> (i32, i32, i32) {
    %c0_i32 = arith.constant 0 : i32
    %c0_i32_0 = arith.constant 0 : i32
    return %arg0, %arg1, %c0_i32 : i32, i32, i32
  }
  func.func @transform_1(%arg0: i32, %arg1: i32) -> (i32, i32, i32) {
    %c0_i32 = arith.constant 0 : i32
    %c0_i32_0 = arith.constant 0 : i32
    %c0_i32_1 = arith.constant 0 : i32
    return %arg0, %c0_i32, %c0_i32_0 : i32, i32, i32
  }
  func.func @transform_2(%arg0: i32, %arg1: i32) -> (i32, i32, i32) {
    %c0_i32 = arith.constant 0 : i32
    %c0_i32_0 = arith.constant 0 : i32
    return %arg0, %arg1, %c0_i32 : i32, i32, i32
  }
}

module attributes {stable_mosaic.version = 11 : i64} {
  func.func @_final_kernel(%arg0: i32, %arg1: i32, %arg2: memref<1x4x512xbf16, #tpu.memory_space<vmem>>, %arg3: memref<1x512xbf16, #tpu.memory_space<vmem>>, %arg4: memref<1x1x4xf32, #tpu.memory_space<vmem>>, %arg5: memref<1x4xf32, #tpu.memory_space<vmem>>) attributes {dimension_semantics = [#tpu.dimension_semantics<parallel>, #tpu.dimension_semantics<arbitrary>], iteration_bounds = array<i64: 2, 16>, scalar_prefetch = 0 : i64, scratch_operands = 1 : i64, tpu.core_type = #tpu.core_type<tc>, window_params = [{transform_indices = @transform_0, window_bounds = array<i64: 1, 4, 512>}, {transform_indices = @transform_1, window_bounds = array<i64: 1, 512>}, {transform_indices = @transform_2, window_bounds = array<i64: 1, 1, 4>}]} {
    %c0_i32 = arith.constant 0 : i32
    %0 = arith.cmpi eq, %arg1, %c0_i32 : i32
    %1 = arith.extui %0 : i1 to i32
    %c0_i32_0 = arith.constant 0 : i32
    %2 = arith.cmpi ne, %1, %c0_i32_0 : i32
    scf.if %2 {
      %cst_10 = arith.constant 0.000000e+00 : f32
      %13 = vector.broadcast %cst_10 : f32 to vector<1x4xf32>
      %c0_11 = arith.constant 0 : index
      %c0_12 = arith.constant 0 : index
      %14 = vector.load %arg5[%c0_11, %c0_12] : memref<1x4xf32, #tpu.memory_space<vmem>>, vector<1x4xf32>
      tpu.vector_store %arg5[%c0_11, %c0_12], %13 {strides = array<i32>} : memref<1x4xf32, #tpu.memory_space<vmem>>, vector<1x4xf32>,
    } else {
    }
    %c0 = arith.constant 0 : index
    %c0_1 = arith.constant 0 : index
    %3 = vector.load %arg5[%c0, %c0_1] : memref<1x4xf32, #tpu.memory_space<vmem>>, vector<1x4xf32>
    %c0_2 = arith.constant 0 : index
    %c0_3 = arith.constant 0 : index
    %4 = vector.load %arg3[%c0_2, %c0_3] : memref<1x512xbf16, #tpu.memory_space<vmem>>, vector<1x512xbf16>
    %c0_4 = arith.constant 0 : index
    %c0_5 = arith.constant 0 : index
    %c0_6 = arith.constant 0 : index
    %5 = vector.load %arg2[%c0_4, %c0_5, %c0_6] : memref<1x4x512xbf16, #tpu.memory_space<vmem>>, vector<1x4x512xbf16>
    %6 = vector.shape_cast %5 : vector<1x4x512xbf16> to vector<4x512xbf16>
    %cst = arith.constant dense<0.000000e+00> : vector<1x4xf32>
    %7 = tpu.matmul %4, %6, %cst {dimension_numbers = #tpu.dot_dimension_numbers<[1], [1], [0], [0], [0, 0, 1, 0], [], []>} : vector<1x512xbf16>, vector<4x512xbf16>, vector<1x4xf32> -> vector<1x4xf32>
    %8 = arith.addf %3, %7 : vector<1x4xf32>
    %c0_7 = arith.constant 0 : index
    %c0_8 = arith.constant 0 : index
    %9 = vector.load %arg5[%c0_7, %c0_8] : memref<1x4xf32, #tpu.memory_space<vmem>>, vector<1x4xf32>
    tpu.vector_store %arg5[%c0_7, %c0_8], %8 {strides = array<i32>} : memref<1x4xf32, #tpu.memory_space<vmem>>, vector<1x4xf32>,
    %c15_i32 = arith.constant 15 : i32
    %10 = arith.cmpi eq, %arg1, %c15_i32 : i32
    %11 = arith.extui %10 : i1 to i32
    %c0_i32_9 = arith.constant 0 : i32
    %12 = arith.cmpi ne, %11, %c0_i32_9 : i32
    scf.if %12 {
      %c0_10 = arith.constant 0 : index
      %c0_11 = arith.constant 0 : index
      %13 = vector.load %arg5[%c0_10, %c0_11] : memref<1x4xf32, #tpu.memory_space<vmem>>, vector<1x4xf32>
      %c0_12 = arith.constant 0 : index
      %c0_13 = arith.constant 0 : index
      %c0_14 = arith.constant 0 : index
      %14 = vector.load %arg4[%c0_12, %c0_13, %c0_14] : memref<1x1x4xf32, #tpu.memory_space<vmem>>, vector<1x1x4xf32>
      %15 = vector.shape_cast %14 : vector<1x1x4xf32> to vector<1x4xf32>
      %16 = vector.shape_cast %13 : vector<1x4xf32> to vector<1x1x4xf32>
      tpu.vector_store %arg4[%c0_12, %c0_13, %c0_14], %16 {strides = array<i32>} : memref<1x1x4xf32, #tpu.memory_space<vmem>>, vector<1x1x4xf32>,
    } else {
    }
    return
  }
  func.func @transform_0(%arg0: i32, %arg1: i32) -> (i32, i32, i32) {
    %c0_i32 = arith.constant 0 : i32
    %c0_i32_0 = arith.constant 0 : i32
    return %arg0, %c0_i32, %arg1 : i32, i32, i32
  }
  func.func @transform_1(%arg0: i32, %arg1: i32) -> (i32, i32) {
    %c0_i32 = arith.constant 0 : i32
    %c0_i32_0 = arith.constant 0 : i32
    return %c0_i32, %arg1 : i32, i32
  }
  func.func @transform_2(%arg0: i32, %arg1: i32) -> (i32, i32, i32) {
    %c0_i32 = arith.constant 0 : i32
    %c0_i32_0 = arith.constant 0 : i32
    %c0_i32_1 = arith.constant 0 : i32
    return %arg0, %c0_i32, %c0_i32_0 : i32, i32, i32
  }
}

</mosaic_0001>

<bundles_post_ra>
// kernel: discriminator_forward.8
= control target key start
LH: loop header
LB: loop body
LE: loop exit
PB: predicated region body
PF: predicated region fallthrough
CT: control target
= control target key end

     0   :  { %s1378_s9 = smov 0   ;;  %s1380_s10 = smov 0   ;;  %s1633_s0 = inlined_call_operand.vmem [shape: bf16[2,256,64], index: 0, kind: input, shape index: {}]   ;;  %s1634_s1 = inlined_call_operand.vmem [shape: bf16[64,64], index: 1, kind: input, shape index: {}]   ;;  %s1635_s2 = inlined_call_operand.vmem [shape: bf16[2,256,64], index: 2, kind: output, shape index: {}]  }
   0x1   :  { %s1382_s11 = smov 0  }
   0x2 LB: > { %s31_s12 = sadd.s32 1, %s1356_s10  ;;  %p1116_p0 = scmp.ge.s32.totalorder %s1360_s11, 1  ;;  %s1360_s11 = sphi %s1382_s11, %s12_s11   ;;  %s1356_s10 = sphi %s1380_s10, %s1637_s10   ;;  %s1352_s9 = sphi %s1378_s9, %s1636_s9  }
   0x3   : > { %p33_p1 = scmp.ge.s32.totalorder %s31_s12, 2  ;;  %p156_p2 = scmp.lt.s32.totalorder %s1360_s11, 3 }
   0x5   : > { %s1639_s12 = smov (%p33_p1, %s31_s12), 0  ;;  %p157_p3 = pnand %p1116_p0, %p156_p2 }
   0x6   : > { %v1318_v0 = vld [vmem:[%s1634_s1] sm:$0xff] (!%p157_p3)   ;;  %p195_p4 = scmp.lt.s32.totalorder (!%p157_p3), %s1352_s9, 1  ;;  %v1319_v1 = vld [vmem:[%s1634_s1 + $0x8] sm:$0xff] (!%p157_p3)   ;;  %vm228_vm0 = vcmask (!%p157_p3), 523264   ;;  %v1320_v2 = vld [vmem:[%s1634_s1 + $0x10] sm:$0xff] (!%p157_p3)   ;;  %v1362_v3 = vmov (!%p157_p3), 0.0  }
   0x7   : > { %160 = sbr.rel (%p157_p3) target bundleno = 294 (0x126), region = 28  ;;  %1245 = vmatprep.subr.bf16.mxu0 (!%p157_p3), %v1318_v0  ;;  %1285 = vmatprep.subr.bf16.mxu1 (!%p157_p3), %v1318_v0  ;;  %231 = vst.msk [vmem:[#allocation2 + $0x10] sm:$0xff] (!%p157_p3), %vm228_vm0, %v1362_v3  ;;  %229 = vst.msk [vmem:[#allocation2] sm:$0xff] (!%p157_p3), %vm228_vm0, %v1362_v3  ;;  %v1321_v6 = vld [vmem:[%s1634_s1 + $0x18] sm:$0xff] (!%p157_p3)   ;;  %vm970_vm3 = vcmask (!%p157_p3), 519168  }
   0x8   : > { %1246 = vmatpush3.bf16.msra.mxu0 (!%p157_p3), %v1318_v0  ;;  %1289 = vmatpush3.bf16.msra.mxu1 (!%p157_p3), %v1318_v0  ;;  %230 = vst.msk [vmem:[#allocation2 + $0x8] sm:$0xff] (!%p157_p3), %vm228_vm0, %v1362_v3  ;;  %232 = vst.msk [vmem:[#allocation2 + $0x18] sm:$0xff] (!%p157_p3), %vm228_vm0, %v1362_v3 }
   0x9   : > { %1247 = vmatprep.subr.bf16.mxu0 (!%p157_p3), %v1319_v1  ;;  %1286 = vmatprep.subr.bf16.mxu1 (!%p157_p3), %v1319_v1  ;;  %233 = vst.msk [vmem:[#allocation2 + $0x20] sm:$0xff] (!%p157_p3), %vm228_vm0, %v1362_v3  ;;  %234 = vst.msk [vmem:[#allocation2 + $0x28] sm:$0xff] (!%p157_p3), %vm228_vm0, %v1362_v3 }
   0xa   : > { %235 = vst.msk [vmem:[#allocation2 + $0x30] sm:$0xff] (!%p157_p3), %vm228_vm0, %v1362_v3  ;;  %236 = vst.msk [vmem:[#allocation2 + $0x38] sm:$0xff] (!%p157_p3), %vm228_vm0, %v1362_v3 }
   0xb   : > { %237 = vst.msk [vmem:[#allocation2 + $0x40] sm:$0xff] (!%p157_p3), %vm228_vm0, %v1362_v3  ;;  %238 = vst.msk [vmem:[#allocation2 + $0x48] sm:$0xff] (!%p157_p3), %vm228_vm0, %v1362_v3 }
   0xc   : > { %239 = vst.msk [vmem:[#allocation2 + $0x50] sm:$0xff] (!%p157_p3), %vm228_vm0, %v1362_v3  ;;  %240 = vst.msk [vmem:[#allocation2 + $0x58] sm:$0xff] (!%p157_p3), %vm228_vm0, %v1362_v3  ;;  %1248 = vmatpush3.bf16.msra.mxu0 (!%p157_p3), %v1319_v1  ;;  %1290 = vmatpush3.bf16.msra.mxu1 (!%p157_p3), %v1319_v1 }
   0xd   : > { %241 = vst.msk [vmem:[#allocation2 + $0x60] sm:$0xff] (!%p157_p3), %vm228_vm0, %v1362_v3  ;;  %242 = vst.msk [vmem:[#allocation2 + $0x68] sm:$0xff] (!%p157_p3), %vm228_vm0, %v1362_v3  ;;  %1249 = vmatprep.subr.bf16.mxu0 (!%p157_p3), %v1320_v2  ;;  %1287 = vmatprep.subr.bf16.mxu1 (!%p157_p3), %v1320_v2 }
   0xe   : > { %s1641_s9 = smov (!%p195_p4, %s1352_s9), 1  ;;  %243 = vst.msk [vmem:[#allocation2 + $0x70] sm:$0xff] %vm228_vm0, %v1362_v3  ;;  %244 = vst.msk [vmem:[#allocation2 + $0x78] sm:$0xff] %vm228_vm0, %v1362_v3  ;;  %v263_v21 = vld [vmem:[#allocation2 + $0x10] sm:$0xff]  ;;  %v261_v23 = vld [vmem:[#allocation2] sm:$0xff] }
   0xf   : > { %s1191_s19 = sshll.u32 %s1641_s9, 7  ;;  %245 = vst.msk [vmem:[#allocation2 + $0x80] sm:$0xff] %vm228_vm0, %v1362_v3  ;;  %246 = vst.msk [vmem:[#allocation2 + $0x88] sm:$0xff] %vm228_vm0, %v1362_v3  ;;  %v264_v27 = vld [vmem:[#allocation2 + $0x18] sm:$0xff]  ;;  %v262_v33 = vld [vmem:[#allocation2 + $0x8] sm:$0xff] }
  0x10   : > { %247 = vst.msk [vmem:[#allocation2 + $0x90] sm:$0xff] %vm228_vm0, %v1362_v3  ;;  %248 = vst.msk [vmem:[#allocation2 + $0x98] sm:$0xff] %vm228_vm0, %v1362_v3  ;;  %s1445_s22 = scalar_lea.vmem %s1633_s0, %s1191_s19  ;;  %1250 = vmatpush3.bf16.msra.mxu0 %v1320_v2  ;;  %1291 = vmatpush3.bf16.msra.mxu1 %v1320_v2  ;;  %v265_v47 = vld [vmem:[#allocation2 + $0x20] sm:$0xff]  ;;  %s1501_s27 = scalar_lea.vmem %s1635_s2, %s1191_s19 }
  0x11   : > { %249 = vst.msk [vmem:[#allocation2 + $0xa0] sm:$0xff] %vm228_vm0, %v1362_v3  ;;  %250 = vst.msk [vmem:[#allocation2 + $0xa8] sm:$0xff] %vm228_vm0, %v1362_v3  ;;  %v1322_v4 = vld [vmem:[%s1445_s22] sm:$0xff]   ;;  %1251 = vmatprep.subr.bf16.mxu0 %v1321_v6  ;;  %1288 = vmatprep.subr.bf16.mxu1 %v1321_v6  ;;  %v1324_v7 = vld [vmem:[%s1445_s22 + $0x8] sm:$0xff]  }
  0x12   : > { %251 = vst.msk [vmem:[#allocation2 + $0xb0] sm:$0xff] %vm228_vm0, %v1362_v3  ;;  %252 = vst.msk [vmem:[#allocation2 + $0xb8] sm:$0xff] %vm228_vm0, %v1362_v3  ;;  %v1323_v5 = vld [vmem:[%s1445_s22 + $0x40] sm:$0xff]   ;;  %1253 = vmatprep.mubr.msk.bf16.mxu0 %vm228_vm0, %v1322_v4  ;;  %v1325_v8 = vld [vmem:[%s1445_s22 + $0x48] sm:$0xff]  }
  0x13   : > { %253 = vst.msk [vmem:[#allocation2 + $0xc0] sm:$0xff] %vm228_vm0, %v1362_v3  ;;  %254 = vst.msk [vmem:[#allocation2 + $0xc8] sm:$0xff] %vm228_vm0, %v1362_v3  ;;  %1269 = vmatprep.mubr.msk.bf16.mxu1 %vm228_vm0, %v1323_v5  ;;  %v1326_v9 = vld [vmem:[%s1445_s22 + $0x10] sm:$0xff]   ;;  %v1328_v11 = vld [vmem:[%s1445_s22 + $0x18] sm:$0xff]  }
  0x14   : > { %255 = vst.msk [vmem:[#allocation2 + $0xd0] sm:$0xff] %vm228_vm0, %v1362_v3  ;;  %256 = vst.msk [vmem:[#allocation2 + $0xd8] sm:$0xff] %vm228_vm0, %v1362_v3  ;;  %1252 = vmatpush3.bf16.msra.mxu0 %v1321_v6  ;;  %1292 = vmatpush3.bf16.msra.mxu1 %v1321_v6  ;;  %v1327_v10 = vld [vmem:[%s1445_s22 + $0x50] sm:$0xff]   ;;  %v1329_v12 = vld [vmem:[%s1445_s22 + $0x58] sm:$0xff]  }
  0x15   : > { %257 = vst.msk [vmem:[#allocation2 + $0xe0] sm:$0xff] %vm228_vm0, %v1362_v3  ;;  %258 = vst.msk [vmem:[#allocation2 + $0xe8] sm:$0xff] %vm228_vm0, %v1362_v3  ;;  %v1330_v13 = vld [vmem:[%s1445_s22 + $0x20] sm:$0xff]   ;;  %v1332_v15 = vld [vmem:[%s1445_s22 + $0x28] sm:$0xff]  }
  0x16   : > { %259 = vst.msk [vmem:[#allocation2 + $0xf0] sm:$0xff] %vm228_vm0, %v1362_v3  ;;  %260 = vst.msk [vmem:[#allocation2 + $0xf8] sm:$0xff] %vm228_vm0, %v1362_v3  ;;  %v1331_v14 = vld [vmem:[%s1445_s22 + $0x60] sm:$0xff]   ;;  %v1333_v16 = vld [vmem:[%s1445_s22 + $0x68] sm:$0xff]  }
  0x17   : > { %1254 = vmatmul.mubr.msk.bf16.vlgmr.msra.gmra.mrb[0].mxu0 %vm228_vm0, %v1324_v7  ;;  %1270 = vmatmul.mubr.msk.bf16.vlgmr.msra.gmra.mrb[0].mxu1 %vm228_vm0, %v1325_v8  ;;  %v1334_v17 = vld [vmem:[%s1445_s22 + $0x30] sm:$0xff]   ;;  %v1336_v19 = vld [vmem:[%s1445_s22 + $0x38] sm:$0xff]   ;;  %v277_v24 = vld [vmem:[#allocation2 + $0x80] sm:$0xff] }
  0x18   : > { %1257 = vmatprep.mubr.msk.bf16.mxu0 %vm228_vm0, %v1326_v9  ;;  %1273 = vmatprep.mubr.msk.bf16.mxu1 %vm228_vm0, %v1327_v10  ;;  %v1335_v18 = vld [vmem:[%s1445_s22 + $0x70] sm:$0xff]   ;;  %v1337_v20 = vld [vmem:[%s1445_s22 + $0x78] sm:$0xff]   ;;  %v278_v34 = vld [vmem:[#allocation2 + $0x88] sm:$0xff] }
  0x19   : > { %v279_v22 = vld [vmem:[#allocation2 + $0x90] sm:$0xff]  ;;  %v280_v28 = vld [vmem:[#allocation2 + $0x98] sm:$0xff]  ;;  %v281_v48 = vld [vmem:[#allocation2 + $0xa0] sm:$0xff] }
  0x1a   : > { %v267_v45 = vld [vmem:[#allocation2 + $0x30] sm:$0xff]  ;;  %v268_v55 = vld [vmem:[#allocation2 + $0x38] sm:$0xff] }
  0x1b   : > { %v283_v46 = vld [vmem:[#allocation2 + $0xb0] sm:$0xff]  ;;  %v284_v56 = vld [vmem:[#allocation2 + $0xb8] sm:$0xff] }
  0x1f   : > { %1258 = vmatmul.mubr.msk.bf16.gmra.mrb[4].mxu0 %vm228_vm0, %v1328_v11  ;;  %1274 = vmatmul.mubr.msk.bf16.gmra.mrb[4].mxu1 %vm228_vm0, %v1329_v12 }
  0x20   : > { %1261 = vmatprep.mubr.msk.bf16.mxu0 %vm228_vm0, %v1330_v13  ;;  %1277 = vmatprep.mubr.msk.bf16.mxu1 %vm228_vm0, %v1331_v14 }
  0x27   : > { %1262 = vmatmul.mubr.msk.bf16.gmra.mrb[8].mxu0 %vm228_vm0, %v1332_v15  ;;  %1278 = vmatmul.mubr.msk.bf16.gmra.mrb[8].mxu1 %vm228_vm0, %v1333_v16 }
  0x28   : > { %1265 = vmatprep.mubr.msk.bf16.mxu0 %vm228_vm0, %v1334_v17  ;;  %1281 = vmatprep.mubr.msk.bf16.mxu1 %vm228_vm0, %v1335_v18 }
  0x2f   : > { %1266 = vmatmul.mubr.msk.bf16.gmra.mrb[12].mxu0 %vm228_vm0, %v1336_v19  ;;  %1282 = vmatmul.mubr.msk.bf16.gmra.mrb[12].mxu1 %vm228_vm0, %v1337_v20  ;;  %v266_v19 = vld [vmem:[#allocation2 + $0x28] sm:$0xff] }
  0xea   : > { %v1255_v25 = vpop.f32.mrb[0].mxu0  ;;  %v1271_v26 = vpop.f32.mrb[0].mxu1 }
  0xeb   : > { %v649_v29 = vadd.f32 %v1255_v25, %v263_v21  ;;  %v665_v30 = vadd.f32 %v1271_v26, %v279_v22  ;;  %v520_v31 = vpop.f32.mrb[1].mxu0  ;;  %v584_v32 = vpop.f32.mrb[1].mxu1 }
  0xec   : > { %v647_v35 = vadd.f32 %v520_v31, %v261_v23  ;;  %v663_v36 = vadd.f32 %v584_v32, %v277_v24  ;;  %v1256_v37 = vpop.f32.mrb[2].mxu0  ;;  %v1272_v38 = vpop.f32.mrb[2].mxu1 }
  0xed   : > { %681 = vst.msk [vmem:[#allocation2 + $0x10] sm:$0xff] %vm228_vm0, %v649_v29  ;;  %697 = vst.msk [vmem:[#allocation2 + $0x90] sm:$0xff] %vm228_vm0, %v665_v30  ;;  %v650_v39 = vadd.f32 %v1256_v37, %v264_v27  ;;  %v666_v40 = vadd.f32 %v1272_v38, %v280_v28  ;;  %v523_v41 = vpop.f32.mrb[3].mxu0  ;;  %v587_v42 = vpop.f32.mrb[3].mxu1 }
  0xee   : > { %679 = vst.msk [vmem:[#allocation2] sm:$0xff] %vm228_vm0, %v647_v35  ;;  %695 = vst.msk [vmem:[#allocation2 + $0x80] sm:$0xff] %vm228_vm0, %v663_v36  ;;  %v648_v43 = vadd.f32 %v523_v41, %v262_v33  ;;  %v664_v44 = vadd.f32 %v587_v42, %v278_v34 }
  0xef   : > { %682 = vst.msk [vmem:[#allocation2 + $0x18] sm:$0xff] %vm228_vm0, %v650_v39  ;;  %698 = vst.msk [vmem:[#allocation2 + $0x98] sm:$0xff] %vm228_vm0, %v666_v40 }
  0xf0   : > { %680 = vst.msk [vmem:[#allocation2 + $0x8] sm:$0xff] %vm228_vm0, %v648_v43  ;;  %696 = vst.msk [vmem:[#allocation2 + $0x88] sm:$0xff] %vm228_vm0, %v664_v44 }
  0xf2   : > { %v1259_v49 = vpop.f32.mrb[4].mxu0  ;;  %v1275_v50 = vpop.f32.mrb[4].mxu1 }
  0xf3   : > { %v653_v51 = vadd.f32 %v1259_v49, %v267_v45  ;;  %v669_v52 = vadd.f32 %v1275_v50, %v283_v46  ;;  %v536_v53 = vpop.f32.mrb[5].mxu0  ;;  %v600_v54 = vpop.f32.mrb[5].mxu1 }
  0xf4   : > { %v716_v57 = vld [vmem:[#allocation2 + $0x10] sm:$0xff]  ;;  %v651_v59 = vadd.f32 %v536_v53, %v265_v47  ;;  %v667_v60 = vadd.f32 %v600_v54, %v281_v48  ;;  %v1260_v61 = vpop.f32.mrb[6].mxu0  ;;  %v1276_v62 = vpop.f32.mrb[6].mxu1  ;;  %v282_v53 = vld [vmem:[#allocation2 + $0xa8] sm:$0xff] }
  0xf5   : > { %v732_v58 = vld [vmem:[#allocation2 + $0x90] sm:$0xff]  ;;  %vm748_vm1 = vcmp.ge.f32.partialorder %v716_v57, 0.0  ;;  %v780_v63 = vmul.f32 0.2, %v716_v57  ;;  %685 = vst.msk [vmem:[#allocation2 + $0x30] sm:$0xff] %vm228_vm0, %v653_v51  ;;  %701 = vst.msk [vmem:[#allocation2 + $0xb0] sm:$0xff] %vm228_vm0, %v669_v52  ;;  %v654_v4 = vadd.f32 %v1260_v61, %v268_v55  ;;  %v670_v5 = vadd.f32 %v1276_v62, %v284_v56 }
  0xf6   : > { %vm764_vm2 = vcmp.ge.f32.partialorder %v732_v58, 0.0  ;;  %v796_v0 = vmul.f32 0.2, %v732_v58  ;;  %v714_v1 = vld [vmem:[#allocation2] sm:$0xff]  ;;  %v717_v3 = vld [vmem:[#allocation2 + $0x18] sm:$0xff]  ;;  %683 = vst.msk [vmem:[#allocation2 + $0x20] sm:$0xff] %vm228_vm0, %v651_v59 }
  0xf7   : > { %v730_v2 = vld [vmem:[#allocation2 + $0x80] sm:$0xff]  ;;  %699 = vst.msk [vmem:[#allocation2 + $0xa0] sm:$0xff] %vm228_vm0, %v667_v60  ;;  %v539_v6 = vpop.f32.mrb[7].mxu0  ;;  %v1494_v7 = vpop.f32.mrb[7].mxu1  ;;  %v812_v8 = vsel %vm748_vm1, %v716_v57, %v780_v63  ;;  %vm746_vm4 = vcmp.ge.f32.partialorder %v714_v1, 0.0  ;;  %v733_v11 = vld [vmem:[#allocation2 + $0x98] sm:$0xff] }
  0xf8   : > { %v828_v9 = vsel %vm764_vm2, %v732_v58, %v796_v0  ;;  %v778_v10 = vmul.f32 0.2, %v714_v1  ;;  %v715_v12 = vld [vmem:[#allocation2 + $0x8] sm:$0xff]  ;;  %v1195_v13 = vpack.c.bf16 %v812_v8, %v812_v8  ;;  %vm762_vm5 = vcmp.ge.f32.partialorder %v730_v2, 0.0  ;;  %686 = vst.msk [vmem:[#allocation2 + $0x38] sm:$0xff] %vm228_vm0, %v654_v4  ;;  %702 = vst.msk [vmem:[#allocation2 + $0xb8] sm:$0xff] %vm228_vm0, %v670_v5 }
  0xf9   : > { %v1211_v14 = vpack.c.bf16 %v828_v9, %v828_v9  ;;  %v794_v15 = vmul.f32 0.2, %v730_v2  ;;  %v731_v16 = vld [vmem:[#allocation2 + $0x88] sm:$0xff]  ;;  %vm749_vm6 = vcmp.ge.f32.partialorder %v717_v3, 0.0  ;;  %v781_v18 = vmul.f32 0.2, %v717_v3 }
  0xfa   : > { %v810_v17 = vsel %vm746_vm4, %v714_v1, %v778_v10  ;;  %vm765_vm7 = vcmp.ge.f32.partialorder %v733_v11, 0.0  ;;  %973 = vst.msk [vmem:[%s1501_s27 + $0x8] sm:$0xf] %vm970_vm3, %v1195_v13  ;;  %v797_v22 = vmul.f32 0.2, %v733_v11  ;;  %vm747_vm8 = vcmp.ge.f32.partialorder %v715_v12, 0.0 }
  0xfb   : > { %989 = vst.msk [vmem:[%s1501_s27 + $0x48] sm:$0xf] %vm970_vm3, %v1211_v14  ;;  %v1193_v20 = vpack.c.bf16 %v810_v17, %v810_v17  ;;  %v826_v21 = vsel %vm762_vm5, %v730_v2, %v794_v15  ;;  %v1511_v23 = vpop.f32.mrb[8].mxu0  ;;  %v1513_v24 = vpop.f32.mrb[8].mxu1  ;;  %v813_v26 = vsel %vm749_vm6, %v717_v3, %v781_v18  ;;  %v779_v27 = vmul.f32 0.2, %v715_v12 }
  0xfc   : > { %v1209_v25 = vpack.c.bf16 %v826_v21, %v826_v21  ;;  %vm763_vm9 = vcmp.ge.f32.partialorder %v731_v16, 0.0  ;;  %v1515_v28 = vpop.f32.mrb[9].mxu0  ;;  %v1517_v29 = vpop.f32.mrb[9].mxu1  ;;  %v1196_v30 = vpack.c.bf16 %v813_v26, %v813_v26  ;;  %v829_v31 = vsel %vm765_vm7, %v733_v11, %v797_v22  ;;  %v720_v33 = vld [vmem:[#allocation2 + $0x30] sm:$0xff]  ;;  %v269_v59 = vld [vmem:[#allocation2 + $0x40] sm:$0xff]  ;;  %v272_v0 = vld [vmem:[#allocation2 + $0x58] sm:$0xff] }
  0xfd   : > { %971 = vst.msk [vmem:[%s1501_s27] sm:$0xf] %vm970_vm3, %v1193_v20  ;;  %v795_v32 = vmul.f32 0.2, %v731_v16  ;;  %v736_v34 = vld [vmem:[#allocation2 + $0xb0] sm:$0xff]  ;;  %v652_v35 = vadd.f32 %v539_v6, %v266_v19  ;;  %v1522_v36 = vpop.f32.mrb[10].mxu0  ;;  %v1212_v38 = vpack.c.bf16 %v829_v31, %v829_v31  ;;  %v811_v39 = vsel %vm747_vm8, %v715_v12, %v779_v27 }
  0xfe   : > { %v1524_v37 = vpop.f32.mrb[10].mxu1  ;;  %987 = vst.msk [vmem:[%s1501_s27 + $0x40] sm:$0xf] %vm970_vm3, %v1209_v25  ;;  %vm752_vm10 = vcmp.ge.f32.partialorder %v720_v33, 0.0  ;;  %v784_v40 = vmul.f32 0.2, %v720_v33  ;;  %v1194_v44 = vpack.c.bf16 %v811_v39, %v811_v39  ;;  %v668_v11 = vadd.f32 %v1494_v7, %v282_v53 }
  0xff   : > { %v718_v41 = vld [vmem:[#allocation2 + $0x20] sm:$0xff]  ;;  %v1529_v43 = vpop.f32.mrb[11].mxu0  ;;  %974 = vst.msk [vmem:[%s1501_s27 + $0xc] sm:$0xf] %vm970_vm3, %v1196_v30  ;;  %v827_v45 = vsel %vm763_vm9, %v731_v16, %v795_v32  ;;  %vm768_vm11 = vcmp.ge.f32.partialorder %v736_v34, 0.0  ;;  %v1535_v47 = vpop.f32.mrb[11].mxu1  ;;  %v655_v21 = vadd.f32 %v1515_v28, %v269_v59 }
 0x100   : > { %v734_v42 = vld [vmem:[#allocation2 + $0xa0] sm:$0xff]  ;;  %v800_v46 = vmul.f32 0.2, %v736_v34  ;;  %684 = vst.msk [vmem:[#allocation2 + $0x28] sm:$0xff] %vm228_vm0, %v652_v35  ;;  %v1210_v48 = vpack.c.bf16 %v827_v45, %v827_v45  ;;  %v816_v49 = vsel %vm752_vm10, %v720_v33, %v784_v40  ;;  %vm750_vm12 = vcmp.ge.f32.partialorder %v718_v41, 0.0  ;;  %v721_v51 = vld [vmem:[#allocation2 + $0x38] sm:$0xff] }
 0x101   : > { %990 = vst.msk [vmem:[%s1501_s27 + $0x4c] sm:$0xf] %vm970_vm3, %v1212_v38  ;;  %v782_v50 = vmul.f32 0.2, %v718_v41  ;;  %v737_v52 = vld [vmem:[#allocation2 + $0xb8] sm:$0xff]  ;;  %v1199_v54 = vpack.c.bf16 %v816_v49, %v816_v49  ;;  %vm766_vm13 = vcmp.ge.f32.partialorder %v734_v42, 0.0 }
 0x102   : > { %972 = vst.msk [vmem:[%s1501_s27 + $0x4] sm:$0xf] %vm970_vm3, %v1194_v44  ;;  %v832_v55 = vsel %vm768_vm11, %v736_v34, %v800_v46  ;;  %v798_v56 = vmul.f32 0.2, %v734_v42  ;;  %v271_v57 = vld [vmem:[#allocation2 + $0x50] sm:$0xff]  ;;  %vm753_vm14 = vcmp.ge.f32.partialorder %v721_v51, 0.0 }
 0x103   : > { %v287_v58 = vld [vmem:[#allocation2 + $0xd0] sm:$0xff]  ;;  %988 = vst.msk [vmem:[%s1501_s27 + $0x44] sm:$0xf] %vm970_vm3, %v1210_v48  ;;  %v1215_v60 = vpack.c.bf16 %v832_v55, %v832_v55  ;;  %v814_v61 = vsel %vm750_vm12, %v718_v41, %v782_v50  ;;  %v785_v62 = vmul.f32 0.2, %v721_v51  ;;  %v285_v63 = vld [vmem:[#allocation2 + $0xc0] sm:$0xff]  ;;  %v657_v12 = vadd.f32 %v1511_v23, %v271_v57 }
 0x104   : > { %v288_v1 = vld [vmem:[#allocation2 + $0xd8] sm:$0xff]  ;;  %977 = vst.msk [vmem:[%s1501_s27 + $0x18] sm:$0xf] %vm970_vm3, %v1199_v54  ;;  %v1197_v2 = vpack.c.bf16 %v814_v61, %v814_v61  ;;  %v830_v3 = vsel %vm766_vm13, %v734_v42, %v798_v56  ;;  %vm769_vm15 = vcmp.ge.f32.partialorder %v737_v52, 0.0  ;;  %v801_v4 = vmul.f32 0.2, %v737_v52 }
 0x105   : > { %v270_v5 = vld [vmem:[#allocation2 + $0x48] sm:$0xff]  ;;  %v1267_v6 = vpop.f32.mrb[12].mxu0  ;;  %v1283_v8 = vpop.f32.mrb[12].mxu1  ;;  %993 = vst.msk [vmem:[%s1501_s27 + $0x58] sm:$0xf] %vm970_vm3, %v1215_v60  ;;  %v1213_v9 = vpack.c.bf16 %v830_v3, %v830_v3  ;;  %v817_v10 = vsel %vm753_vm14, %v721_v51, %v785_v62  ;;  %v275_v14 = vld [vmem:[#allocation2 + $0x70] sm:$0xff]  ;;  %v673_v20 = vadd.f32 %v1513_v24, %v287_v58  ;;  %v671_v31 = vadd.f32 %v1517_v29, %v285_v63 }
 0x106   : > { %v286_v13 = vld [vmem:[#allocation2 + $0xc8] sm:$0xff]  ;;  %v291_v15 = vld [vmem:[#allocation2 + $0xf0] sm:$0xff]  ;;  %v568_v16 = vpop.f32.mrb[13].mxu0  ;;  %v632_v17 = vpop.f32.mrb[13].mxu1  ;;  %975 = vst.msk [vmem:[%s1501_s27 + $0x10] sm:$0xf] %vm970_vm3, %v1197_v2  ;;  %v1200_v18 = vpack.c.bf16 %v817_v10, %v817_v10  ;;  %v833_v19 = vsel %vm769_vm15, %v737_v52, %v801_v4  ;;  %v658_v24 = vadd.f32 %v1522_v36, %v272_v0  ;;  %v674_v28 = vadd.f32 %v1524_v37, %v288_v1 }
 0x107   : > { %v273_v22 = vld [vmem:[#allocation2 + $0x60] sm:$0xff]  ;;  %v276_v7 = vld [vmem:[#allocation2 + $0x78] sm:$0xff]  ;;  %v1268_v23 = vpop.f32.mrb[14].mxu0  ;;  %v1284_v26 = vpop.f32.mrb[14].mxu1  ;;  %991 = vst.msk [vmem:[%s1501_s27 + $0x50] sm:$0xf] %vm970_vm3, %v1213_v9  ;;  %v1216_v27 = vpack.c.bf16 %v833_v19, %v833_v19  ;;  %v656_v39 = vadd.f32 %v1529_v43, %v270_v5  ;;  %v672_v29 = vadd.f32 %v1535_v47, %v286_v13  ;;  %v661_v36 = vadd.f32 %v1267_v6, %v275_v14 }
 0x108   : > { %v289_v25 = vld [vmem:[#allocation2 + $0xe0] sm:$0xff]  ;;  %v719_v30 = vld [vmem:[#allocation2 + $0x28] sm:$0xff]  ;;  %700 = vst.msk [vmem:[#allocation2 + $0xa8] sm:$0xff] %vm228_vm0, %v668_v11  ;;  %689 = vst.msk [vmem:[#allocation2 + $0x50] sm:$0xff] %vm228_vm0, %v657_v12  ;;  %v571_v34 = vpop.f32.mrb[15].mxu0  ;;  %v635_v35 = vpop.f32.mrb[15].mxu1  ;;  %v677_v37 = vadd.f32 %v1283_v8, %v291_v15  ;;  %v659_v41 = vadd.f32 %v568_v16, %v273_v22  ;;  %v662_v43 = vadd.f32 %v1268_v23, %v276_v7 }
 0x109   : > { %v292_v32 = vld [vmem:[#allocation2 + $0xf8] sm:$0xff]  ;;  %v274_v33 = vld [vmem:[#allocation2 + $0x68] sm:$0xff]  ;;  %978 = vst.msk [vmem:[%s1501_s27 + $0x1c] sm:$0xf] %vm970_vm3, %v1200_v18  ;;  %vm751_vm1 = vcmp.ge.f32.partialorder %v719_v30, 0.0  ;;  %v675_v42 = vadd.f32 %v632_v17, %v289_v25 }
 0x10a   : > { %v783_v38 = vmul.f32 0.2, %v719_v30  ;;  %705 = vst.msk [vmem:[#allocation2 + $0xd0] sm:$0xff] %vm228_vm0, %v673_v20  ;;  %687 = vst.msk [vmem:[#allocation2 + $0x40] sm:$0xff] %vm228_vm0, %v655_v21  ;;  %v290_v40 = vld [vmem:[#allocation2 + $0xe8] sm:$0xff]  ;;  %v678_v45 = vadd.f32 %v1284_v26, %v292_v32  ;;  %v660_v46 = vadd.f32 %v571_v34, %v274_v33 }
 0x10b   : > { %994 = vst.msk [vmem:[%s1501_s27 + $0x5c] sm:$0xf] %vm970_vm3, %v1216_v27  ;;  %v676_v48 = vadd.f32 %v635_v35, %v290_v40 }
 0x10c   : > { %703 = vst.msk [vmem:[#allocation2 + $0xc0] sm:$0xff] %vm228_vm0, %v671_v31  ;;  %690 = vst.msk [vmem:[#allocation2 + $0x58] sm:$0xff] %vm228_vm0, %v658_v24  ;;  %v815_v44 = vsel %vm751_vm1, %v719_v30, %v783_v38 }
 0x10d   : > { %706 = vst.msk [vmem:[#allocation2 + $0xd8] sm:$0xff] %vm228_vm0, %v674_v28  ;;  %688 = vst.msk [vmem:[#allocation2 + $0x48] sm:$0xff] %vm228_vm0, %v656_v39  ;;  %v1198_v47 = vpack.c.bf16 %v815_v44, %v815_v44 }
 0x10e   : > { %704 = vst.msk [vmem:[#allocation2 + $0xc8] sm:$0xff] %vm228_vm0, %v672_v29  ;;  %693 = vst.msk [vmem:[#allocation2 + $0x70] sm:$0xff] %vm228_vm0, %v661_v36 }
 0x10f   : > { %709 = vst.msk [vmem:[#allocation2 + $0xf0] sm:$0xff] %vm228_vm0, %v677_v37  ;;  %691 = vst.msk [vmem:[#allocation2 + $0x60] sm:$0xff] %vm228_vm0, %v659_v41  ;;  %v735_v49 = vld [vmem:[#allocation2 + $0xa8] sm:$0xff]  ;;  %v724_v50 = vld [vmem:[#allocation2 + $0x50] sm:$0xff] }
 0x110   : > { %707 = vst.msk [vmem:[#allocation2 + $0xe0] sm:$0xff] %vm228_vm0, %v675_v42  ;;  %694 = vst.msk [vmem:[#allocation2 + $0x78] sm:$0xff] %vm228_vm0, %v662_v43  ;;  %vm767_vm2 = vcmp.ge.f32.partialorder %v735_v49, 0.0  ;;  %v799_v51 = vmul.f32 0.2, %v735_v49  ;;  %vm756_vm4 = vcmp.ge.f32.partialorder %v724_v50, 0.0 }
 0x111   : > { %710 = vst.msk [vmem:[#allocation2 + $0xf8] sm:$0xff] %vm228_vm0, %v678_v45  ;;  %692 = vst.msk [vmem:[#allocation2 + $0x68] sm:$0xff] %vm228_vm0, %v660_v46  ;;  %v788_v52 = vmul.f32 0.2, %v724_v50  ;;  %v740_v53 = vld [vmem:[#allocation2 + $0xd0] sm:$0xff]  ;;  %v722_v54 = vld [vmem:[#allocation2 + $0x40] sm:$0xff] }
 0x112   : > { %976 = vst.msk [vmem:[%s1501_s27 + $0x14] sm:$0xf] %vm970_vm3, %v1198_v47  ;;  %v831_v56 = vsel %vm767_vm2, %v735_v49, %v799_v51  ;;  %vm772_vm5 = vcmp.ge.f32.partialorder %v740_v53, 0.0  ;;  %v804_v58 = vmul.f32 0.2, %v740_v53 }
 0x113   : > { %708 = vst.msk [vmem:[#allocation2 + $0xe8] sm:$0xff] %vm228_vm0, %v676_v48  ;;  %v738_v55 = vld [vmem:[#allocation2 + $0xc0] sm:$0xff]  ;;  %v820_v57 = vsel %vm756_vm4, %v724_v50, %v788_v52  ;;  %v725_v59 = vld [vmem:[#allocation2 + $0x58] sm:$0xff]  ;;  %v1214_v61 = vpack.c.bf16 %v831_v56, %v831_v56  ;;  %vm754_vm0 = vcmp.ge.f32.partialorder %v722_v54, 0.0  ;;  %v786_v63 = vmul.f32 0.2, %v722_v54 }
 0x114   : > { %v741_v60 = vld [vmem:[#allocation2 + $0xd8] sm:$0xff]  ;;  %v1203_v62 = vpack.c.bf16 %v820_v57, %v820_v57  ;;  %v723_v0 = vld [vmem:[#allocation2 + $0x48] sm:$0xff]  ;;  %v836_v1 = vsel %vm772_vm5, %v740_v53, %v804_v58  ;;  %vm770_vm6 = vcmp.ge.f32.partialorder %v738_v55, 0.0  ;;  %v802_v2 = vmul.f32 0.2, %v738_v55 }
 0x115   : > { %vm757_vm7 = vcmp.ge.f32.partialorder %v725_v59, 0.0  ;;  %v739_v3 = vld [vmem:[#allocation2 + $0xc8] sm:$0xff]  ;;  %992 = vst.msk [vmem:[%s1501_s27 + $0x54] sm:$0xf] %vm970_vm3, %v1214_v61  ;;  %v1219_v4 = vpack.c.bf16 %v836_v1, %v836_v1  ;;  %v818_v5 = vsel %vm754_vm0, %v722_v54, %v786_v63  ;;  %v789_v6 = vmul.f32 0.2, %v725_v59 }
 0x116   : > { %981 = vst.msk [vmem:[%s1501_s27 + $0x28] sm:$0xf] %vm970_vm3, %v1203_v62  ;;  %vm773_vm8 = vcmp.ge.f32.partialorder %v741_v60, 0.0  ;;  %v728_v8 = vld [vmem:[#allocation2 + $0x70] sm:$0xff]  ;;  %v1201_v9 = vpack.c.bf16 %v818_v5, %v818_v5  ;;  %v834_v10 = vsel %vm770_vm6, %v738_v55, %v802_v2  ;;  %v805_v11 = vmul.f32 0.2, %v741_v60 }
 0x117   : > { %vm755_vm9 = vcmp.ge.f32.partialorder %v723_v0, 0.0  ;;  %v744_v12 = vld [vmem:[#allocation2 + $0xf0] sm:$0xff]  ;;  %997 = vst.msk [vmem:[%s1501_s27 + $0x68] sm:$0xf] %vm970_vm3, %v1219_v4  ;;  %v1217_v13 = vpack.c.bf16 %v834_v10, %v834_v10  ;;  %v821_v14 = vsel %vm757_vm7, %v725_v59, %v789_v6  ;;  %v787_v15 = vmul.f32 0.2, %v723_v0 }
 0x118   : > { %vm771_vm10 = vcmp.ge.f32.partialorder %v739_v3, 0.0  ;;  %v726_v16 = vld [vmem:[#allocation2 + $0x60] sm:$0xff]  ;;  %979 = vst.msk [vmem:[%s1501_s27 + $0x20] sm:$0xf] %vm970_vm3, %v1201_v9  ;;  %v1204_v17 = vpack.c.bf16 %v821_v14, %v821_v14  ;;  %v837_v18 = vsel %vm773_vm8, %v741_v60, %v805_v11  ;;  %v803_v19 = vmul.f32 0.2, %v739_v3 }
 0x119   : > { %vm760_vm11 = vcmp.ge.f32.partialorder %v728_v8, 0.0  ;;  %v742_v20 = vld [vmem:[#allocation2 + $0xe0] sm:$0xff]  ;;  %995 = vst.msk [vmem:[%s1501_s27 + $0x60] sm:$0xf] %vm970_vm3, %v1217_v13  ;;  %v1220_v21 = vpack.c.bf16 %v837_v18, %v837_v18  ;;  %v819_v22 = vsel %vm755_vm9, %v723_v0, %v787_v15  ;;  %v792_v25 = vmul.f32 0.2, %v728_v8 }
 0x11a   : > { %vm776_vm12 = vcmp.ge.f32.partialorder %v744_v12, 0.0  ;;  %v729_v7 = vld [vmem:[#allocation2 + $0x78] sm:$0xff]  ;;  %982 = vst.msk [vmem:[%s1501_s27 + $0x2c] sm:$0xf] %vm970_vm3, %v1204_v17  ;;  %v1202_v23 = vpack.c.bf16 %v819_v22, %v819_v22  ;;  %v835_v26 = vsel %vm771_vm10, %v739_v3, %v803_v19  ;;  %v808_v27 = vmul.f32 0.2, %v744_v12 }
 0x11b   : > { %vm758_vm13 = vcmp.ge.f32.partialorder %v726_v16, 0.0  ;;  %v745_v30 = vld [vmem:[#allocation2 + $0xf8] sm:$0xff]  ;;  %998 = vst.msk [vmem:[%s1501_s27 + $0x6c] sm:$0xf] %vm970_vm3, %v1220_v21  ;;  %v1218_v31 = vpack.c.bf16 %v835_v26, %v835_v26  ;;  %v824_v24 = vsel %vm760_vm11, %v728_v8, %v792_v25  ;;  %v790_v28 = vmul.f32 0.2, %v726_v16 }
 0x11c   : > { %vm774_vm14 = vcmp.ge.f32.partialorder %v742_v20, 0.0  ;;  %v727_v32 = vld [vmem:[#allocation2 + $0x68] sm:$0xff]  ;;  %980 = vst.msk [vmem:[%s1501_s27 + $0x24] sm:$0xf] %vm970_vm3, %v1202_v23  ;;  %v1207_v33 = vpack.c.bf16 %v824_v24, %v824_v24  ;;  %v840_v34 = vsel %vm776_vm12, %v744_v12, %v808_v27  ;;  %v806_v35 = vmul.f32 0.2, %v742_v20 }
 0x11d   : > { %vm761_vm15 = vcmp.ge.f32.partialorder %v729_v7, 0.0  ;;  %v743_v38 = vld [vmem:[#allocation2 + $0xe8] sm:$0xff]  ;;  %996 = vst.msk [vmem:[%s1501_s27 + $0x64] sm:$0xf] %vm970_vm3, %v1218_v31  ;;  %v1223_v39 = vpack.c.bf16 %v840_v34, %v840_v34  ;;  %v822_v29 = vsel %vm758_vm13, %v726_v16, %v790_v28  ;;  %v793_v40 = vmul.f32 0.2, %v729_v7 }
 0x11e   : > { %vm777_vm1 = vcmp.ge.f32.partialorder %v745_v30, 0.0  ;;  %985 = vst.msk [vmem:[%s1501_s27 + $0x38] sm:$0xf] %vm970_vm3, %v1207_v33  ;;  %v1205_v36 = vpack.c.bf16 %v822_v29, %v822_v29  ;;  %v838_v37 = vsel %vm774_vm14, %v742_v20, %v806_v35  ;;  %v809_v41 = vmul.f32 0.2, %v745_v30 }
 0x11f   : > { %vm759_vm2 = vcmp.ge.f32.partialorder %v727_v32, 0.0  ;;  %1001 = vst.msk [vmem:[%s1501_s27 + $0x78] sm:$0xf] %vm970_vm3, %v1223_v39  ;;  %v1221_v42 = vpack.c.bf16 %v838_v37, %v838_v37  ;;  %v825_v44 = vsel %vm761_vm15, %v729_v7, %v793_v40  ;;  %v791_v43 = vmul.f32 0.2, %v727_v32 }
 0x120   : > { %vm775_vm4 = vcmp.ge.f32.partialorder %v743_v38, 0.0  ;;  %983 = vst.msk [vmem:[%s1501_s27 + $0x30] sm:$0xf] %vm970_vm3, %v1205_v36  ;;  %v1208_v45 = vpack.c.bf16 %v825_v44, %v825_v44  ;;  %v841_v46 = vsel %vm777_vm1, %v745_v30, %v809_v41  ;;  %v807_v47 = vmul.f32 0.2, %v743_v38 }
 0x121   : > { %999 = vst.msk [vmem:[%s1501_s27 + $0x70] sm:$0xf] %vm970_vm3, %v1221_v42  ;;  %v1224_v48 = vpack.c.bf16 %v841_v46, %v841_v46  ;;  %v823_v49 = vsel %vm759_vm2, %v727_v32, %v791_v43 }
 0x122   : > { %986 = vst.msk [vmem:[%s1501_s27 + $0x3c] sm:$0xf] %vm970_vm3, %v1208_v45  ;;  %v1206_v50 = vpack.c.bf16 %v823_v49, %v823_v49  ;;  %v839_v51 = vsel %vm775_vm4, %v743_v38, %v807_v47 }
 0x123   : > { %1002 = vst.msk [vmem:[%s1501_s27 + $0x7c] sm:$0xf] %vm970_vm3, %v1224_v48  ;;  %v1222_v52 = vpack.c.bf16 %v839_v51, %v839_v51 }
 0x124   : > { %984 = vst.msk [vmem:[%s1501_s27 + $0x34] sm:$0xf] %vm970_vm3, %v1206_v50 }
 0x125   : > { %1000 = vst.msk [vmem:[%s1501_s27 + $0x74] sm:$0xf] %vm970_vm3, %v1222_v52 }
 0x126 PF: > { %s12_s11 = sadd.s32 1, %s1360_s11   ;;  %s1636_s9 = smov %s1356_s10 }
 0x127   : > { %p9_p5 = scmp.ge.s32.totalorder %s12_s11, 4   ;;  %s1637_s10 = smov %s1639_s12 }
 0x129   :  { %11 = sbr.rel (!%p9_p5) target bundleno = 2 (0x2), region = 69 }

// kernel: discriminator_forward.10
= control target key start
LH: loop header
LB: loop body
LE: loop exit
PB: predicated region body
PF: predicated region fallthrough
CT: control target
= control target key end

     0   :  { %s523_s9 = smov 0   ;;  %s525_s10 = smov 0   ;;  %s564_s0 = inlined_call_operand.vmem [shape: f32[2,64,128], index: 0, kind: input, shape index: {}]   ;;  %s565_s1 = inlined_call_operand.vmem [shape: f32[2,2,128], index: 1, kind: input, shape index: {}]   ;;  %s566_s2 = inlined_call_operand.vmem [shape: bf16[2,64,128], index: 2, kind: output, shape index: {}]  }
   0x1   :  { %s527_s11 = smov 0  }
   0x2 LB: > { %s24_s12 = sadd.s32 1, %s502_s10  ;;  %p409_p0 = scmp.ge.s32.totalorder %s506_s11, 1  ;;  %s506_s11 = sphi %s527_s11, %s12_s11   ;;  %s502_s10 = sphi %s525_s10, %s568_s10   ;;  %s498_s9 = sphi %s523_s9, %s567_s9  }
   0x3   : > { %p26_p1 = scmp.ge.s32.totalorder %s24_s12, 2  ;;  %p142_p2 = scmp.lt.s32.totalorder %s506_s11, 3 }
   0x5   : > { %s570_s12 = smov (%p26_p1, %s24_s12), 0  ;;  %p143_p3 = pnand %p409_p0, %p142_p2 }
   0x6   : > { %p177_p4 = scmp.lt.s32.totalorder (!%p143_p3), %s498_s9, 1  ;;  %v216_v4 = vlaneseq (!%p143_p3) }
   0x7   : > { %146 = sbr.rel (%p143_p3) target bundleno = 56 (0x38), region = 28 }
   0x8   : > { %v217_v7 = vshrl.u32 (!%p143_p3), %v216_v4, 7 }
   0xa   : > { %v218_v9 = vsub.s32 (!%p143_p3), 0, %v217_v7  ;;  %v232_v16 = vsub.s32 (!%p143_p3), 1, %v217_v7 }
   0xe   : > { %s572_s9 = smov (!%p177_p4, %s498_s9), 1 }
   0xf   : > { %s412_s13 = sshll.u32 %s572_s9, 1  ;;  %s425_s17 = sshll.u32 %s572_s9, 6 }
  0x10   : > { %s189_s16 = scalar_lea.vmem %s565_s1, %s412_s13  ;;  %s184_s20 = scalar_lea.vmem %s564_s0, %s425_s17 }
  0x11   : > { %v208_v0 = vld [vmem:[%s189_s16] sm:$0x3]  ;;  %v201_v11 = vld [vmem:[%s184_s20 + $0x8] sm:$0xff]  ;;  %v202_v13 = vld [vmem:[%s184_s20 + $0x10] sm:$0xff]  ;;  %s426_s21 = sshll.u32 %s572_s9, 5 }
  0x12   : > { %v209_v1 = vmul.f32 0.015625, %v208_v0  ;;  %v200_v10 = vld [vmem:[%s184_s20] sm:$0xff]  ;;  %v203_v14 = vld [vmem:[%s184_s20 + $0x18] sm:$0xff]  ;;  %v205_v17 = vld [vmem:[%s184_s20 + $0x28] sm:$0xff]  ;;  %s198_s24 = scalar_lea.vmem %s566_s2, %s426_s21 }
  0x13   : > { %v204_v15 = vld [vmem:[%s184_s20 + $0x20] sm:$0xff]  ;;  %v206_v18 = vld [vmem:[%s184_s20 + $0x30] sm:$0xff]  ;;  %v207_v19 = vld [vmem:[%s184_s20 + $0x38] sm:$0xff] }
  0x14   : > { %v210_v2 = vmul.f32 %v209_v1, %v209_v1  ;;  %v219_v12 = vrot.slane %v209_v1, %v218_v9 }
  0x16   : > { %v212_v3 = vrot.slane %v210_v2, 7  ;;  %v220_v20 = vsub.f32 %v200_v10, %v219_v12  ;;  %v221_v21 = vsub.f32 %v201_v11, %v219_v12  ;;  %v222_v22 = vsub.f32 %v202_v13, %v219_v12 }
  0x17   : > { %v223_v23 = vsub.f32 %v203_v14, %v219_v12  ;;  %v224_v25 = vsub.f32 %v204_v15, %v219_v12  ;;  %v225_v26 = vsub.f32 %v205_v17, %v219_v12  ;;  %v226_v27 = vsub.f32 %v206_v18, %v219_v12 }
  0x18   : > { %v214_v5 = vsub.f32 %v209_v1, %v212_v3  ;;  %v227_v28 = vsub.f32 %v207_v19, %v219_v12 }
  0x1a   : > { %v215_v6 = vmax.f32 %v214_v5, 0.0 }
  0x1c   : > { %v228_v8 = vadd.f32 1e-05, %v215_v6 }
  0x1e   : > { %482 = vrsqrt.f32 %v228_v8 }
  0x28   : > { %v483_v24 = vpop.eup %482 }
  0x29   : > { %v233_v29 = vrot.slane %v483_v24, %v232_v16 }
  0x2b   : > { %v234_v30 = vmul.f32 %v233_v29, %v220_v20  ;;  %v235_v31 = vmul.f32 %v233_v29, %v221_v21  ;;  %v236_v32 = vmul.f32 %v233_v29, %v222_v22  ;;  %v237_v33 = vmul.f32 %v233_v29, %v223_v23 }
  0x2c   : > { %v238_v34 = vmul.f32 %v233_v29, %v224_v25  ;;  %v239_v35 = vmul.f32 %v233_v29, %v225_v26  ;;  %v240_v36 = vmul.f32 %v233_v29, %v226_v27  ;;  %v241_v37 = vmul.f32 %v233_v29, %v227_v28 }
  0x2d   : > { %vm242_vm0 = vcmp.ge.f32.partialorder %v234_v30, 0.0  ;;  %vm243_vm1 = vcmp.ge.f32.partialorder %v235_v31, 0.0  ;;  %v250_v38 = vmul.f32 0.2, %v234_v30  ;;  %v251_v39 = vmul.f32 0.2, %v235_v31 }
  0x2e   : > { %vm244_vm2 = vcmp.ge.f32.partialorder %v236_v32, 0.0  ;;  %vm245_vm3 = vcmp.ge.f32.partialorder %v237_v33, 0.0  ;;  %v252_v40 = vmul.f32 0.2, %v236_v32  ;;  %v253_v41 = vmul.f32 0.2, %v237_v33 }
  0x2f   : > { %v258_v42 = vsel %vm242_vm0, %v234_v30, %v250_v38  ;;  %v259_v43 = vsel %vm243_vm1, %v235_v31, %v251_v39  ;;  %vm246_vm4 = vcmp.ge.f32.partialorder %v238_v34, 0.0  ;;  %vm247_vm5 = vcmp.ge.f32.partialorder %v239_v35, 0.0 }
  0x30   : > { %v438_v44 = vpack.c.bf16 %v259_v43, %v258_v42  ;;  %v260_v45 = vsel %vm244_vm2, %v236_v32, %v252_v40  ;;  %v261_v46 = vsel %vm245_vm3, %v237_v33, %v253_v41  ;;  %v254_v47 = vmul.f32 0.2, %v238_v34 }
  0x31   : > { %v443_v48 = vpack.c.bf16 %v261_v46, %v260_v45  ;;  %v255_v49 = vmul.f32 0.2, %v239_v35  ;;  %vm248_vm6 = vcmp.ge.f32.partialorder %v240_v36, 0.0  ;;  %vm249_vm7 = vcmp.ge.f32.partialorder %v241_v37, 0.0 }
  0x32   : > { %439 = vst [vmem:[%s198_s24] sm:$0xff] %v438_v44   ;;  %v262_v50 = vsel %vm246_vm4, %v238_v34, %v254_v47  ;;  %v256_v51 = vmul.f32 0.2, %v240_v36  ;;  %v257_v52 = vmul.f32 0.2, %v241_v37 }
  0x33   : > { %455 = vst [vmem:[%s198_s24 + $0x8] sm:$0xff] %v443_v48   ;;  %v263_v53 = vsel %vm247_vm5, %v239_v35, %v255_v49 }
  0x34   : > { %v448_v54 = vpack.c.bf16 %v263_v53, %v262_v50  ;;  %v264_v55 = vsel %vm248_vm6, %v240_v36, %v256_v51  ;;  %v265_v56 = vsel %vm249_vm7, %v241_v37, %v257_v52 }
  0x35   : > { %v453_v57 = vpack.c.bf16 %v265_v56, %v264_v55 }
  0x36   : > { %456 = vst [vmem:[%s198_s24 + $0x10] sm:$0xff] %v448_v54  }
  0x37   : > { %457 = vst [vmem:[%s198_s24 + $0x18] sm:$0xff] %v453_v57  }
  0x38 PF: > { %s12_s11 = sadd.s32 1, %s506_s11   ;;  %s567_s9 = smov %s502_s10 }
  0x39   : > { %p9_p5 = scmp.ge.s32.totalorder %s12_s11, 4   ;;  %s568_s10 = smov %s570_s12 }
  0x3b   :  { %11 = sbr.rel (!%p9_p5) target bundleno = 2 (0x2), region = 61 }

// kernel: discriminator_forward.9
= control target key start
LH: loop header
LB: loop body
LE: loop exit
PB: predicated region body
PF: predicated region fallthrough
CT: control target
= control target key end

     0   :  { %s1362_s12 = smov 0   ;;  %s1364_s13 = smov 0   ;;  %s1548_s0 = inlined_call_operand.vmem [shape: bf16[2,64,1024], index: 0, kind: input, shape index: {}]   ;;  %s1549_s1 = inlined_call_operand.vmem [shape: bf16[1024,128], index: 1, kind: input, shape index: {}]   ;;  %s1550_s2 = inlined_call_operand.vmem [shape: f32[2,64,128], index: 2, kind: output, shape index: {0}]   ;;  %s1551_s3 = inlined_call_operand.vmem [shape: f32[2,2,128], index: 3, kind: output, shape index: {1}]  }
   0x1   :  { %s1366_s14 = smov 0   ;;  %s1368_s15 = smov 0  }
   0x2   :  { %s1370_s16 = smov 0   ;;  %s1372_s17 = smov 0  }
   0x3   :  { %s1374_s18 = smov 0  }
   0x4 LB: > { %s26_s19 = sadd.s32 1, %s1330_s16  ;;  %s33_s20 = sadd.s32 1, %s1334_s17  ;;  %s1338_s18 = sphi %s1374_s18, %s14_s18   ;;  %s1334_s17 = sphi %s1372_s17, %s1557_s17   ;;  %s1330_s16 = sphi %s1370_s16, %s1556_s16   ;;  %s1326_s15 = sphi %s1368_s15, %s1555_s15   ;;  %s1322_s14 = sphi %s1366_s14, %s1554_s14   ;;  %s1318_s13 = sphi %s1364_s13, %s1553_s13   ;;  %s1314_s12 = sphi %s1362_s12, %s1552_s12  }
   0x5   : > { %p27_p0 = scmp.ge.s32.totalorder %s26_s19, 2  ;;  %p51_p1 = scmp.ne.s32.totalorder %s1318_s13, %s1314_s12 }
   0x6   : > { %p52_p2 = scmp.eq.s32.totalorder %s1338_s18, 0  ;;  %s44_s24 = sadd.s32 1, %s1318_s13 }
   0x7   : > { %s1559_s19 = smov (%p27_p0, %s26_s19), 0  ;;  %s1561_s20 = smov (!%p27_p0, %s33_s20), %s1334_s17 }
   0x8   : > { %p53_p3 = por %p52_p2, %p51_p1  ;;  %p35_p4 = scmp.ge.s32.totalorder %s1561_s20, 2 }
   0x9   : > { %s40_s21 = ssub.s32 %s1330_s16, %s1559_s19  ;;  %p1023_p6 = scmp.ge.s32.totalorder %s1338_s18, 4 }
   0xa   : > { %s1563_s20 = smov (%p35_p4, %s1561_s20), 0 }
   0xb   : > { %s37_s22 = ssub.s32 %s1334_s17, %s1563_s20  ;;  %157 = sbr.rel (%p1023_p6) target bundleno = 33 (0x21), region = 16 }
   0xc   : > { %s41_s23 = sor.u32 %s40_s21, %s37_s22 }
   0xd   : > { %p42_p5 = scmp.eq.s32.totalorder %s41_s23, 0 }
   0xf   : > { %s1413_s25 = scalar_select %p42_p5, %s1318_s13, %s44_s24  }
  0x12   : > { %160 = sbr.rel (!%p53_p3) target bundleno = 33 (0x21), region = 20  ;;  %s162_s26 = sand.u32 (%p53_p3), 1, %s1318_s13  }
  0x13   : > { %s1025_s27 = sshll.u32 (%p53_p3), %s1330_s16, 2  ;;  %s1024_s28 = sshll.u32 (%p53_p3), %s162_s26, 7 }
  0x14   : > { %s1026_s29 = sshll.u32 (%p53_p3), %s1334_s17, 6  ;;  %s164_s8 = scalar_lea.vmem (%p53_p3), [#allocation3], %s1024_s28 }
  0x15   : > { %s170_s30 = sadd.s32 (%p53_p3), %s1026_s29, %s1025_s27 }
  0x16   : > { %s1027_s4 = sshll.u32 (%p53_p3), %s170_s30, 2 }
  0x17   : > { %s1422_s7 = scalar_lea.vmem (%p53_p3), %s1548_s0, %s1027_s4 }
  0x18   : > { %v185_v0 = vld [vmem:[%s1422_s7] sm:$0xff] (%p53_p3)  ;;  %v187_v1 = vld [vmem:[%s1422_s7 + $0x8] sm:$0xff] (%p53_p3) }
  0x19   : > { %v189_v2 = vld [vmem:[%s1422_s7 + $0x20] sm:$0xff]  ;;  %186 = vst [vmem:[%s164_s8] sm:$0xff] %v185_v0  ;;  %188 = vst [vmem:[%s164_s8 + $0x8] sm:$0xff] %v187_v1  ;;  %v191_v3 = vld [vmem:[%s1422_s7 + $0x28] sm:$0xff] }
  0x1a   : > { %190 = vst [vmem:[%s164_s8 + $0x10] sm:$0xff] %v189_v2  ;;  %v193_v4 = vld [vmem:[%s1422_s7 + $0x40] sm:$0xff]  ;;  %v195_v5 = vld [vmem:[%s1422_s7 + $0x48] sm:$0xff]  ;;  %192 = vst [vmem:[%s164_s8 + $0x18] sm:$0xff] %v191_v3 }
  0x1b   : > { %194 = vst [vmem:[%s164_s8 + $0x20] sm:$0xff] %v193_v4  ;;  %196 = vst [vmem:[%s164_s8 + $0x28] sm:$0xff] %v195_v5  ;;  %v197_v6 = vld [vmem:[%s1422_s7 + $0x60] sm:$0xff]  ;;  %v199_v7 = vld [vmem:[%s1422_s7 + $0x68] sm:$0xff] }
  0x1c   : > { %v201_v8 = vld [vmem:[%s1422_s7 + $0x80] sm:$0xff]  ;;  %198 = vst [vmem:[%s164_s8 + $0x30] sm:$0xff] %v197_v6  ;;  %200 = vst [vmem:[%s164_s8 + $0x38] sm:$0xff] %v199_v7  ;;  %v203_v9 = vld [vmem:[%s1422_s7 + $0x88] sm:$0xff] }
  0x1d   : > { %202 = vst [vmem:[%s164_s8 + $0x40] sm:$0xff] %v201_v8  ;;  %v205_v10 = vld [vmem:[%s1422_s7 + $0xa0] sm:$0xff]  ;;  %v207_v11 = vld [vmem:[%s1422_s7 + $0xa8] sm:$0xff]  ;;  %204 = vst [vmem:[%s164_s8 + $0x48] sm:$0xff] %v203_v9 }
  0x1e   : > { %206 = vst [vmem:[%s164_s8 + $0x50] sm:$0xff] %v205_v10  ;;  %208 = vst [vmem:[%s164_s8 + $0x58] sm:$0xff] %v207_v11  ;;  %v209_v12 = vld [vmem:[%s1422_s7 + $0xc0] sm:$0xff]  ;;  %v211_v13 = vld [vmem:[%s1422_s7 + $0xc8] sm:$0xff] }
  0x1f   : > { %v213_v14 = vld [vmem:[%s1422_s7 + $0xe0] sm:$0xff]  ;;  %210 = vst [vmem:[%s164_s8 + $0x60] sm:$0xff] %v209_v12  ;;  %212 = vst [vmem:[%s164_s8 + $0x68] sm:$0xff] %v211_v13  ;;  %v215_v15 = vld [vmem:[%s1422_s7 + $0xe8] sm:$0xff] }
  0x20   : > { %214 = vst [vmem:[%s164_s8 + $0x70] sm:$0xff] %v213_v14  ;;  %216 = vst [vmem:[%s164_s8 + $0x78] sm:$0xff] %v215_v15 }
  0x21 PF: > { %p1028_p7 = scmp.ge.s32.totalorder %s1338_s18, 1  ;;  %p230_p8 = scmp.lt.s32.totalorder %s1338_s18, 5 }
  0x23   : > { %p231_p9 = pnand %p1028_p7, %p230_p8 }
  0x24   : > { %s237_s9 = sand.u32 (!%p231_p9), 1, %s1314_s12   ;;  %s1030_s10 = sshll.u32 (!%p231_p9), %s1322_s14, 6 }
  0x25   : > { %234 = sbr.rel (%p231_p9) target bundleno = 369 (0x171), region = 47  ;;  %s1029_s11 = sshll.u32 (!%p231_p9), %s237_s9, 7 }
  0x26   : > { %p276_p10 = scmp.lt.s32.totalorder (!%p231_p9), %s1030_s10, 127  ;;  %p282_p11 = scmp.lt.s32.totalorder (!%p231_p9), %s1326_s15, 1 }
  0x27   : > { %p296_p12 = scmp.eq.s32.totalorder (!%p231_p9), %s1322_s14, 0  ;;  %s1462_s6 = scalar_lea.vmem (!%p231_p9), [#allocation3], %s1029_s11 }
  0x28   : > { %p1035_p13 = scmp.ne.s32.totalorder (!%p231_p9), %s1322_s14, 0 }
  0x2c   : > { %s1565_s10 = smov (!%p276_p10, %s1030_s10), 127  ;;  %s1567_s15 = smov (!%p282_p11, %s1326_s15), 1 }
  0x2d   : > { %s1031_s21 = sshll.u32 %s1565_s10, 2  ;;  %s1088_s26 = sshll.u32 %s1567_s15, 6  ;;  %v1340_v16 = vmov (!%p1035_p13), 0.0  }
  0x2e   : > { %s1450_s24 = scalar_lea.vmem %s1549_s1, %s1031_s21  ;;  %s1455_s29 = scalar_lea.vmem %s1550_s2, %s1088_s26  ;;  %300 = vst [vmem:[#allocation2] sm:$0xff] (!%p1035_p13), %v1340_v16  ;;  %301 = vst [vmem:[#allocation2 + $0x8] sm:$0xff] (!%p1035_p13), %v1340_v16 }
  0x2f   : > { %s1034_s12 = sshll.u32 %s1567_s15, 1  ;;  %299 = sbr.rel (%p1035_p13) target bundleno = 54 (0x36), region = 55  ;;  %302 = vst [vmem:[#allocation2 + $0x10] sm:$0xff] (!%p1035_p13), %v1340_v16  ;;  %303 = vst [vmem:[#allocation2 + $0x18] sm:$0xff] (!%p1035_p13), %v1340_v16 }
  0x30   : > { %s1460_s5 = scalar_lea.vmem %s1551_s3, %s1034_s12  ;;  %304 = vst [vmem:[#allocation2 + $0x20] sm:$0xff] (!%p1035_p13), %v1340_v16  ;;  %305 = vst [vmem:[#allocation2 + $0x28] sm:$0xff] (!%p1035_p13), %v1340_v16 }
  0x31   : > { %306 = vst [vmem:[#allocation2 + $0x30] sm:$0xff] (!%p1035_p13), %v1340_v16  ;;  %307 = vst [vmem:[#allocation2 + $0x38] sm:$0xff] (!%p1035_p13), %v1340_v16 }
  0x36 PF: > { %312 = sbr.rel (!%p296_p12) target bundleno = 61 (0x3d), region = 59  ;;  %v1341_v17 = vmov (%p296_p12), 0.0  }
  0x37   : > { %313 = vst [vmem:[%s1460_s5] sm:$0x3] (%p296_p12), %v1341_v17 }
  0x3d PF: > { %v1228_v18 = vld [vmem:[%s1450_s24 + $0x40] sm:$0xff]   ;;  %v1232_v22 = vld [vmem:[%s1450_s24 + $0x48] sm:$0xff]   ;;  %v1236_v26 = vld [vmem:[%s1450_s24 + $0x50] sm:$0xff]   ;;  %p1085_p0 = scmp.ne.s32.totalorder %s1322_s14, 1 }
  0x3e   : > { %v1229_v19 = vld [vmem:[%s1450_s24 + $0xc0] sm:$0xff]   ;;  %1090 = vmatprep.subr.bf16.mxu0 %v1228_v18  ;;  %v1233_v23 = vld [vmem:[%s1450_s24 + $0xc8] sm:$0xff]   ;;  %v1237_v27 = vld [vmem:[%s1450_s24 + $0xd0] sm:$0xff]   ;;  %vm875_vm0 = vcmask (!%p1085_p0), 1040384  }
  0x3f   : > { %v1230_v20 = vld [vmem:[%s1450_s24] sm:$0xff]   ;;  %1130 = vmatprep.subr.bf16.mxu1 %v1229_v19  ;;  %v1234_v24 = vld [vmem:[%s1450_s24 + $0x8] sm:$0xff]   ;;  %v1238_v28 = vld [vmem:[%s1450_s24 + $0x10] sm:$0xff]  }
  0x40   : > { %v1231_v21 = vld [vmem:[%s1450_s24 + $0x80] sm:$0xff]   ;;  %1091 = vmatpush3.bf16.msra.mxu0 %v1230_v20  ;;  %v1235_v25 = vld [vmem:[%s1450_s24 + $0x88] sm:$0xff]   ;;  %v1239_v29 = vld [vmem:[%s1450_s24 + $0x90] sm:$0xff]  }
  0x41   : > { %1131 = vmatpush3.bf16.msra.mxu1 %v1231_v21  ;;  %1092 = vmatprep.subr.bf16.mxu0 %v1232_v22  ;;  %v1240_v30 = vld [vmem:[%s1450_s24 + $0x58] sm:$0xff]   ;;  %v1244_v34 = vld [vmem:[%s1450_s24 + $0x60] sm:$0xff]   ;;  %v1248_v38 = vld [vmem:[%s1450_s24 + $0x68] sm:$0xff]  }
  0x42   : > { %1132 = vmatprep.subr.bf16.mxu1 %v1233_v23  ;;  %v1241_v31 = vld [vmem:[%s1450_s24 + $0xd8] sm:$0xff]   ;;  %v1245_v35 = vld [vmem:[%s1450_s24 + $0xe0] sm:$0xff]   ;;  %v1249_v39 = vld [vmem:[%s1450_s24 + $0xe8] sm:$0xff]  }
  0x43   : > { %v1242_v32 = vld [vmem:[%s1450_s24 + $0x18] sm:$0xff]   ;;  %v1246_v36 = vld [vmem:[%s1450_s24 + $0x20] sm:$0xff]   ;;  %v1250_v40 = vld [vmem:[%s1450_s24 + $0x28] sm:$0xff]  }
  0x44   : > { %1093 = vmatpush3.bf16.msra.mxu0 %v1234_v24  ;;  %v1243_v33 = vld [vmem:[%s1450_s24 + $0x98] sm:$0xff]   ;;  %v1247_v37 = vld [vmem:[%s1450_s24 + $0xa0] sm:$0xff]   ;;  %v1251_v41 = vld [vmem:[%s1450_s24 + $0xa8] sm:$0xff]  }
  0x45   : > { %1133 = vmatpush3.bf16.msra.mxu1 %v1235_v25  ;;  %1094 = vmatprep.subr.bf16.mxu0 %v1236_v26  ;;  %v1252_v42 = vld [vmem:[%s1450_s24 + $0x70] sm:$0xff]   ;;  %v1256_v46 = vld [vmem:[%s1450_s24 + $0x78] sm:$0xff]   ;;  %v314_v11 = vld [vmem:[#allocation2] sm:$0xff] }
  0x46   : > { %1134 = vmatprep.subr.bf16.mxu1 %v1237_v27  ;;  %v1253_v43 = vld [vmem:[%s1450_s24 + $0xf0] sm:$0xff]   ;;  %v1257_v47 = vld [vmem:[%s1450_s24 + $0xf8] sm:$0xff]   ;;  %v315_v16 = vld [vmem:[#allocation2 + $0x8] sm:$0xff] }
  0x47   : > { %v1254_v44 = vld [vmem:[%s1450_s24 + $0x30] sm:$0xff]   ;;  %v1258_v48 = vld [vmem:[%s1450_s24 + $0x38] sm:$0xff]  }
  0x48   : > { %1095 = vmatpush3.bf16.msra.mxu0 %v1238_v28  ;;  %v1255_v45 = vld [vmem:[%s1450_s24 + $0xb0] sm:$0xff]   ;;  %v1259_v49 = vld [vmem:[%s1450_s24 + $0xb8] sm:$0xff]  }
  0x49   : > { %1135 = vmatpush3.bf16.msra.mxu1 %v1239_v29  ;;  %1096 = vmatprep.subr.bf16.mxu0 %v1240_v30  ;;  %v1260_v50 = vld [vmem:[%s1462_s6] ss:$16 sps:$4 sm:$0xff]   ;;  %v1262_v51 = vld [vmem:[%s1462_s6 + $0x4] ss:$16 sps:$4 sm:$0xff]   ;;  %v1263_v52 = vld [vmem:[%s1462_s6 + $0x8] ss:$16 sps:$4 sm:$0xff]  }
  0x4a   : > { %1136 = vmatprep.subr.bf16.mxu1 %v1241_v31  ;;  %v1265_v53 = vld [vmem:[%s1462_s6 + $0xc] ss:$16 sps:$4 sm:$0xff]   ;;  %706 = vmatprep.mubr.bf16.mxu0 %v1262_v51  ;;  %v1266_v54 = vld [vmem:[%s1462_s6 + $0x24] ss:$16 sps:$4 sm:$0xff]   ;;  %v1270_v56 = vld [vmem:[%s1462_s6 + $0x20] ss:$16 sps:$4 sm:$0xff]  }
  0x4b   : > { %771 = vmatprep.mubr.bf16.mxu1 %v1265_v53  ;;  %v1268_v55 = vld [vmem:[%s1462_s6 + $0x2c] ss:$16 sps:$4 sm:$0xff]   ;;  %v1271_v57 = vld [vmem:[%s1462_s6 + $0x28] ss:$16 sps:$4 sm:$0xff]   ;;  %v1272_v58 = vld [vmem:[%s1462_s6 + $0x44] ss:$16 sps:$4 sm:$0xff]  }
  0x4c   : > { %1097 = vmatpush3.bf16.msra.mxu0 %v1242_v32  ;;  %v1274_v59 = vld [vmem:[%s1462_s6 + $0x4c] ss:$16 sps:$4 sm:$0xff]   ;;  %v1276_v60 = vld [vmem:[%s1462_s6 + $0x40] ss:$16 sps:$4 sm:$0xff]   ;;  %v1277_v61 = vld [vmem:[%s1462_s6 + $0x48] ss:$16 sps:$4 sm:$0xff]  }
  0x4d   : > { %1137 = vmatpush3.bf16.msra.mxu1 %v1243_v33  ;;  %1098 = vmatprep.subr.bf16.mxu0 %v1244_v34  ;;  %v1278_v62 = vld [vmem:[%s1462_s6 + $0x64] ss:$16 sps:$4 sm:$0xff]   ;;  %v1280_v63 = vld [vmem:[%s1462_s6 + $0x6c] ss:$16 sps:$4 sm:$0xff]   ;;  %v1282_v0 = vld [vmem:[%s1462_s6 + $0x60] ss:$16 sps:$4 sm:$0xff]  }
  0x4e   : > { %1138 = vmatprep.subr.bf16.mxu1 %v1245_v35  ;;  %v1283_v1 = vld [vmem:[%s1462_s6 + $0x68] ss:$16 sps:$4 sm:$0xff]   ;;  %v316_v29 = vld [vmem:[#allocation2 + $0x10] sm:$0xff] }
  0x4f   : > { %v317_v34 = vld [vmem:[#allocation2 + $0x18] sm:$0xff] }
  0x50   : > { %1099 = vmatpush3.bf16.msra.mxu0 %v1246_v36 }
  0x51   : > { %1139 = vmatpush3.bf16.msra.mxu1 %v1247_v37  ;;  %1100 = vmatprep.subr.bf16.mxu0 %v1248_v38 }
  0x52   : > { %1140 = vmatprep.subr.bf16.mxu1 %v1249_v39 }
  0x54   : > { %1101 = vmatpush3.bf16.msra.mxu0 %v1250_v40 }
  0x55   : > { %1141 = vmatpush3.bf16.msra.mxu1 %v1251_v41  ;;  %1102 = vmatprep.subr.bf16.mxu0 %v1252_v42 }
  0x56   : > { %1142 = vmatprep.subr.bf16.mxu1 %v1253_v43 }
  0x58   : > { %1103 = vmatpush3.bf16.msra.mxu0 %v1254_v44 }
  0x59   : > { %1143 = vmatpush3.bf16.msra.mxu1 %v1255_v45  ;;  %1104 = vmatprep.subr.bf16.mxu0 %v1256_v46 }
  0x5a   : > { %1144 = vmatprep.subr.bf16.mxu1 %v1257_v47  ;;  %v318_v47 = vld [vmem:[#allocation2 + $0x20] sm:$0xff] }
  0x5c   : > { %1105 = vmatpush3.bf16.msra.mxu0 %v1258_v48 }
  0x5d   : > { %1145 = vmatpush3.bf16.msra.mxu1 %v1259_v49 }
  0x5f   : > { %707 = vmatmul.mubr.bf16.vlgmr.msra.gmra.mrb[0].mxu0 %v1260_v50 }
  0x60   : > { %772 = vmatmul.mubr.bf16.vlgmr.msra.gmra.mrb[0].mxu1 %v1263_v52  ;;  %714 = vmatprep.mubr.bf16.mxu0 %v1266_v54  ;;  %v319_v52 = vld [vmem:[#allocation2 + $0x28] sm:$0xff] }
  0x61   : > { %779 = vmatprep.mubr.bf16.mxu1 %v1268_v55 }
  0x67   : > { %715 = vmatmul.mubr.bf16.gmra.mrb[4].mxu0 %v1270_v56 }
  0x68   : > { %780 = vmatmul.mubr.bf16.gmra.mrb[4].mxu1 %v1271_v57  ;;  %722 = vmatprep.mubr.bf16.mxu0 %v1272_v58 }
  0x69   : > { %787 = vmatprep.mubr.bf16.mxu1 %v1274_v59 }
  0x6f   : > { %723 = vmatmul.mubr.bf16.gmra.mrb[8].mxu0 %v1276_v60 }
  0x70   : > { %788 = vmatmul.mubr.bf16.gmra.mrb[8].mxu1 %v1277_v61  ;;  %730 = vmatprep.mubr.bf16.mxu0 %v1278_v62 }
  0x71   : > { %795 = vmatprep.mubr.bf16.mxu1 %v1280_v63 }
  0x77   : > { %731 = vmatmul.mubr.bf16.gmra.mrb[12].mxu0 %v1282_v0 }
  0x78   : > { %796 = vmatmul.mubr.bf16.gmra.mrb[12].mxu1 %v1283_v1  ;;  %v320_v1 = vld [vmem:[#allocation2 + $0x30] sm:$0xff] }
 0x132   : > { %v1106_v2 = vpop.f32.mrb[0].mxu0 }
 0x133   : > { %v1146_v3 = vpop.f32.mrb[0].mxu1  ;;  %v1107_v4 = vpop.f32.mrb[1].mxu0 }
 0x134   : > { %v1108_v5 = vadd.f32 %v1107_v4, %v1106_v2  ;;  %v1147_v6 = vpop.f32.mrb[1].mxu1  ;;  %v1109_v7 = vpop.f32.mrb[2].mxu0 }
 0x135   : > { %v1148_v8 = vadd.f32 %v1147_v6, %v1146_v3  ;;  %v1149_v9 = vpop.f32.mrb[2].mxu1  ;;  %v1110_v10 = vpop.f32.mrb[3].mxu0  ;;  %v321_v6 = vld [vmem:[#allocation2 + $0x38] sm:$0xff] }
 0x136   : > { %v1111_v12 = vadd.f32 %v1110_v10, %v1109_v7  ;;  %v1150_v13 = vpop.f32.mrb[3].mxu1 }
 0x137   : > { %v774_v14 = vadd.f32 %v1148_v8, %v1108_v5  ;;  %v1151_v15 = vadd.f32 %v1150_v13, %v1149_v9 }
 0x139   : > { %v804_v17 = vadd.f32 %v774_v14, %v314_v11  ;;  %v777_v18 = vadd.f32 %v1151_v15, %v1111_v12 }
 0x13a   : > { %v1112_v19 = vpop.f32.mrb[4].mxu0 }
 0x13b   : > { %812 = vst [vmem:[#allocation2] sm:$0xff] %v804_v17  ;;  %v805_v20 = vadd.f32 %v777_v18, %v315_v16  ;;  %v1152_v21 = vpop.f32.mrb[4].mxu1  ;;  %v1113_v22 = vpop.f32.mrb[5].mxu0 }
 0x13c   : > { %v1114_v23 = vadd.f32 %v1113_v22, %v1112_v19  ;;  %v1153_v24 = vpop.f32.mrb[5].mxu1  ;;  %v1115_v25 = vpop.f32.mrb[6].mxu0 }
 0x13d   : > { %813 = vst [vmem:[#allocation2 + $0x8] sm:$0xff] %v805_v20  ;;  %v1154_v26 = vadd.f32 %v1153_v24, %v1152_v21  ;;  %v1155_v27 = vpop.f32.mrb[6].mxu1  ;;  %v1116_v28 = vpop.f32.mrb[7].mxu0 }
 0x13e   : > { %v1117_v30 = vadd.f32 %v1116_v28, %v1115_v25  ;;  %v1156_v31 = vpop.f32.mrb[7].mxu1 }
 0x13f   : > { %v782_v32 = vadd.f32 %v1154_v26, %v1114_v23  ;;  %v1157_v33 = vadd.f32 %v1156_v31, %v1155_v27 }
 0x141   : > { %v806_v35 = vadd.f32 %v782_v32, %v316_v29  ;;  %v785_v36 = vadd.f32 %v1157_v33, %v1117_v30 }
 0x142   : > { %v1118_v37 = vpop.f32.mrb[8].mxu0  ;;  %v824_v10 = vld [vmem:[#allocation2] sm:$0xff] (!%p1085_p0) }
 0x143   : > { %814 = vst [vmem:[#allocation2 + $0x10] sm:$0xff] %v806_v35  ;;  %v807_v38 = vadd.f32 %v785_v36, %v317_v34  ;;  %v1158_v39 = vpop.f32.mrb[8].mxu1  ;;  %v1119_v40 = vpop.f32.mrb[9].mxu0  ;;  %832 = vst [vmem:[%s1455_s29] sm:$0xff] (!%p1085_p0), %v824_v10  ;;  %v853_v13 = vmul.f32 (!%p1085_p0), %v824_v10, %v824_v10 }
 0x144   : > { %v1120_v41 = vadd.f32 %v1119_v40, %v1118_v37  ;;  %v1159_v42 = vpop.f32.mrb[9].mxu1  ;;  %v1121_v43 = vpop.f32.mrb[10].mxu0  ;;  %v825_v11 = vld [vmem:[#allocation2 + $0x8] sm:$0xff] (!%p1085_p0) }
 0x145   : > { %815 = vst [vmem:[#allocation2 + $0x18] sm:$0xff] %v807_v38  ;;  %v1160_v44 = vadd.f32 %v1159_v42, %v1158_v39  ;;  %v1161_v45 = vpop.f32.mrb[10].mxu1  ;;  %v1122_v46 = vpop.f32.mrb[11].mxu0  ;;  %833 = vst [vmem:[%s1455_s29 + $0x8] sm:$0xff] (!%p1085_p0), %v825_v11  ;;  %v840_v14 = vadd.f32 (!%p1085_p0), %v825_v11, %v824_v10  ;;  %v854_v15 = vmul.f32 (!%p1085_p0), %v825_v11, %v825_v11 }
 0x146   : > { %v1123_v48 = vadd.f32 %v1122_v46, %v1121_v43  ;;  %v1162_v49 = vpop.f32.mrb[11].mxu1 }
 0x147   : > { %v790_v50 = vadd.f32 %v1160_v44, %v1120_v41  ;;  %v1163_v51 = vadd.f32 %v1162_v49, %v1161_v45  ;;  %v861_v22 = vadd.f32 (!%p1085_p0), %v854_v15, %v853_v13 }
 0x149   : > { %v808_v53 = vadd.f32 %v790_v50, %v318_v47  ;;  %v793_v54 = vadd.f32 %v1163_v51, %v1123_v48 }
 0x14a   : > { %v1124_v55 = vpop.f32.mrb[12].mxu0  ;;  %v826_v12 = vld [vmem:[#allocation2 + $0x10] sm:$0xff] (!%p1085_p0) }
 0x14b   : > { %816 = vst [vmem:[#allocation2 + $0x20] sm:$0xff] %v808_v53  ;;  %v809_v56 = vadd.f32 %v793_v54, %v319_v52  ;;  %v1164_v57 = vpop.f32.mrb[12].mxu1  ;;  %v1125_v58 = vpop.f32.mrb[13].mxu0  ;;  %834 = vst [vmem:[%s1455_s29 + $0x10] sm:$0xff] (!%p1085_p0), %v826_v12  ;;  %v855_v16 = vmul.f32 (!%p1085_p0), %v826_v12, %v826_v12  ;;  %v841_v23 = vadd.f32 (!%p1085_p0), %v840_v14, %v826_v12  ;;  %v874_v52 = vld [vmem:[%s1460_s5] sm:$0x3] (!%p1085_p0) }
 0x14c   : > { %v1126_v59 = vadd.f32 %v1125_v58, %v1124_v55  ;;  %v1165_v60 = vpop.f32.mrb[13].mxu1  ;;  %v1127_v61 = vpop.f32.mrb[14].mxu0  ;;  %v827_v17 = vld [vmem:[#allocation2 + $0x18] sm:$0xff] (!%p1085_p0) }
 0x14d   : > { %817 = vst [vmem:[#allocation2 + $0x28] sm:$0xff] %v809_v56  ;;  %v1166_v62 = vadd.f32 %v1165_v60, %v1164_v57  ;;  %v1167_v63 = vpop.f32.mrb[14].mxu1  ;;  %v1128_v0 = vpop.f32.mrb[15].mxu0  ;;  %835 = vst [vmem:[%s1455_s29 + $0x18] sm:$0xff] (!%p1085_p0), %v827_v17  ;;  %v856_v24 = vmul.f32 (!%p1085_p0), %v827_v17, %v827_v17  ;;  %v862_v25 = vadd.f32 (!%p1085_p0), %v861_v22, %v855_v16 }
 0x14e   : > { %v1129_v2 = vadd.f32 %v1128_v0, %v1127_v61  ;;  %v1168_v3 = vpop.f32.mrb[15].mxu1  ;;  %v842_v26 = vadd.f32 (!%p1085_p0), %v841_v23, %v827_v17 }
 0x14f   : > { %v798_v4 = vadd.f32 %v1166_v62, %v1126_v59  ;;  %v1169_v5 = vadd.f32 %v1168_v3, %v1167_v63  ;;  %823 = sbr.rel (%p1085_p0) target bundleno = 369 (0x171), region = 63  ;;  %v863_v28 = vadd.f32 (!%p1085_p0), %v862_v25, %v856_v24 }
 0x151   : > { %v810_v7 = vadd.f32 %v798_v4, %v320_v1  ;;  %v801_v8 = vadd.f32 %v1169_v5, %v1129_v2 }
 0x152   : > { %v828_v18 = vld [vmem:[#allocation2 + $0x20] sm:$0xff] (!%p1085_p0) }
 0x153   : > { %818 = vst [vmem:[#allocation2 + $0x30] sm:$0xff] %v810_v7  ;;  %v811_v9 = vadd.f32 %v801_v8, %v321_v6  ;;  %836 = vst [vmem:[%s1455_s29 + $0x20] sm:$0xff] (!%p1085_p0), %v828_v18  ;;  %v857_v27 = vmul.f32 (!%p1085_p0), %v828_v18, %v828_v18  ;;  %v843_v29 = vadd.f32 (!%p1085_p0), %v842_v26, %v828_v18 }
 0x154   : > { %v829_v19 = vld [vmem:[#allocation2 + $0x28] sm:$0xff] (!%p1085_p0) }
 0x155   : > { %819 = vst [vmem:[#allocation2 + $0x38] sm:$0xff] %v811_v9  ;;  %837 = vst [vmem:[%s1455_s29 + $0x28] sm:$0xff] (!%p1085_p0), %v829_v19  ;;  %v858_v30 = vmul.f32 (!%p1085_p0), %v829_v19, %v829_v19  ;;  %v864_v31 = vadd.f32 (!%p1085_p0), %v863_v28, %v857_v27  ;;  %v844_v32 = vadd.f32 (!%p1085_p0), %v843_v29, %v829_v19 }
 0x157   : > { %v865_v34 = vadd.f32 %v864_v31, %v858_v30 }
 0x15a   : > { %v830_v20 = vld [vmem:[#allocation2 + $0x30] sm:$0xff] }
 0x15b   : > { %838 = vst [vmem:[%s1455_s29 + $0x30] sm:$0xff] %v830_v20  ;;  %v859_v33 = vmul.f32 %v830_v20, %v830_v20  ;;  %v845_v35 = vadd.f32 %v844_v32, %v830_v20 }
 0x15c   : > { %v831_v21 = vld [vmem:[#allocation2 + $0x38] sm:$0xff] }
 0x15d   : > { %839 = vst [vmem:[%s1455_s29 + $0x38] sm:$0xff] %v831_v21  ;;  %v860_v36 = vmul.f32 %v831_v21, %v831_v21  ;;  %v866_v37 = vadd.f32 %v865_v34, %v859_v33  ;;  %v846_v38 = vadd.f32 %v845_v35, %v831_v21 }
 0x15f   : > { %v847_v39 = vrot.slane %v846_v38, 4  ;;  %v867_v40 = vadd.f32 %v866_v37, %v860_v36 }
 0x161   : > { %v848_v41 = vadd.f32 %v847_v39, %v846_v38  ;;  %v868_v42 = vrot.slane %v867_v40, 4 }
 0x163   : > { %v849_v43 = vrot.slane %v848_v41, 2  ;;  %v869_v44 = vadd.f32 %v868_v42, %v867_v40 }
 0x165   : > { %v850_v45 = vadd.f32 %v849_v43, %v848_v41  ;;  %v870_v46 = vrot.slane %v869_v44, 2 }
 0x167   : > { %v851_v47 = vrot.slane %v850_v45, 1  ;;  %v871_v48 = vadd.f32 %v870_v46, %v869_v44 }
 0x169   : > { %v852_v49 = vadd.f32 %v851_v47, %v850_v45  ;;  %v872_v50 = vrot.slane %v871_v48, 1 }
 0x16b   : > { %v873_v51 = vadd.f32 %v872_v50, %v871_v48 }
 0x16d   : > { %v876_v53 = vsel %vm875_vm0, %v852_v49, %v873_v51 }
 0x16e   : > { %v877_v54 = vadd.f32 %v876_v53, %v874_v52 }
 0x170   : > { %878 = vst [vmem:[%s1460_s5] sm:$0x3] %v877_v54 }
 0x171 PF: > { %s14_s18 = sadd.s32 1, %s1338_s18   ;;  %s1552_s12 = smov %s1318_s13 }
 0x172   : > { %p11_p1 = scmp.ge.s32.totalorder %s14_s18, 6   ;;  %s1553_s13 = smov %s1413_s25 }
 0x173   : > { %s1554_s14 = smov %s1330_s16  ;;  %s1555_s15 = smov %s1334_s17 }
 0x174   : > { %s1556_s16 = smov %s1559_s19  ;;  %s1557_s17 = smov %s1563_s20 }
 0x175   :  { %13 = sbr.rel (!%p11_p1) target bundleno = 4 (0x4), region = 113 }

// kernel: discriminator_forward.12
= control target key start
LH: loop header
LB: loop body
LE: loop exit
PB: predicated region body
PF: predicated region fallthrough
CT: control target
= control target key end

     0   :  { %s487_s9 = smov 0   ;;  %s489_s10 = smov 0   ;;  %s528_s0 = inlined_call_operand.vmem [shape: f32[2,16,256], index: 0, kind: input, shape index: {}]   ;;  %s529_s1 = inlined_call_operand.vmem [shape: f32[2,2,256], index: 1, kind: input, shape index: {}]   ;;  %s530_s2 = inlined_call_operand.vmem [shape: bf16[2,16,256], index: 2, kind: output, shape index: {}]  }
   0x1   :  { %s491_s11 = smov 0  }
   0x2 LB: > { %s24_s12 = sadd.s32 1, %s466_s10  ;;  %p406_p0 = scmp.ge.s32.totalorder %s470_s11, 1  ;;  %s470_s11 = sphi %s491_s11, %s12_s11   ;;  %s466_s10 = sphi %s489_s10, %s532_s10   ;;  %s462_s9 = sphi %s487_s9, %s531_s9  }
   0x3   : > { %p26_p1 = scmp.ge.s32.totalorder %s24_s12, 2  ;;  %p144_p2 = scmp.lt.s32.totalorder %s470_s11, 3 }
   0x5   : > { %s534_s12 = smov (%p26_p1, %s24_s12), 0  ;;  %p145_p3 = pnand %p406_p0, %p144_p2 }
   0x6   : > { %p182_p4 = scmp.lt.s32.totalorder (!%p145_p3), %s462_s9, 1  ;;  %v221_v3 = vlaneseq (!%p145_p3) }
   0x7   : > { %148 = sbr.rel (%p145_p3) target bundleno = 54 (0x36), region = 28 }
   0x8   : > { %v222_v6 = vshrl.u32 (!%p145_p3), %v221_v3, 7 }
   0xa   : > { %v223_v8 = vsub.s32 (!%p145_p3), 0, %v222_v6  ;;  %v227_v9 = vsub.s32 (!%p145_p3), 2, %v222_v6  ;;  %v248_v17 = vsub.s32 (!%p145_p3), 1, %v222_v6  ;;  %v252_v18 = vsub.s32 (!%p145_p3), 3, %v222_v6 }
   0xe   : > { %s536_s9 = smov (!%p182_p4, %s462_s9), 1 }
   0xf   : > { %s418_s13 = sshll.u32 %s536_s9, 2  ;;  %s417_s17 = sshll.u32 %s536_s9, 5 }
  0x10   : > { %s196_s16 = scalar_lea.vmem %s529_s1, %s418_s13  ;;  %s190_s20 = scalar_lea.vmem %s528_s0, %s417_s17 }
  0x11   : > { %v212_v0 = vld [vmem:[%s196_s16] sm:$0xf]  ;;  %v209_v16 = vld [vmem:[%s190_s20 + $0x8] sm:$0xff]  ;;  %v210_v19 = vld [vmem:[%s190_s20 + $0x10] sm:$0xff]  ;;  %s419_s21 = sshll.u32 %s536_s9, 4 }
  0x12   : > { %v213_v1 = vmul.f32 0.0625, %v212_v0  ;;  %v208_v15 = vld [vmem:[%s190_s20] sm:$0xff]  ;;  %v211_v20 = vld [vmem:[%s190_s20 + $0x18] sm:$0xff]  ;;  %s206_s24 = scalar_lea.vmem %s530_s2, %s419_s21 }
  0x14   : > { %v214_v2 = vmul.f32 %v213_v1, %v213_v1  ;;  %v224_v11 = vrot.slane %v213_v1, %v223_v8  ;;  %v228_v12 = vrot.slane %v213_v1, %v227_v9 }
  0x16   : > { %v216_v4 = vrot.slane %v214_v2, 7  ;;  %v234_v13 = vrot.slane %v224_v11, %v223_v8  ;;  %v238_v14 = vrot.slane %v228_v12, %v223_v8 }
  0x18   : > { %v218_v5 = vsub.f32 %v213_v1, %v216_v4  ;;  %v239_v22 = vsub.f32 %v208_v15, %v234_v13  ;;  %v240_v23 = vsub.f32 %v209_v16, %v238_v14  ;;  %v241_v26 = vsub.f32 %v210_v19, %v234_v13 }
  0x19   : > { %v242_v27 = vsub.f32 %v211_v20, %v238_v14 }
  0x1a   : > { %v219_v7 = vmax.f32 %v218_v5, 0.0 }
  0x1c   : > { %v243_v10 = vadd.f32 1e-05, %v219_v7 }
  0x1e   : > { %446 = vrsqrt.f32 %v243_v10 }
  0x28   : > { %v447_v21 = vpop.eup %446 }
  0x29   : > { %v249_v24 = vrot.slane %v447_v21, %v248_v17  ;;  %v253_v25 = vrot.slane %v447_v21, %v252_v18 }
  0x2b   : > { %v259_v28 = vrot.slane %v249_v24, %v248_v17  ;;  %v263_v29 = vrot.slane %v253_v25, %v248_v17 }
  0x2d   : > { %v264_v30 = vmul.f32 %v259_v28, %v239_v22  ;;  %v265_v31 = vmul.f32 %v263_v29, %v240_v23  ;;  %v266_v32 = vmul.f32 %v259_v28, %v241_v26  ;;  %v267_v33 = vmul.f32 %v263_v29, %v242_v27 }
  0x2f   : > { %vm268_vm0 = vcmp.ge.f32.partialorder %v264_v30, 0.0  ;;  %vm269_vm1 = vcmp.ge.f32.partialorder %v265_v31, 0.0  ;;  %v272_v34 = vmul.f32 0.2, %v264_v30  ;;  %v273_v35 = vmul.f32 0.2, %v265_v31 }
  0x30   : > { %vm270_vm2 = vcmp.ge.f32.partialorder %v266_v32, 0.0  ;;  %vm271_vm3 = vcmp.ge.f32.partialorder %v267_v33, 0.0  ;;  %v274_v36 = vmul.f32 0.2, %v266_v32  ;;  %v275_v37 = vmul.f32 0.2, %v267_v33 }
  0x31   : > { %v276_v38 = vsel %vm268_vm0, %v264_v30, %v272_v34  ;;  %v277_v39 = vsel %vm269_vm1, %v265_v31, %v273_v35 }
  0x32   : > { %v420_v40 = vpack.c.bf16 %v277_v39, %v276_v38  ;;  %v278_v41 = vsel %vm270_vm2, %v266_v32, %v274_v36  ;;  %v279_v42 = vsel %vm271_vm3, %v267_v33, %v275_v37 }
  0x33   : > { %v421_v43 = vpack.c.bf16 %v279_v42, %v278_v41 }
  0x34   : > { %292 = vst [vmem:[%s206_s24] sm:$0xff] %v420_v40 }
  0x35   : > { %293 = vst [vmem:[%s206_s24 + $0x8] sm:$0xff] %v421_v43 }
  0x36 PF: > { %s12_s11 = sadd.s32 1, %s470_s11   ;;  %s531_s9 = smov %s466_s10 }
  0x37   : > { %p9_p5 = scmp.ge.s32.totalorder %s12_s11, 4   ;;  %s532_s10 = smov %s534_s12 }
  0x39   :  { %11 = sbr.rel (!%p9_p5) target bundleno = 2 (0x2), region = 61 }

// kernel: discriminator_forward.11
= control target key start
LH: loop header
LB: loop body
LE: loop exit
PB: predicated region body
PF: predicated region fallthrough
CT: control target
= control target key end

     0   :  { %s1346_s12 = smov 0   ;;  %s1348_s13 = smov 0   ;;  %s1530_s0 = inlined_call_operand.vmem [shape: bf16[2,16,2048], index: 0, kind: input, shape index: {}]   ;;  %s1531_s1 = inlined_call_operand.vmem [shape: bf16[2048,256], index: 1, kind: input, shape index: {}]   ;;  %s1532_s2 = inlined_call_operand.vmem [shape: f32[2,16,256], index: 2, kind: output, shape index: {0}]   ;;  %s1533_s3 = inlined_call_operand.vmem [shape: f32[2,2,256], index: 3, kind: output, shape index: {1}]  }
   0x1   :  { %s1350_s14 = smov 0   ;;  %s1352_s15 = smov 0  }
   0x2   :  { %s1354_s16 = smov 0   ;;  %s1356_s17 = smov 0  }
   0x3   :  { %s1358_s18 = smov 0  }
   0x4 LB: > { %s26_s19 = sadd.s32 1, %s1313_s16  ;;  %s33_s20 = sadd.s32 1, %s1317_s17  ;;  %s1321_s18 = sphi %s1358_s18, %s14_s18   ;;  %s1317_s17 = sphi %s1356_s17, %s1539_s17   ;;  %s1313_s16 = sphi %s1354_s16, %s1538_s16   ;;  %s1309_s15 = sphi %s1352_s15, %s1537_s15   ;;  %s1305_s14 = sphi %s1350_s14, %s1536_s14   ;;  %s1301_s13 = sphi %s1348_s13, %s1535_s13   ;;  %s1297_s12 = sphi %s1346_s12, %s1534_s12  }
   0x5   : > { %p27_p0 = scmp.ge.s32.totalorder %s26_s19, 4  ;;  %p51_p1 = scmp.ne.s32.totalorder %s1301_s13, %s1297_s12 }
   0x6   : > { %p52_p2 = scmp.eq.s32.totalorder %s1321_s18, 0  ;;  %s44_s24 = sadd.s32 1, %s1301_s13 }
   0x7   : > { %s1541_s19 = smov (%p27_p0, %s26_s19), 0  ;;  %s1543_s20 = smov (!%p27_p0, %s33_s20), %s1317_s17 }
   0x8   : > { %p53_p3 = por %p52_p2, %p51_p1  ;;  %p35_p4 = scmp.ge.s32.totalorder %s1543_s20, 2 }
   0x9   : > { %s40_s21 = ssub.s32 %s1313_s16, %s1541_s19  ;;  %p1011_p6 = scmp.ge.s32.totalorder %s1321_s18, 8 }
   0xa   : > { %s1545_s20 = smov (%p35_p4, %s1543_s20), 0 }
   0xb   : > { %s37_s22 = ssub.s32 %s1317_s17, %s1545_s20  ;;  %157 = sbr.rel (%p1011_p6) target bundleno = 27 (0x1b), region = 16 }
   0xc   : > { %s41_s23 = sor.u32 %s40_s21, %s37_s22 }
   0xd   : > { %p42_p5 = scmp.eq.s32.totalorder %s41_s23, 0 }
   0xf   : > { %s1397_s25 = scalar_select %p42_p5, %s1301_s13, %s44_s24  }
  0x12   : > { %160 = sbr.rel (!%p53_p3) target bundleno = 27 (0x1b), region = 20  ;;  %s162_s26 = sand.u32 (%p53_p3), 1, %s1301_s13  }
  0x13   : > { %s1013_s27 = sshll.u32 (%p53_p3), %s1313_s16, 2  ;;  %s1012_s28 = sshll.u32 (%p53_p3), %s162_s26, 5 }
  0x14   : > { %s1014_s29 = sshll.u32 (%p53_p3), %s1317_s17, 5  ;;  %s164_s8 = scalar_lea.vmem (%p53_p3), [#allocation3], %s1012_s28 }
  0x15   : > { %s170_s30 = sadd.s32 (%p53_p3), %s1014_s29, %s1013_s27 }
  0x16   : > { %s1015_s4 = sshll.u32 (%p53_p3), %s170_s30, 2 }
  0x17   : > { %s172_s7 = scalar_lea.vmem (%p53_p3), %s1530_s0, %s1015_s4 }
  0x18   : > { %v185_v0 = vld [vmem:[%s172_s7] sm:$0xff] (%p53_p3)  ;;  %v187_v1 = vld [vmem:[%s172_s7 + $0x8] sm:$0xff] (%p53_p3) }
  0x19   : > { %v189_v2 = vld [vmem:[%s172_s7 + $0x40] sm:$0xff]  ;;  %186 = vst [vmem:[%s164_s8] sm:$0xff] %v185_v0  ;;  %188 = vst [vmem:[%s164_s8 + $0x8] sm:$0xff] %v187_v1  ;;  %v191_v3 = vld [vmem:[%s172_s7 + $0x48] sm:$0xff] }
  0x1a   : > { %190 = vst [vmem:[%s164_s8 + $0x10] sm:$0xff] %v189_v2  ;;  %192 = vst [vmem:[%s164_s8 + $0x18] sm:$0xff] %v191_v3 }
  0x1b PF: > { %p1016_p7 = scmp.ge.s32.totalorder %s1321_s18, 1  ;;  %p207_p8 = scmp.lt.s32.totalorder %s1321_s18, 9 }
  0x1d   : > { %p208_p9 = pnand %p1016_p7, %p207_p8 }
  0x1e   : > { %s214_s9 = sand.u32 (!%p208_p9), 1, %s1297_s12   ;;  %s1018_s10 = sshll.u32 (!%p208_p9), %s1305_s14, 6 }
  0x1f   : > { %211 = sbr.rel (%p208_p9) target bundleno = 372 (0x174), region = 47  ;;  %s1017_s11 = sshll.u32 (!%p208_p9), %s214_s9, 5 }
  0x20   : > { %p256_p10 = scmp.lt.s32.totalorder (!%p208_p9), %s1018_s10, 255  ;;  %p263_p11 = scmp.lt.s32.totalorder (!%p208_p9), %s1309_s15, 1 }
  0x21   : > { %p278_p12 = scmp.eq.s32.totalorder (!%p208_p9), %s1305_s14, 0  ;;  %s1428_s6 = scalar_lea.vmem (!%p208_p9), [#allocation3], %s1017_s11 }
  0x22   : > { %p1025_p13 = scmp.ne.s32.totalorder (!%p208_p9), %s1305_s14, 0 }
  0x26   : > { %s1547_s10 = smov (!%p256_p10, %s1018_s10), 255  ;;  %s1549_s15 = smov (!%p263_p11, %s1309_s15), 1 }
  0x27   : > { %s1098_s21 = sshll.u32 %s1547_s10, 3  ;;  %s1099_s26 = sshll.u32 %s1549_s15, 5  ;;  %v1323_v4 = vmov (!%p1025_p13), 0.0  }
  0x28   : > { %s1416_s24 = scalar_lea.vmem %s1531_s1, %s1098_s21  ;;  %s1421_s29 = scalar_lea.vmem %s1532_s2, %s1099_s26  ;;  %282 = vst [vmem:[#allocation2] sm:$0xff] (!%p1025_p13), %v1323_v4  ;;  %283 = vst [vmem:[#allocation2 + $0x8] sm:$0xff] (!%p1025_p13), %v1323_v4 }
  0x29   : > { %s1100_s12 = sshll.u32 %s1549_s15, 2  ;;  %281 = sbr.rel (%p1025_p13) target bundleno = 48 (0x30), region = 55  ;;  %284 = vst [vmem:[#allocation2 + $0x10] sm:$0xff] (!%p1025_p13), %v1323_v4  ;;  %285 = vst [vmem:[#allocation2 + $0x18] sm:$0xff] (!%p1025_p13), %v1323_v4 }
  0x2a   : > { %s1426_s5 = scalar_lea.vmem %s1533_s3, %s1100_s12 }
  0x30 PF: > { %290 = sbr.rel (!%p278_p12) target bundleno = 55 (0x37), region = 59  ;;  %v1324_v5 = vmov (%p278_p12), 0.0  }
  0x31   : > { %291 = vst [vmem:[%s1426_s5] sm:$0xf] (%p278_p12), %v1324_v5 }
  0x37 PF: > { %v1165_v6 = vld [vmem:[%s1416_s24 + $0x4] ss:$8 sps:$4 sm:$0xff]   ;;  %v1169_v8 = vld [vmem:[%s1416_s24] ss:$8 sps:$4 sm:$0xff]   ;;  %v1171_v10 = vld [vmem:[%s1416_s24 + $0x14] ss:$8 sps:$4 sm:$0xff]  }
  0x38   : > { %v1167_v7 = vld [vmem:[%s1416_s24 + $0x104] ss:$8 sps:$4 sm:$0xff]   ;;  %704 = vmatprep.subr.bf16.mxu1 %v1165_v6  ;;  %v1170_v9 = vld [vmem:[%s1416_s24 + $0x100] ss:$8 sps:$4 sm:$0xff]   ;;  %v1173_v11 = vld [vmem:[%s1416_s24 + $0x114] ss:$8 sps:$4 sm:$0xff]  }
  0x39   : > { %747 = vmatprep.subr.bf16.mxu0 %v1167_v7  ;;  %705 = vmatpush1.bf16.msra.mxu1 %v1169_v8  ;;  %v1175_v12 = vld [vmem:[%s1416_s24 + $0x10] ss:$8 sps:$4 sm:$0xff]   ;;  %v1177_v14 = vld [vmem:[%s1416_s24 + $0x24] ss:$8 sps:$4 sm:$0xff]   ;;  %v1181_v16 = vld [vmem:[%s1416_s24 + $0x20] ss:$8 sps:$4 sm:$0xff]  }
  0x3a   : > { %748 = vmatpush1.bf16.msra.mxu0 %v1170_v9  ;;  %706 = vmatprep.subr.bf16.mxu1 %v1171_v10  ;;  %v1176_v13 = vld [vmem:[%s1416_s24 + $0x110] ss:$8 sps:$4 sm:$0xff]   ;;  %v1179_v15 = vld [vmem:[%s1416_s24 + $0x124] ss:$8 sps:$4 sm:$0xff]   ;;  %v1182_v17 = vld [vmem:[%s1416_s24 + $0x120] ss:$8 sps:$4 sm:$0xff]  }
  0x3b   : > { %749 = vmatprep.subr.bf16.mxu0 %v1173_v11  ;;  %v1183_v18 = vld [vmem:[%s1416_s24 + $0x34] ss:$8 sps:$4 sm:$0xff]   ;;  %v1187_v20 = vld [vmem:[%s1416_s24 + $0x30] ss:$8 sps:$4 sm:$0xff]   ;;  %v1189_v22 = vld [vmem:[%s1416_s24 + $0x44] ss:$8 sps:$4 sm:$0xff]  }
  0x3c   : > { %v1185_v19 = vld [vmem:[%s1416_s24 + $0x134] ss:$8 sps:$4 sm:$0xff]   ;;  %v1188_v21 = vld [vmem:[%s1416_s24 + $0x130] ss:$8 sps:$4 sm:$0xff]   ;;  %v1191_v23 = vld [vmem:[%s1416_s24 + $0x144] ss:$8 sps:$4 sm:$0xff]  }
  0x3d   : > { %707 = vmatpush1.bf16.msra.mxu1 %v1175_v12  ;;  %v1193_v24 = vld [vmem:[%s1416_s24 + $0x40] ss:$8 sps:$4 sm:$0xff]   ;;  %v1195_v26 = vld [vmem:[%s1416_s24 + $0x54] ss:$8 sps:$4 sm:$0xff]   ;;  %v1199_v28 = vld [vmem:[%s1416_s24 + $0x50] ss:$8 sps:$4 sm:$0xff]  }
  0x3e   : > { %750 = vmatpush1.bf16.msra.mxu0 %v1176_v13  ;;  %708 = vmatprep.subr.bf16.mxu1 %v1177_v14  ;;  %v1194_v25 = vld [vmem:[%s1416_s24 + $0x140] ss:$8 sps:$4 sm:$0xff]   ;;  %v1197_v27 = vld [vmem:[%s1416_s24 + $0x154] ss:$8 sps:$4 sm:$0xff]   ;;  %v1200_v29 = vld [vmem:[%s1416_s24 + $0x150] ss:$8 sps:$4 sm:$0xff]  }
  0x3f   : > { %751 = vmatprep.subr.bf16.mxu0 %v1179_v15  ;;  %v1201_v30 = vld [vmem:[%s1416_s24 + $0x64] ss:$8 sps:$4 sm:$0xff]   ;;  %v1205_v32 = vld [vmem:[%s1416_s24 + $0x60] ss:$8 sps:$4 sm:$0xff]   ;;  %v1207_v34 = vld [vmem:[%s1416_s24 + $0x74] ss:$8 sps:$4 sm:$0xff]  }
  0x40   : > { %v1203_v31 = vld [vmem:[%s1416_s24 + $0x164] ss:$8 sps:$4 sm:$0xff]   ;;  %v1206_v33 = vld [vmem:[%s1416_s24 + $0x160] ss:$8 sps:$4 sm:$0xff]   ;;  %v1209_v35 = vld [vmem:[%s1416_s24 + $0x174] ss:$8 sps:$4 sm:$0xff]  }
  0x41   : > { %709 = vmatpush1.bf16.msra.mxu1 %v1181_v16  ;;  %v1211_v36 = vld [vmem:[%s1416_s24 + $0x70] ss:$8 sps:$4 sm:$0xff]   ;;  %v1213_v38 = vld [vmem:[%s1416_s24 + $0x84] ss:$8 sps:$4 sm:$0xff]   ;;  %v1217_v40 = vld [vmem:[%s1416_s24 + $0x80] ss:$8 sps:$4 sm:$0xff]  }
  0x42   : > { %752 = vmatpush1.bf16.msra.mxu0 %v1182_v17  ;;  %710 = vmatprep.subr.bf16.mxu1 %v1183_v18  ;;  %v1212_v37 = vld [vmem:[%s1416_s24 + $0x170] ss:$8 sps:$4 sm:$0xff]   ;;  %v1215_v39 = vld [vmem:[%s1416_s24 + $0x184] ss:$8 sps:$4 sm:$0xff]   ;;  %v1218_v41 = vld [vmem:[%s1416_s24 + $0x180] ss:$8 sps:$4 sm:$0xff]  }
  0x43   : > { %753 = vmatprep.subr.bf16.mxu0 %v1185_v19  ;;  %v1219_v42 = vld [vmem:[%s1416_s24 + $0x94] ss:$8 sps:$4 sm:$0xff]   ;;  %v1223_v44 = vld [vmem:[%s1416_s24 + $0x90] ss:$8 sps:$4 sm:$0xff]   ;;  %v1225_v46 = vld [vmem:[%s1416_s24 + $0xa4] ss:$8 sps:$4 sm:$0xff]  }
  0x44   : > { %v1221_v43 = vld [vmem:[%s1416_s24 + $0x194] ss:$8 sps:$4 sm:$0xff]   ;;  %v1224_v45 = vld [vmem:[%s1416_s24 + $0x190] ss:$8 sps:$4 sm:$0xff]   ;;  %v1227_v47 = vld [vmem:[%s1416_s24 + $0x1a4] ss:$8 sps:$4 sm:$0xff]  }
  0x45   : > { %711 = vmatpush1.bf16.msra.mxu1 %v1187_v20  ;;  %v1229_v48 = vld [vmem:[%s1416_s24 + $0xa0] ss:$8 sps:$4 sm:$0xff]   ;;  %v1231_v50 = vld [vmem:[%s1416_s24 + $0xb4] ss:$8 sps:$4 sm:$0xff]   ;;  %v1235_v52 = vld [vmem:[%s1416_s24 + $0xb0] ss:$8 sps:$4 sm:$0xff]  }
  0x46   : > { %754 = vmatpush1.bf16.msra.mxu0 %v1188_v21  ;;  %712 = vmatprep.subr.bf16.mxu1 %v1189_v22  ;;  %v1230_v49 = vld [vmem:[%s1416_s24 + $0x1a0] ss:$8 sps:$4 sm:$0xff]   ;;  %v1233_v51 = vld [vmem:[%s1416_s24 + $0x1b4] ss:$8 sps:$4 sm:$0xff]   ;;  %v1236_v54 = vld [vmem:[%s1416_s24 + $0x1b0] ss:$8 sps:$4 sm:$0xff]  }
  0x47   : > { %755 = vmatprep.subr.bf16.mxu0 %v1191_v23  ;;  %v1263_v53 = vld [vmem:[%s1428_s6 + $0x4] ss:$16 sps:$4 sm:$0xff]   ;;  %v1266_v57 = vld [vmem:[%s1428_s6 + $0xc] ss:$16 sps:$4 sm:$0xff]   ;;  %v1241_v58 = vld [vmem:[%s1416_s24 + $0xc0] ss:$8 sps:$4 sm:$0xff]  }
  0x48   : > { %v1237_v55 = vld [vmem:[%s1416_s24 + $0xc4] ss:$8 sps:$4 sm:$0xff]   ;;  %736 = vmatprep.mubr.bf16.mxu1 %v1263_v53  ;;  %779 = vmatprep.mubr.bf16.mxu0 %v1266_v57  ;;  %v1242_v59 = vld [vmem:[%s1416_s24 + $0x1c0] ss:$8 sps:$4 sm:$0xff]   ;;  %v1243_v60 = vld [vmem:[%s1416_s24 + $0xd4] ss:$8 sps:$4 sm:$0xff]  }
  0x49   : > { %713 = vmatpush1.bf16.msra.mxu1 %v1193_v24  ;;  %v1239_v56 = vld [vmem:[%s1416_s24 + $0x1c4] ss:$8 sps:$4 sm:$0xff]   ;;  %v1245_v61 = vld [vmem:[%s1416_s24 + $0x1d4] ss:$8 sps:$4 sm:$0xff]   ;;  %v1247_v62 = vld [vmem:[%s1416_s24 + $0xd0] ss:$8 sps:$4 sm:$0xff]  }
  0x4a   : > { %756 = vmatpush1.bf16.msra.mxu0 %v1194_v25  ;;  %714 = vmatprep.subr.bf16.mxu1 %v1195_v26  ;;  %v1248_v63 = vld [vmem:[%s1416_s24 + $0x1d0] ss:$8 sps:$4 sm:$0xff]   ;;  %v1249_v0 = vld [vmem:[%s1416_s24 + $0xe4] ss:$8 sps:$4 sm:$0xff]   ;;  %v1253_v2 = vld [vmem:[%s1416_s24 + $0xe0] ss:$8 sps:$4 sm:$0xff]  }
  0x4b   : > { %757 = vmatprep.subr.bf16.mxu0 %v1197_v27  ;;  %v1251_v1 = vld [vmem:[%s1416_s24 + $0x1e4] ss:$8 sps:$4 sm:$0xff]   ;;  %v1254_v3 = vld [vmem:[%s1416_s24 + $0x1e0] ss:$8 sps:$4 sm:$0xff]   ;;  %v1255_v4 = vld [vmem:[%s1416_s24 + $0xf4] ss:$8 sps:$4 sm:$0xff]  }
  0x4c   : > { %v1257_v5 = vld [vmem:[%s1416_s24 + $0x1f4] ss:$8 sps:$4 sm:$0xff]   ;;  %v1259_v6 = vld [vmem:[%s1416_s24 + $0xf0] ss:$8 sps:$4 sm:$0xff]   ;;  %v292_v11 = vld [vmem:[#allocation2] sm:$0xff]  ;;  %p1095_p0 = scmp.ne.s32.totalorder %s1305_s14, 3 }
  0x4d   : > { %715 = vmatpush1.bf16.msra.mxu1 %v1199_v28  ;;  %v1260_v7 = vld [vmem:[%s1416_s24 + $0x1f0] ss:$8 sps:$4 sm:$0xff]   ;;  %v293_v15 = vld [vmem:[#allocation2 + $0x8] sm:$0xff]  ;;  %vm843_vm0 = vcmask (!%p1095_p0), 1040384  }
  0x4e   : > { %758 = vmatpush1.bf16.msra.mxu0 %v1200_v29  ;;  %716 = vmatprep.subr.bf16.mxu1 %v1201_v30  ;;  %v1261_v8 = vld [vmem:[%s1428_s6] ss:$16 sps:$4 sm:$0xff]   ;;  %v1264_v9 = vld [vmem:[%s1428_s6 + $0x8] ss:$16 sps:$4 sm:$0xff]  }
  0x4f   : > { %759 = vmatprep.subr.bf16.mxu0 %v1203_v31  ;;  %v294_v19 = vld [vmem:[#allocation2 + $0x10] sm:$0xff]  ;;  %v295_v24 = vld [vmem:[#allocation2 + $0x18] sm:$0xff] }
  0x51   : > { %717 = vmatpush1.bf16.msra.mxu1 %v1205_v32 }
  0x52   : > { %760 = vmatpush1.bf16.msra.mxu0 %v1206_v33  ;;  %718 = vmatprep.subr.bf16.mxu1 %v1207_v34 }
  0x53   : > { %761 = vmatprep.subr.bf16.mxu0 %v1209_v35 }
  0x55   : > { %719 = vmatpush1.bf16.msra.mxu1 %v1211_v36 }
  0x56   : > { %762 = vmatpush1.bf16.msra.mxu0 %v1212_v37  ;;  %720 = vmatprep.subr.bf16.mxu1 %v1213_v38 }
  0x57   : > { %763 = vmatprep.subr.bf16.mxu0 %v1215_v39 }
  0x59   : > { %721 = vmatpush1.bf16.msra.mxu1 %v1217_v40 }
  0x5a   : > { %764 = vmatpush1.bf16.msra.mxu0 %v1218_v41  ;;  %722 = vmatprep.subr.bf16.mxu1 %v1219_v42 }
  0x5b   : > { %765 = vmatprep.subr.bf16.mxu0 %v1221_v43 }
  0x5d   : > { %723 = vmatpush1.bf16.msra.mxu1 %v1223_v44 }
  0x5e   : > { %766 = vmatpush1.bf16.msra.mxu0 %v1224_v45  ;;  %724 = vmatprep.subr.bf16.mxu1 %v1225_v46 }
  0x5f   : > { %767 = vmatprep.subr.bf16.mxu0 %v1227_v47 }
  0x61   : > { %725 = vmatpush1.bf16.msra.mxu1 %v1229_v48 }
  0x62   : > { %768 = vmatpush1.bf16.msra.mxu0 %v1230_v49  ;;  %726 = vmatprep.subr.bf16.mxu1 %v1231_v50 }
  0x63   : > { %769 = vmatprep.subr.bf16.mxu0 %v1233_v51 }
  0x65   : > { %727 = vmatpush1.bf16.msra.mxu1 %v1235_v52 }
  0x66   : > { %770 = vmatpush1.bf16.msra.mxu0 %v1236_v54  ;;  %728 = vmatprep.subr.bf16.mxu1 %v1237_v55  ;;  %v1325_v54 = vmov (!%p1095_p0), 1983009808  }
  0x67   : > { %771 = vmatprep.subr.bf16.mxu0 %v1239_v56  ;;  %v850_v55 = vunpack.c.l.s4 (!%p1095_p0), %v1325_v54  ;;  %v852_v56 = vlaneseq (!%p1095_p0) }
  0x69   : > { %729 = vmatpush1.bf16.msra.mxu1 %v1241_v58 }
  0x6a   : > { %772 = vmatpush1.bf16.msra.mxu0 %v1242_v59  ;;  %730 = vmatprep.subr.bf16.mxu1 %v1243_v60 }
  0x6b   : > { %773 = vmatprep.subr.bf16.mxu0 %v1245_v61 }
  0x6d   : > { %731 = vmatpush1.bf16.msra.mxu1 %v1247_v62 }
  0x6e   : > { %774 = vmatpush1.bf16.msra.mxu0 %v1248_v63  ;;  %732 = vmatprep.subr.bf16.mxu1 %v1249_v0 }
  0x6f   : > { %775 = vmatprep.subr.bf16.mxu0 %v1251_v1  ;;  %v851_v1 = vunpack.c.0.s8 (!%p1095_p0), %v850_v55 }
  0x71   : > { %733 = vmatpush1.bf16.msra.mxu1 %v1253_v2  ;;  %v853_v2 = vshrl.u32 (!%p1095_p0), %v852_v56, 7 }
  0x72   : > { %776 = vmatpush1.bf16.msra.mxu0 %v1254_v3  ;;  %734 = vmatprep.subr.bf16.mxu1 %v1255_v4 }
  0x73   : > { %777 = vmatprep.subr.bf16.mxu0 %v1257_v5 }
  0x75   : > { %735 = vmatpush1.bf16.msra.mxu1 %v1259_v6 }
  0x76   : > { %778 = vmatpush1.bf16.msra.mxu0 %v1260_v7 }
  0x78   : > { %737 = vmatmul.mubr.bf16.vlgmr.msra.gmra.mrb[0].mxu1 %v1261_v8  ;;  %v854_v8 = vsub.s32 (!%p1095_p0), %v851_v1, %v853_v2 }
  0x79   : > { %780 = vmatmul.mubr.bf16.vlgmr.msra.gmra.mrb[0].mxu0 %v1264_v9 }
 0x14b   : > { %v738_v10 = vpop.f32.mrb[0].mxu1 }
 0x14c   : > { %v781_v12 = vpop.f32.mrb[0].mxu0  ;;  %v740_v14 = vpop.f32.mrb[1].mxu1 }
 0x14d   : > { %v782_v13 = vadd.f32 %v781_v12, %v738_v10  ;;  %v783_v16 = vpop.f32.mrb[1].mxu0  ;;  %v742_v18 = vpop.f32.mrb[2].mxu1 }
 0x14e   : > { %v784_v17 = vadd.f32 %v783_v16, %v740_v14  ;;  %v785_v20 = vpop.f32.mrb[2].mxu0  ;;  %v744_v23 = vpop.f32.mrb[3].mxu1  ;;  %801 = sbr.rel (%p1095_p0) target bundleno = 372 (0x174), region = 63 }
 0x14f   : > { %v790_v21 = vadd.f32 %v782_v13, %v292_v11  ;;  %v786_v22 = vadd.f32 %v785_v20, %v742_v18  ;;  %v787_v25 = vpop.f32.mrb[3].mxu0  ;;  %v842_v11 = vld [vmem:[%s1426_s5] sm:$0xf] (!%p1095_p0) }
 0x150   : > { %v791_v26 = vadd.f32 %v784_v17, %v293_v15  ;;  %v788_v27 = vadd.f32 %v787_v25, %v744_v23 }
 0x151   : > { %794 = vst [vmem:[#allocation2] sm:$0xff] %v790_v21  ;;  %v792_v28 = vadd.f32 %v786_v22, %v294_v19 }
 0x152   : > { %795 = vst [vmem:[#allocation2 + $0x8] sm:$0xff] %v791_v26  ;;  %v793_v29 = vadd.f32 %v788_v27, %v295_v24 }
 0x153   : > { %796 = vst [vmem:[#allocation2 + $0x10] sm:$0xff] %v792_v28 }
 0x154   : > { %797 = vst [vmem:[#allocation2 + $0x18] sm:$0xff] %v793_v29 }
 0x158   : > { %v802_v30 = vld [vmem:[#allocation2] sm:$0xff] }
 0x159   : > { %v803_v31 = vld [vmem:[#allocation2 + $0x8] sm:$0xff]  ;;  %806 = vst [vmem:[%s1421_s29] sm:$0xff] %v802_v30  ;;  %v824_v33 = vmul.f32 %v802_v30, %v802_v30 }
 0x15a   : > { %v804_v32 = vld [vmem:[#allocation2 + $0x10] sm:$0xff]  ;;  %807 = vst [vmem:[%s1421_s29 + $0x8] sm:$0xff] %v803_v31  ;;  %v825_v34 = vmul.f32 %v803_v31, %v803_v31 }
 0x15b   : > { %808 = vst [vmem:[%s1421_s29 + $0x10] sm:$0xff] %v804_v32  ;;  %v810_v35 = vadd.f32 %v804_v32, %v802_v30  ;;  %v826_v36 = vmul.f32 %v804_v32, %v804_v32  ;;  %v805_v37 = vld [vmem:[#allocation2 + $0x18] sm:$0xff] }
 0x15c   : > { %809 = vst [vmem:[%s1421_s29 + $0x18] sm:$0xff] %v805_v37  ;;  %v817_v38 = vadd.f32 %v805_v37, %v803_v31  ;;  %v827_v39 = vmul.f32 %v805_v37, %v805_v37 }
 0x15d   : > { %v811_v40 = vrot.slane %v810_v35, 4  ;;  %v828_v41 = vadd.f32 %v826_v36, %v824_v33 }
 0x15e   : > { %v818_v42 = vrot.slane %v817_v38, 4  ;;  %v835_v43 = vadd.f32 %v827_v39, %v825_v34 }
 0x15f   : > { %v812_v44 = vadd.f32 %v811_v40, %v810_v35  ;;  %v829_v45 = vrot.slane %v828_v41, 4 }
 0x160   : > { %v819_v46 = vadd.f32 %v818_v42, %v817_v38  ;;  %v836_v47 = vrot.slane %v835_v43, 4 }
 0x161   : > { %v813_v48 = vrot.slane %v812_v44, 2  ;;  %v830_v49 = vadd.f32 %v829_v45, %v828_v41 }
 0x162   : > { %v820_v50 = vrot.slane %v819_v46, 2  ;;  %v837_v51 = vadd.f32 %v836_v47, %v835_v43 }
 0x163   : > { %v814_v52 = vadd.f32 %v813_v48, %v812_v44  ;;  %v831_v53 = vrot.slane %v830_v49, 2 }
 0x164   : > { %v821_v57 = vadd.f32 %v820_v50, %v819_v46  ;;  %v838_v58 = vrot.slane %v837_v51, 2 }
 0x165   : > { %v815_v59 = vrot.slane %v814_v52, 1  ;;  %v832_v60 = vadd.f32 %v831_v53, %v830_v49 }
 0x166   : > { %v822_v61 = vrot.slane %v821_v57, 1  ;;  %v839_v62 = vadd.f32 %v838_v58, %v837_v51 }
 0x167   : > { %v816_v63 = vadd.f32 %v815_v59, %v814_v52  ;;  %v833_v0 = vrot.slane %v832_v60, 1 }
 0x168   : > { %v823_v3 = vadd.f32 %v822_v61, %v821_v57  ;;  %v840_v4 = vrot.slane %v839_v62, 1 }
 0x169   : > { %v834_v5 = vadd.f32 %v833_v0, %v832_v60 }
 0x16a   : > { %v841_v6 = vadd.f32 %v840_v4, %v839_v62 }
 0x16b   : > { %v844_v7 = vsel %vm843_vm0, %v816_v63, %v834_v5 }
 0x16c   : > { %v845_v9 = vsel %vm843_vm0, %v823_v3, %v841_v6 }
 0x16d   : > { %v848_v10 = vcombine.low %v844_v7, %v845_v9 }
 0x16f   : > { %v855_v12 = vrot.slane %v848_v10, %v854_v8 }
 0x171   : > { %v857_v13 = vadd.f32 %v855_v12, %v842_v11 }
 0x173   : > { %858 = vst [vmem:[%s1426_s5] sm:$0xf] %v857_v13 }
 0x174 PF: > { %s14_s18 = sadd.s32 1, %s1321_s18   ;;  %s1534_s12 = smov %s1301_s13 }
 0x175   : > { %p11_p1 = scmp.ge.s32.totalorder %s14_s18, 10   ;;  %s1535_s13 = smov %s1397_s25 }
 0x176   : > { %s1536_s14 = smov %s1313_s16  ;;  %s1537_s15 = smov %s1317_s17 }
 0x177   : > { %s1538_s16 = smov %s1541_s19  ;;  %s1539_s17 = smov %s1545_s20 }
 0x178   :  { %13 = sbr.rel (!%p11_p1) target bundleno = 4 (0x4), region = 113 }

// kernel: discriminator_forward.13
= control target key start
LH: loop header
LB: loop body
LE: loop exit
PB: predicated region body
PF: predicated region fallthrough
CT: control target
= control target key end

     0   :  { %s2057_s12 = smov 0   ;;  %s2059_s13 = smov 0   ;;  %s2321_s0 = inlined_call_operand.vmem [shape: bf16[2,9,4096], index: 0, kind: input, shape index: {}]   ;;  %s2322_s1 = inlined_call_operand.vmem [shape: bf16[4096,512], index: 1, kind: input, shape index: {}]   ;;  %s2323_s2 = inlined_call_operand.vmem [shape: f32[2,9,512], index: 2, kind: output, shape index: {0}]   ;;  %s2324_s3 = inlined_call_operand.vmem [shape: f32[2,2,512], index: 3, kind: output, shape index: {1}]  }
   0x1   :  { %s2061_s14 = smov 0   ;;  %s2063_s15 = smov 0  }
   0x2   :  { %s2065_s16 = smov 0   ;;  %s2067_s17 = smov 0  }
   0x3   :  { %s2069_s18 = smov 0  }
   0x4 LB: > { %s26_s19 = sadd.s32 1, %s2024_s16  ;;  %s33_s20 = sadd.s32 1, %s2028_s17  ;;  %s2032_s18 = sphi %s2069_s18, %s14_s18   ;;  %s2028_s17 = sphi %s2067_s17, %s2330_s17   ;;  %s2024_s16 = sphi %s2065_s16, %s2329_s16   ;;  %s2020_s15 = sphi %s2063_s15, %s2328_s15   ;;  %s2016_s14 = sphi %s2061_s14, %s2327_s14   ;;  %s2012_s13 = sphi %s2059_s13, %s2326_s13   ;;  %s2008_s12 = sphi %s2057_s12, %s2325_s12  }
   0x5   : > { %p27_p0 = scmp.ge.s32.totalorder %s26_s19, 8  ;;  %p51_p1 = scmp.ne.s32.totalorder %s2012_s13, %s2008_s12 }
   0x6   : > { %p52_p2 = scmp.eq.s32.totalorder %s2032_s18, 0  ;;  %s44_s24 = sadd.s32 1, %s2012_s13 }
   0x7   : > { %s2332_s19 = smov (%p27_p0, %s26_s19), 0  ;;  %s2334_s20 = smov (!%p27_p0, %s33_s20), %s2028_s17 }
   0x8   : > { %p53_p3 = por %p52_p2, %p51_p1  ;;  %p35_p4 = scmp.ge.s32.totalorder %s2334_s20, 2 }
   0x9   : > { %s40_s21 = ssub.s32 %s2024_s16, %s2332_s19  ;;  %p1558_p6 = scmp.ge.s32.totalorder %s2032_s18, 16 }
   0xa   : > { %s2336_s20 = smov (%p35_p4, %s2334_s20), 0 }
   0xb   : > { %s37_s22 = ssub.s32 %s2028_s17, %s2336_s20  ;;  %157 = sbr.rel (%p1558_p6) target bundleno = 27 (0x1b), region = 16 }
   0xc   : > { %s41_s23 = sor.u32 %s40_s21, %s37_s22 }
   0xd   : > { %p42_p5 = scmp.eq.s32.totalorder %s41_s23, 0 }
   0xf   : > { %s2108_s25 = scalar_select %p42_p5, %s2012_s13, %s44_s24  }
  0x12   : > { %160 = sbr.rel (!%p53_p3) target bundleno = 27 (0x1b), region = 20  ;;  %s162_s26 = sand.u32 (%p53_p3), 1, %s2012_s13  }
  0x13   : > { %s1560_s27 = sshll.u32 (%p53_p3), %s2024_s16, 2  ;;  %s1559_s28 = sshll.u32 (%p53_p3), %s162_s26, 5 }
  0x14   : > { %s1561_s29 = sshll.u32 (%p53_p3), %s2028_s17, 6  ;;  %s164_s8 = scalar_lea.vmem (%p53_p3), [#allocation3], %s1559_s28 }
  0x15   : > { %s170_s30 = sadd.s32 (%p53_p3), %s1561_s29, %s1560_s27 }
  0x16   : > { %s1562_s4 = sshll.u32 (%p53_p3), %s170_s30, 2 }
  0x17   : > { %s172_s7 = scalar_lea.vmem (%p53_p3), %s2321_s0, %s1562_s4 }
  0x18   : > { %v185_v0 = vld [vmem:[%s172_s7] sm:$0xff] (%p53_p3)  ;;  %v187_v1 = vld [vmem:[%s172_s7 + $0x8] sm:$0xff] (%p53_p3) }
  0x19   : > { %v189_v2 = vld [vmem:[%s172_s7 + $0x80] sm:$0xff]  ;;  %186 = vst [vmem:[%s164_s8] sm:$0xff] %v185_v0  ;;  %188 = vst [vmem:[%s164_s8 + $0x8] sm:$0xff] %v187_v1  ;;  %v191_v3 = vld [vmem:[%s172_s7 + $0x88] sm:$0xff] }
  0x1a   : > { %190 = vst [vmem:[%s164_s8 + $0x10] sm:$0xff] %v189_v2  ;;  %192 = vst [vmem:[%s164_s8 + $0x18] sm:$0xff] %v191_v3 }
  0x1b PF: > { %p1563_p7 = scmp.ge.s32.totalorder %s2032_s18, 1  ;;  %p207_p8 = scmp.lt.s32.totalorder %s2032_s18, 17 }
  0x1d   : > { %p208_p9 = pnand %p1563_p7, %p207_p8 }
  0x1e   : > { %s214_s9 = sand.u32 (!%p208_p9), 1, %s2008_s12   ;;  %s1565_s10 = sshll.u32 (!%p208_p9), %s2016_s14, 6 }
  0x1f   : > { %211 = sbr.rel (%p208_p9) target bundleno = 442 (0x1ba), region = 47  ;;  %s1564_s11 = sshll.u32 (!%p208_p9), %s214_s9, 5 }
  0x20   : > { %p256_p10 = scmp.lt.s32.totalorder (!%p208_p9), %s1565_s10, 511  ;;  %p263_p11 = scmp.lt.s32.totalorder (!%p208_p9), %s2020_s15, 1 }
  0x21   : > { %p278_p12 = scmp.eq.s32.totalorder (!%p208_p9), %s2016_s14, 0  ;;  %s2139_s6 = scalar_lea.vmem (!%p208_p9), [#allocation3], %s1564_s11 }
  0x22   : > { %p1572_p13 = scmp.ne.s32.totalorder (!%p208_p9), %s2016_s14, 0 }
  0x26   : > { %s2338_s10 = smov (!%p256_p10, %s1565_s10), 511  ;;  %s2340_s15 = smov (!%p263_p11, %s2020_s15), 1 }
  0x27   : > { %s1709_s21 = sshll.u32 %s2338_s10, 4  ;;  %s1710_s26 = sshll.u32 %s2340_s15, 6  ;;  %v2034_v4 = vmov (!%p1572_p13), 0.0  }
  0x28   : > { %s2127_s24 = scalar_lea.vmem %s2322_s1, %s1709_s21  ;;  %s2132_s29 = scalar_lea.vmem %s2323_s2, %s1710_s26  ;;  %282 = vst [vmem:[#allocation2] sm:$0xff] (!%p1572_p13), %v2034_v4  ;;  %283 = vst [vmem:[#allocation2 + $0x8] sm:$0xff] (!%p1572_p13), %v2034_v4 }
  0x29   : > { %s1711_s12 = sshll.u32 %s2340_s15, 3  ;;  %281 = sbr.rel (%p1572_p13) target bundleno = 48 (0x30), region = 55  ;;  %284 = vst [vmem:[#allocation2 + $0x10] sm:$0xff] (!%p1572_p13), %v2034_v4  ;;  %285 = vst [vmem:[#allocation2 + $0x18] sm:$0xff] (!%p1572_p13), %v2034_v4 }
  0x2a   : > { %s2137_s5 = scalar_lea.vmem %s2324_s3, %s1711_s12  ;;  %286 = vst [vmem:[#allocation2 + $0x20] sm:$0x1] (!%p1572_p13), %v2034_v4  ;;  %287 = vst [vmem:[#allocation2 + $0x28] sm:$0x1] (!%p1572_p13), %v2034_v4 }
  0x2b   : > { %288 = vst [vmem:[#allocation2 + $0x30] sm:$0x1] (!%p1572_p13), %v2034_v4  ;;  %289 = vst [vmem:[#allocation2 + $0x38] sm:$0x1] (!%p1572_p13), %v2034_v4 }
  0x30 PF: > { %294 = sbr.rel (!%p278_p12) target bundleno = 55 (0x37), region = 59  ;;  %v2035_v5 = vmov (%p278_p12), 0.0  }
  0x31   : > { %295 = vst [vmem:[%s2137_s5] sm:$0xff] (%p278_p12), %v2035_v5 }
  0x37 PF: > { %v1780_v6 = vld [vmem:[%s2127_s24 + $0x4] ss:$16 sps:$4 sm:$0xff]   ;;  %v1782_v7 = vld [vmem:[%s2127_s24 + $0xc] ss:$16 sps:$4 sm:$0xff]   ;;  %v1784_v8 = vld [vmem:[%s2127_s24] ss:$16 sps:$4 sm:$0xff]  }
  0x38   : > { %1096 = vmatprep.subr.bf16.mxu0 %v1780_v6  ;;  %v1785_v9 = vld [vmem:[%s2127_s24 + $0x8] ss:$16 sps:$4 sm:$0xff]   ;;  %1182 = vmatprep.subr.bf16.mxu1 %v1782_v7  ;;  %v1786_v10 = vld [vmem:[%s2127_s24 + $0x24] ss:$16 sps:$4 sm:$0xff]   ;;  %v1788_v11 = vld [vmem:[%s2127_s24 + $0x2c] ss:$16 sps:$4 sm:$0xff]  }
  0x39   : > { %1097 = vmatpush1.bf16.msra.mxu0 %v1784_v8  ;;  %1183 = vmatpush1.bf16.msra.mxu1 %v1785_v9  ;;  %v1790_v12 = vld [vmem:[%s2127_s24 + $0x20] ss:$16 sps:$4 sm:$0xff]   ;;  %v1791_v13 = vld [vmem:[%s2127_s24 + $0x28] ss:$16 sps:$4 sm:$0xff]   ;;  %v1792_v14 = vld [vmem:[%s2127_s24 + $0x44] ss:$16 sps:$4 sm:$0xff]  }
  0x3a   : > { %1098 = vmatprep.subr.bf16.mxu0 %v1786_v10  ;;  %1184 = vmatprep.subr.bf16.mxu1 %v1788_v11  ;;  %v1794_v15 = vld [vmem:[%s2127_s24 + $0x4c] ss:$16 sps:$4 sm:$0xff]   ;;  %v1796_v16 = vld [vmem:[%s2127_s24 + $0x40] ss:$16 sps:$4 sm:$0xff]   ;;  %v1797_v17 = vld [vmem:[%s2127_s24 + $0x48] ss:$16 sps:$4 sm:$0xff]  }
  0x3b   : > { %v1798_v18 = vld [vmem:[%s2127_s24 + $0x64] ss:$16 sps:$4 sm:$0xff]   ;;  %v1800_v19 = vld [vmem:[%s2127_s24 + $0x6c] ss:$16 sps:$4 sm:$0xff]   ;;  %v1802_v20 = vld [vmem:[%s2127_s24 + $0x60] ss:$16 sps:$4 sm:$0xff]  }
  0x3c   : > { %v1803_v21 = vld [vmem:[%s2127_s24 + $0x68] ss:$16 sps:$4 sm:$0xff]   ;;  %v1804_v22 = vld [vmem:[%s2127_s24 + $0x84] ss:$16 sps:$4 sm:$0xff]   ;;  %v1806_v23 = vld [vmem:[%s2127_s24 + $0x8c] ss:$16 sps:$4 sm:$0xff]  }
  0x3d   : > { %1099 = vmatpush1.bf16.msra.mxu0 %v1790_v12  ;;  %1185 = vmatpush1.bf16.msra.mxu1 %v1791_v13  ;;  %v1808_v24 = vld [vmem:[%s2127_s24 + $0x80] ss:$16 sps:$4 sm:$0xff]   ;;  %v1809_v25 = vld [vmem:[%s2127_s24 + $0x88] ss:$16 sps:$4 sm:$0xff]   ;;  %v1810_v26 = vld [vmem:[%s2127_s24 + $0xa4] ss:$16 sps:$4 sm:$0xff]  }
  0x3e   : > { %1100 = vmatprep.subr.bf16.mxu0 %v1792_v14  ;;  %1186 = vmatprep.subr.bf16.mxu1 %v1794_v15  ;;  %v1812_v27 = vld [vmem:[%s2127_s24 + $0xac] ss:$16 sps:$4 sm:$0xff]   ;;  %v1814_v28 = vld [vmem:[%s2127_s24 + $0xa0] ss:$16 sps:$4 sm:$0xff]   ;;  %v1815_v29 = vld [vmem:[%s2127_s24 + $0xa8] ss:$16 sps:$4 sm:$0xff]  }
  0x3f   : > { %v1816_v30 = vld [vmem:[%s2127_s24 + $0xc4] ss:$16 sps:$4 sm:$0xff]   ;;  %v1818_v31 = vld [vmem:[%s2127_s24 + $0xcc] ss:$16 sps:$4 sm:$0xff]   ;;  %v1820_v32 = vld [vmem:[%s2127_s24 + $0xc0] ss:$16 sps:$4 sm:$0xff]  }
  0x40   : > { %v1821_v33 = vld [vmem:[%s2127_s24 + $0xc8] ss:$16 sps:$4 sm:$0xff]   ;;  %v1822_v34 = vld [vmem:[%s2127_s24 + $0xe4] ss:$16 sps:$4 sm:$0xff]   ;;  %v1824_v35 = vld [vmem:[%s2127_s24 + $0xec] ss:$16 sps:$4 sm:$0xff]  }
  0x41   : > { %1101 = vmatpush1.bf16.msra.mxu0 %v1796_v16  ;;  %1187 = vmatpush1.bf16.msra.mxu1 %v1797_v17  ;;  %v1826_v36 = vld [vmem:[%s2127_s24 + $0xe0] ss:$16 sps:$4 sm:$0xff]   ;;  %v1827_v37 = vld [vmem:[%s2127_s24 + $0xe8] ss:$16 sps:$4 sm:$0xff]   ;;  %v1828_v38 = vld [vmem:[%s2127_s24 + $0x104] ss:$16 sps:$4 sm:$0xff]  }
  0x42   : > { %1102 = vmatprep.subr.bf16.mxu0 %v1798_v18  ;;  %1188 = vmatprep.subr.bf16.mxu1 %v1800_v19  ;;  %v1830_v39 = vld [vmem:[%s2127_s24 + $0x10c] ss:$16 sps:$4 sm:$0xff]   ;;  %v1832_v40 = vld [vmem:[%s2127_s24 + $0x100] ss:$16 sps:$4 sm:$0xff]   ;;  %v1833_v41 = vld [vmem:[%s2127_s24 + $0x108] ss:$16 sps:$4 sm:$0xff]  }
  0x43   : > { %v1834_v42 = vld [vmem:[%s2127_s24 + $0x124] ss:$16 sps:$4 sm:$0xff]   ;;  %v1836_v43 = vld [vmem:[%s2127_s24 + $0x12c] ss:$16 sps:$4 sm:$0xff]   ;;  %v1838_v44 = vld [vmem:[%s2127_s24 + $0x120] ss:$16 sps:$4 sm:$0xff]  }
  0x44   : > { %v1839_v45 = vld [vmem:[%s2127_s24 + $0x128] ss:$16 sps:$4 sm:$0xff]   ;;  %v1840_v46 = vld [vmem:[%s2127_s24 + $0x144] ss:$16 sps:$4 sm:$0xff]   ;;  %v1842_v47 = vld [vmem:[%s2127_s24 + $0x14c] ss:$16 sps:$4 sm:$0xff]  }
  0x45   : > { %1103 = vmatpush1.bf16.msra.mxu0 %v1802_v20  ;;  %1189 = vmatpush1.bf16.msra.mxu1 %v1803_v21  ;;  %v1844_v48 = vld [vmem:[%s2127_s24 + $0x140] ss:$16 sps:$4 sm:$0xff]   ;;  %v1845_v49 = vld [vmem:[%s2127_s24 + $0x148] ss:$16 sps:$4 sm:$0xff]   ;;  %v1846_v50 = vld [vmem:[%s2127_s24 + $0x164] ss:$16 sps:$4 sm:$0xff]  }
  0x46   : > { %1104 = vmatprep.subr.bf16.mxu0 %v1804_v22  ;;  %1190 = vmatprep.subr.bf16.mxu1 %v1806_v23  ;;  %v1848_v51 = vld [vmem:[%s2127_s24 + $0x16c] ss:$16 sps:$4 sm:$0xff]   ;;  %v1850_v52 = vld [vmem:[%s2127_s24 + $0x160] ss:$16 sps:$4 sm:$0xff]   ;;  %v1851_v53 = vld [vmem:[%s2127_s24 + $0x168] ss:$16 sps:$4 sm:$0xff]  }
  0x47   : > { %v1852_v54 = vld [vmem:[%s2127_s24 + $0x184] ss:$16 sps:$4 sm:$0xff]   ;;  %v1854_v56 = vld [vmem:[%s2127_s24 + $0x18c] ss:$16 sps:$4 sm:$0xff]   ;;  %v1856_v57 = vld [vmem:[%s2127_s24 + $0x180] ss:$16 sps:$4 sm:$0xff]  }
  0x48   : > { %v1878_v55 = vld [vmem:[%s2139_s6 + $0x4] ss:$16 sps:$4 sm:$0x1f]   ;;  %v1857_v58 = vld [vmem:[%s2127_s24 + $0x188] ss:$16 sps:$4 sm:$0xff]   ;;  %p1706_p0 = scmp.ne.s32.totalorder %s2016_s14, 7 }
  0x49   : > { %1105 = vmatpush1.bf16.msra.mxu0 %v1808_v24  ;;  %1191 = vmatpush1.bf16.msra.mxu1 %v1809_v25  ;;  %v1858_v59 = vld [vmem:[%s2127_s24 + $0x1a4] ss:$16 sps:$4 sm:$0xff]   ;;  %v1860_v60 = vld [vmem:[%s2127_s24 + $0x1ac] ss:$16 sps:$4 sm:$0xff]   ;;  %v1862_v61 = vld [vmem:[%s2127_s24 + $0x1a0] ss:$16 sps:$4 sm:$0xff]  }
  0x4a   : > { %1106 = vmatprep.subr.bf16.mxu0 %v1810_v26  ;;  %1192 = vmatprep.subr.bf16.mxu1 %v1812_v27  ;;  %v1863_v62 = vld [vmem:[%s2127_s24 + $0x1a8] ss:$16 sps:$4 sm:$0xff]   ;;  %v1864_v63 = vld [vmem:[%s2127_s24 + $0x1c4] ss:$16 sps:$4 sm:$0xff]   ;;  %v1866_v0 = vld [vmem:[%s2127_s24 + $0x1cc] ss:$16 sps:$4 sm:$0xff]  }
  0x4b   : > { %1128 = vmatprep.mubr.bf16.mxu0 %v1878_v55  ;;  %1214 = vmatprep.mubr.bf16.mxu1 %v1878_v55  ;;  %v1868_v1 = vld [vmem:[%s2127_s24 + $0x1c0] ss:$16 sps:$4 sm:$0xff]   ;;  %v1869_v2 = vld [vmem:[%s2127_s24 + $0x1c8] ss:$16 sps:$4 sm:$0xff]   ;;  %v1870_v3 = vld [vmem:[%s2127_s24 + $0x1e4] ss:$16 sps:$4 sm:$0xff]  }
  0x4c   : > { %v1872_v4 = vld [vmem:[%s2127_s24 + $0x1ec] ss:$16 sps:$4 sm:$0xff]   ;;  %v1874_v5 = vld [vmem:[%s2127_s24 + $0x1e0] ss:$16 sps:$4 sm:$0xff]   ;;  %v1875_v6 = vld [vmem:[%s2127_s24 + $0x1e8] ss:$16 sps:$4 sm:$0xff]  }
  0x4d   : > { %1107 = vmatpush1.bf16.msra.mxu0 %v1814_v28  ;;  %1193 = vmatpush1.bf16.msra.mxu1 %v1815_v29  ;;  %v1881_v7 = vld [vmem:[%s2127_s24 + $0x204] ss:$16 sps:$4 sm:$0xff]   ;;  %v1884_v8 = vld [vmem:[%s2127_s24 + $0x20c] ss:$16 sps:$4 sm:$0xff]   ;;  %v1879_v10 = vld [vmem:[%s2127_s24 + $0x200] ss:$16 sps:$4 sm:$0xff]  }
  0x4e   : > { %1108 = vmatprep.subr.bf16.mxu0 %v1816_v30  ;;  %1194 = vmatprep.subr.bf16.mxu1 %v1818_v31  ;;  %v1876_v9 = vld [vmem:[%s2139_s6] ss:$16 sps:$4 sm:$0x1f]   ;;  %v1882_v11 = vld [vmem:[%s2127_s24 + $0x208] ss:$16 sps:$4 sm:$0xff]   ;;  %vm1304_vm0 = vcmask (!%p1706_p0), 1040384  }
  0x4f   : > { %v1887_v12 = vld [vmem:[%s2127_s24 + $0x224] ss:$16 sps:$4 sm:$0xff]   ;;  %v1890_v13 = vld [vmem:[%s2127_s24 + $0x22c] ss:$16 sps:$4 sm:$0xff]   ;;  %v1885_v14 = vld [vmem:[%s2127_s24 + $0x220] ss:$16 sps:$4 sm:$0xff]  }
  0x50   : > { %v1888_v15 = vld [vmem:[%s2127_s24 + $0x228] ss:$16 sps:$4 sm:$0xff]   ;;  %v1893_v16 = vld [vmem:[%s2127_s24 + $0x244] ss:$16 sps:$4 sm:$0xff]   ;;  %v1896_v17 = vld [vmem:[%s2127_s24 + $0x24c] ss:$16 sps:$4 sm:$0xff]  }
  0x51   : > { %1109 = vmatpush1.bf16.msra.mxu0 %v1820_v32  ;;  %1195 = vmatpush1.bf16.msra.mxu1 %v1821_v33  ;;  %v1891_v18 = vld [vmem:[%s2127_s24 + $0x240] ss:$16 sps:$4 sm:$0xff]   ;;  %v1894_v19 = vld [vmem:[%s2127_s24 + $0x248] ss:$16 sps:$4 sm:$0xff]   ;;  %v1899_v20 = vld [vmem:[%s2127_s24 + $0x264] ss:$16 sps:$4 sm:$0xff]  }
  0x52   : > { %1110 = vmatprep.subr.bf16.mxu0 %v1822_v34  ;;  %1196 = vmatprep.subr.bf16.mxu1 %v1824_v35  ;;  %v1902_v21 = vld [vmem:[%s2127_s24 + $0x26c] ss:$16 sps:$4 sm:$0xff]   ;;  %v1897_v22 = vld [vmem:[%s2127_s24 + $0x260] ss:$16 sps:$4 sm:$0xff]   ;;  %v1900_v23 = vld [vmem:[%s2127_s24 + $0x268] ss:$16 sps:$4 sm:$0xff]  }
  0x53   : > { %v1905_v24 = vld [vmem:[%s2127_s24 + $0x284] ss:$16 sps:$4 sm:$0xff]   ;;  %v1908_v25 = vld [vmem:[%s2127_s24 + $0x28c] ss:$16 sps:$4 sm:$0xff]   ;;  %v1903_v26 = vld [vmem:[%s2127_s24 + $0x280] ss:$16 sps:$4 sm:$0xff]  }
  0x54   : > { %v1906_v27 = vld [vmem:[%s2127_s24 + $0x288] ss:$16 sps:$4 sm:$0xff]   ;;  %v1911_v28 = vld [vmem:[%s2127_s24 + $0x2a4] ss:$16 sps:$4 sm:$0xff]   ;;  %v1914_v29 = vld [vmem:[%s2127_s24 + $0x2ac] ss:$16 sps:$4 sm:$0xff]  }
  0x55   : > { %1111 = vmatpush1.bf16.msra.mxu0 %v1826_v36  ;;  %1197 = vmatpush1.bf16.msra.mxu1 %v1827_v37  ;;  %v1909_v30 = vld [vmem:[%s2127_s24 + $0x2a0] ss:$16 sps:$4 sm:$0xff]   ;;  %v1912_v31 = vld [vmem:[%s2127_s24 + $0x2a8] ss:$16 sps:$4 sm:$0xff]   ;;  %v1917_v32 = vld [vmem:[%s2127_s24 + $0x2c4] ss:$16 sps:$4 sm:$0xff]  }
  0x56   : > { %1112 = vmatprep.subr.bf16.mxu0 %v1828_v38  ;;  %1198 = vmatprep.subr.bf16.mxu1 %v1830_v39  ;;  %v1920_v33 = vld [vmem:[%s2127_s24 + $0x2cc] ss:$16 sps:$4 sm:$0xff]   ;;  %v1915_v34 = vld [vmem:[%s2127_s24 + $0x2c0] ss:$16 sps:$4 sm:$0xff]   ;;  %v1918_v35 = vld [vmem:[%s2127_s24 + $0x2c8] ss:$16 sps:$4 sm:$0xff]  }
  0x57   : > { %v1977_v36 = vld [vmem:[%s2139_s6 + $0xc] ss:$16 sps:$4 sm:$0x1f]   ;;  %v1923_v37 = vld [vmem:[%s2127_s24 + $0x2e4] ss:$16 sps:$4 sm:$0xff]  }
  0x58   : > { %v1926_v38 = vld [vmem:[%s2127_s24 + $0x2ec] ss:$16 sps:$4 sm:$0xff]   ;;  %v1921_v39 = vld [vmem:[%s2127_s24 + $0x2e0] ss:$16 sps:$4 sm:$0xff]  }
  0x59   : > { %1113 = vmatpush1.bf16.msra.mxu0 %v1832_v40  ;;  %1199 = vmatpush1.bf16.msra.mxu1 %v1833_v41  ;;  %v1924_v40 = vld [vmem:[%s2127_s24 + $0x2e8] ss:$16 sps:$4 sm:$0xff]   ;;  %v1929_v41 = vld [vmem:[%s2127_s24 + $0x304] ss:$16 sps:$4 sm:$0xff]   ;;  %v1945_v55 = vld [vmem:[%s2127_s24 + $0x360] ss:$16 sps:$4 sm:$0xff]  }
  0x5a   : > { %1114 = vmatprep.subr.bf16.mxu0 %v1834_v42  ;;  %1200 = vmatprep.subr.bf16.mxu1 %v1836_v43  ;;  %v1932_v42 = vld [vmem:[%s2127_s24 + $0x30c] ss:$16 sps:$4 sm:$0xff]   ;;  %v1927_v43 = vld [vmem:[%s2127_s24 + $0x300] ss:$16 sps:$4 sm:$0xff]  }
  0x5d   : > { %1115 = vmatpush1.bf16.msra.mxu0 %v1838_v44  ;;  %1201 = vmatpush1.bf16.msra.mxu1 %v1839_v45  ;;  %v1930_v44 = vld [vmem:[%s2127_s24 + $0x308] ss:$16 sps:$4 sm:$0xff]   ;;  %v1935_v45 = vld [vmem:[%s2127_s24 + $0x324] ss:$16 sps:$4 sm:$0xff]  }
  0x5e   : > { %1116 = vmatprep.subr.bf16.mxu0 %v1840_v46  ;;  %1202 = vmatprep.subr.bf16.mxu1 %v1842_v47  ;;  %v1938_v46 = vld [vmem:[%s2127_s24 + $0x32c] ss:$16 sps:$4 sm:$0xff]   ;;  %v1933_v47 = vld [vmem:[%s2127_s24 + $0x320] ss:$16 sps:$4 sm:$0xff]  }
  0x61   : > { %1117 = vmatpush1.bf16.msra.mxu0 %v1844_v48  ;;  %1203 = vmatpush1.bf16.msra.mxu1 %v1845_v49  ;;  %v1936_v48 = vld [vmem:[%s2127_s24 + $0x328] ss:$16 sps:$4 sm:$0xff]   ;;  %v1941_v49 = vld [vmem:[%s2127_s24 + $0x344] ss:$16 sps:$4 sm:$0xff]  }
  0x62   : > { %1118 = vmatprep.subr.bf16.mxu0 %v1846_v50  ;;  %1204 = vmatprep.subr.bf16.mxu1 %v1848_v51  ;;  %v1944_v50 = vld [vmem:[%s2127_s24 + $0x34c] ss:$16 sps:$4 sm:$0xff]   ;;  %v1939_v51 = vld [vmem:[%s2127_s24 + $0x340] ss:$16 sps:$4 sm:$0xff]  }
  0x65   : > { %1119 = vmatpush1.bf16.msra.mxu0 %v1850_v52  ;;  %1205 = vmatpush1.bf16.msra.mxu1 %v1851_v53  ;;  %v1942_v52 = vld [vmem:[%s2127_s24 + $0x348] ss:$16 sps:$4 sm:$0xff]   ;;  %v1947_v53 = vld [vmem:[%s2127_s24 + $0x364] ss:$16 sps:$4 sm:$0xff]  }
  0x66   : > { %1120 = vmatprep.subr.bf16.mxu0 %v1852_v54  ;;  %1206 = vmatprep.subr.bf16.mxu1 %v1854_v56  ;;  %v1950_v54 = vld [vmem:[%s2127_s24 + $0x36c] ss:$16 sps:$4 sm:$0xff]   ;;  %v1948_v56 = vld [vmem:[%s2127_s24 + $0x368] ss:$16 sps:$4 sm:$0xff]  }
  0x69   : > { %1121 = vmatpush1.bf16.msra.mxu0 %v1856_v57  ;;  %1207 = vmatpush1.bf16.msra.mxu1 %v1857_v58  ;;  %v1953_v57 = vld [vmem:[%s2127_s24 + $0x384] ss:$16 sps:$4 sm:$0xff]   ;;  %v1956_v58 = vld [vmem:[%s2127_s24 + $0x38c] ss:$16 sps:$4 sm:$0xff]  }
  0x6a   : > { %1122 = vmatprep.subr.bf16.mxu0 %v1858_v59  ;;  %1208 = vmatprep.subr.bf16.mxu1 %v1860_v60  ;;  %v1951_v59 = vld [vmem:[%s2127_s24 + $0x380] ss:$16 sps:$4 sm:$0xff]   ;;  %v1954_v60 = vld [vmem:[%s2127_s24 + $0x388] ss:$16 sps:$4 sm:$0xff]  }
  0x6d   : > { %1123 = vmatpush1.bf16.msra.mxu0 %v1862_v61  ;;  %1209 = vmatpush1.bf16.msra.mxu1 %v1863_v62  ;;  %v1959_v61 = vld [vmem:[%s2127_s24 + $0x3a4] ss:$16 sps:$4 sm:$0xff]   ;;  %v1962_v62 = vld [vmem:[%s2127_s24 + $0x3ac] ss:$16 sps:$4 sm:$0xff]  }
  0x6e   : > { %1124 = vmatprep.subr.bf16.mxu0 %v1864_v63  ;;  %1210 = vmatprep.subr.bf16.mxu1 %v1866_v0  ;;  %v1957_v63 = vld [vmem:[%s2127_s24 + $0x3a0] ss:$16 sps:$4 sm:$0xff]   ;;  %v1960_v0 = vld [vmem:[%s2127_s24 + $0x3a8] ss:$16 sps:$4 sm:$0xff]  }
  0x71   : > { %1125 = vmatpush1.bf16.msra.mxu0 %v1868_v1  ;;  %1211 = vmatpush1.bf16.msra.mxu1 %v1869_v2  ;;  %v1965_v1 = vld [vmem:[%s2127_s24 + $0x3c4] ss:$16 sps:$4 sm:$0xff]   ;;  %v1968_v2 = vld [vmem:[%s2127_s24 + $0x3cc] ss:$16 sps:$4 sm:$0xff]  }
  0x72   : > { %1126 = vmatprep.subr.bf16.mxu0 %v1870_v3  ;;  %1212 = vmatprep.subr.bf16.mxu1 %v1872_v4  ;;  %v1963_v3 = vld [vmem:[%s2127_s24 + $0x3c0] ss:$16 sps:$4 sm:$0xff]   ;;  %v1966_v4 = vld [vmem:[%s2127_s24 + $0x3c8] ss:$16 sps:$4 sm:$0xff]  }
  0x75   : > { %1127 = vmatpush1.bf16.msra.mxu0 %v1874_v5  ;;  %1213 = vmatpush1.bf16.msra.mxu1 %v1875_v6  ;;  %v1971_v5 = vld [vmem:[%s2127_s24 + $0x3e4] ss:$16 sps:$4 sm:$0xff]   ;;  %v1974_v6 = vld [vmem:[%s2127_s24 + $0x3ec] ss:$16 sps:$4 sm:$0xff]  }
  0x76   : > { %1139 = vmatprep.subr.bf16.mxu0 %v1881_v7  ;;  %1225 = vmatprep.subr.bf16.mxu1 %v1884_v8  ;;  %v1969_v7 = vld [vmem:[%s2127_s24 + $0x3e0] ss:$16 sps:$4 sm:$0xff]   ;;  %v1972_v8 = vld [vmem:[%s2127_s24 + $0x3e8] ss:$16 sps:$4 sm:$0xff]  }
  0x78   : > { %1129 = vmatmul.mubr.bf16.vlgmr.msra.gmra.mrb[0].mxu0 %v1876_v9  ;;  %1215 = vmatmul.mubr.bf16.vlgmr.msra.gmra.mrb[0].mxu1 %v1876_v9  ;;  %v1975_v9 = vld [vmem:[%s2139_s6 + $0x8] ss:$16 sps:$4 sm:$0x1f]  }
  0x79   : > { %1140 = vmatpush1.bf16.msra.mxu0 %v1879_v10  ;;  %1226 = vmatpush1.bf16.msra.mxu1 %v1882_v11  ;;  %v296_v10 = vld [vmem:[#allocation2] sm:$0xff]  ;;  %v298_v11 = vld [vmem:[#allocation2 + $0x10] sm:$0xff] }
  0x7a   : > { %1141 = vmatprep.subr.bf16.mxu0 %v1887_v12  ;;  %1227 = vmatprep.subr.bf16.mxu1 %v1890_v13  ;;  %v297_v12 = vld [vmem:[#allocation2 + $0x8] sm:$0xff]  ;;  %v299_v13 = vld [vmem:[#allocation2 + $0x18] sm:$0xff] }
  0x7b   : > { %1171 = vmatprep.mubr.bf16.mxu0 %v1977_v36  ;;  %1257 = vmatprep.mubr.bf16.mxu1 %v1977_v36 }
  0x7d   : > { %1142 = vmatpush1.bf16.msra.mxu0 %v1885_v14  ;;  %1228 = vmatpush1.bf16.msra.mxu1 %v1888_v15 }
  0x7e   : > { %1143 = vmatprep.subr.bf16.mxu0 %v1893_v16  ;;  %1229 = vmatprep.subr.bf16.mxu1 %v1896_v17  ;;  %v300_v16 = vld [vmem:[#allocation2 + $0x20] sm:$0x1]  ;;  %v302_v17 = vld [vmem:[#allocation2 + $0x30] sm:$0x1] }
  0x81   : > { %1144 = vmatpush1.bf16.msra.mxu0 %v1891_v18  ;;  %1230 = vmatpush1.bf16.msra.mxu1 %v1894_v19 }
  0x82   : > { %1145 = vmatprep.subr.bf16.mxu0 %v1899_v20  ;;  %1231 = vmatprep.subr.bf16.mxu1 %v1902_v21 }
  0x85   : > { %1146 = vmatpush1.bf16.msra.mxu0 %v1897_v22  ;;  %1232 = vmatpush1.bf16.msra.mxu1 %v1900_v23  ;;  %v301_v22 = vld [vmem:[#allocation2 + $0x28] sm:$0x1]  ;;  %v303_v23 = vld [vmem:[#allocation2 + $0x38] sm:$0x1] }
  0x86   : > { %1147 = vmatprep.subr.bf16.mxu0 %v1905_v24  ;;  %1233 = vmatprep.subr.bf16.mxu1 %v1908_v25 }
  0x89   : > { %1148 = vmatpush1.bf16.msra.mxu0 %v1903_v26  ;;  %1234 = vmatpush1.bf16.msra.mxu1 %v1906_v27 }
  0x8a   : > { %1149 = vmatprep.subr.bf16.mxu0 %v1911_v28  ;;  %1235 = vmatprep.subr.bf16.mxu1 %v1914_v29 }
  0x8d   : > { %1150 = vmatpush1.bf16.msra.mxu0 %v1909_v30  ;;  %1236 = vmatpush1.bf16.msra.mxu1 %v1912_v31 }
  0x8e   : > { %1151 = vmatprep.subr.bf16.mxu0 %v1917_v32  ;;  %1237 = vmatprep.subr.bf16.mxu1 %v1920_v33 }
  0x91   : > { %1152 = vmatpush1.bf16.msra.mxu0 %v1915_v34  ;;  %1238 = vmatpush1.bf16.msra.mxu1 %v1918_v35 }
  0x92   : > { %1153 = vmatprep.subr.bf16.mxu0 %v1923_v37  ;;  %1239 = vmatprep.subr.bf16.mxu1 %v1926_v38 }
  0x95   : > { %1154 = vmatpush1.bf16.msra.mxu0 %v1921_v39  ;;  %1240 = vmatpush1.bf16.msra.mxu1 %v1924_v40 }
  0x96   : > { %1155 = vmatprep.subr.bf16.mxu0 %v1929_v41  ;;  %1241 = vmatprep.subr.bf16.mxu1 %v1932_v42 }
  0x99   : > { %1156 = vmatpush1.bf16.msra.mxu0 %v1927_v43  ;;  %1242 = vmatpush1.bf16.msra.mxu1 %v1930_v44 }
  0x9a   : > { %1157 = vmatprep.subr.bf16.mxu0 %v1935_v45  ;;  %1243 = vmatprep.subr.bf16.mxu1 %v1938_v46 }
  0x9d   : > { %1158 = vmatpush1.bf16.msra.mxu0 %v1933_v47  ;;  %1244 = vmatpush1.bf16.msra.mxu1 %v1936_v48 }
  0x9e   : > { %1159 = vmatprep.subr.bf16.mxu0 %v1941_v49  ;;  %1245 = vmatprep.subr.bf16.mxu1 %v1944_v50 }
  0xa1   : > { %1160 = vmatpush1.bf16.msra.mxu0 %v1939_v51  ;;  %1246 = vmatpush1.bf16.msra.mxu1 %v1942_v52 }
  0xa2   : > { %1161 = vmatprep.subr.bf16.mxu0 %v1947_v53  ;;  %1247 = vmatprep.subr.bf16.mxu1 %v1950_v54 }
  0xa5   : > { %1162 = vmatpush1.bf16.msra.mxu0 %v1945_v55  ;;  %1248 = vmatpush1.bf16.msra.mxu1 %v1948_v56 }
  0xa6   : > { %1163 = vmatprep.subr.bf16.mxu0 %v1953_v57  ;;  %1249 = vmatprep.subr.bf16.mxu1 %v1956_v58 }
  0xa9   : > { %1164 = vmatpush1.bf16.msra.mxu0 %v1951_v59  ;;  %1250 = vmatpush1.bf16.msra.mxu1 %v1954_v60 }
  0xaa   : > { %1165 = vmatprep.subr.bf16.mxu0 %v1959_v61  ;;  %1251 = vmatprep.subr.bf16.mxu1 %v1962_v62 }
  0xad   : > { %1166 = vmatpush1.bf16.msra.mxu0 %v1957_v63  ;;  %1252 = vmatpush1.bf16.msra.mxu1 %v1960_v0 }
  0xae   : > { %1167 = vmatprep.subr.bf16.mxu0 %v1965_v1  ;;  %1253 = vmatprep.subr.bf16.mxu1 %v1968_v2 }
  0xb1   : > { %1168 = vmatpush1.bf16.msra.mxu0 %v1963_v3  ;;  %1254 = vmatpush1.bf16.msra.mxu1 %v1966_v4 }
  0xb2   : > { %1169 = vmatprep.subr.bf16.mxu0 %v1971_v5  ;;  %1255 = vmatprep.subr.bf16.mxu1 %v1974_v6 }
  0xb5   : > { %1170 = vmatpush1.bf16.msra.mxu0 %v1969_v7  ;;  %1256 = vmatpush1.bf16.msra.mxu1 %v1972_v8 }
  0xb8   : > { %1172 = vmatmul.mubr.bf16.vlgmr.msra.gmra.mrb[0].mxu0 %v1975_v9  ;;  %1258 = vmatmul.mubr.bf16.vlgmr.msra.gmra.mrb[0].mxu1 %v1975_v9 }
 0x18b   : > { %v1173_v14 = vpop.f32.mrb[0].mxu0  ;;  %v1259_v15 = vpop.f32.mrb[0].mxu1  ;;  %1287 = sbr.rel (%p1706_p0) target bundleno = 442 (0x1ba), region = 63 }
 0x18c   : > { %v1268_v18 = vadd.f32 %v1173_v14, %v296_v10  ;;  %v1270_v19 = vadd.f32 %v1259_v15, %v298_v11  ;;  %v1175_v20 = vpop.f32.mrb[1].mxu0  ;;  %v1261_v21 = vpop.f32.mrb[1].mxu1 }
 0x18d   : > { %v1269_v24 = vadd.f32 %v1175_v20, %v297_v12  ;;  %v1271_v25 = vadd.f32 %v1261_v21, %v299_v13  ;;  %v1177_v26 = vpop.f32.mrb[2].mxu0  ;;  %v1263_v27 = vpop.f32.mrb[2].mxu1 }
 0x18e   : > { %1276 = vst [vmem:[#allocation2] sm:$0xff] %v1268_v18  ;;  %1278 = vst [vmem:[#allocation2 + $0x10] sm:$0xff] %v1270_v19  ;;  %v1272_v28 = vadd.f32 %v1177_v26, %v300_v16  ;;  %v1274_v29 = vadd.f32 %v1263_v27, %v302_v17  ;;  %v1179_v30 = vpop.f32.mrb[3].mxu0  ;;  %v1265_v31 = vpop.f32.mrb[3].mxu1 }
 0x18f   : > { %1277 = vst [vmem:[#allocation2 + $0x8] sm:$0xff] %v1269_v24  ;;  %1279 = vst [vmem:[#allocation2 + $0x18] sm:$0xff] %v1271_v25  ;;  %v1273_v32 = vadd.f32 %v1179_v30, %v301_v22  ;;  %v1275_v33 = vadd.f32 %v1265_v31, %v303_v23 }
 0x190   : > { %1280 = vst [vmem:[#allocation2 + $0x20] sm:$0x1] %v1272_v28  ;;  %1282 = vst [vmem:[#allocation2 + $0x30] sm:$0x1] %v1274_v29 }
 0x191   : > { %1281 = vst [vmem:[#allocation2 + $0x28] sm:$0x1] %v1273_v32  ;;  %1283 = vst [vmem:[#allocation2 + $0x38] sm:$0x1] %v1275_v33  ;;  %v1391_v32 = vlaneseq (!%p1706_p0) }
 0x195   : > { %v1288_v34 = vld [vmem:[#allocation2] sm:$0xff]  ;;  %v1290_v36 = vld [vmem:[#allocation2 + $0x10] sm:$0xff] }
 0x196   : > { %v1289_v35 = vld [vmem:[#allocation2 + $0x8] sm:$0xff]  ;;  %1296 = vst [vmem:[%s2132_s29] sm:$0xff] %v1288_v34  ;;  %v1337_v37 = vmul.f32 %v1288_v34, %v1288_v34  ;;  %1298 = vst [vmem:[%s2132_s29 + $0x10] sm:$0xff] %v1290_v36  ;;  %v1339_v39 = vmul.f32 %v1290_v36, %v1290_v36  ;;  %v1291_v40 = vld [vmem:[#allocation2 + $0x18] sm:$0xff] }
 0x197   : > { %1297 = vst [vmem:[%s2132_s29 + $0x8] sm:$0xff] %v1289_v35  ;;  %v1338_v38 = vmul.f32 %v1289_v35, %v1289_v35  ;;  %v1292_v41 = vld [vmem:[#allocation2 + $0x20] sm:$0x1]  ;;  %1299 = vst [vmem:[%s2132_s29 + $0x18] sm:$0xff] %v1291_v40  ;;  %v1340_v43 = vmul.f32 %v1291_v40, %v1291_v40  ;;  %v1294_v47 = vld [vmem:[#allocation2 + $0x30] sm:$0x1] }
 0x198   : > { %v1293_v42 = vld [vmem:[#allocation2 + $0x28] sm:$0x1]  ;;  %1300 = vst [vmem:[%s2132_s29 + $0x20] sm:$0x1] %v1292_v41  ;;  %v1305_v44 = vsel %vm1304_vm0, %v1292_v41, 0.0  ;;  %v1341_v45 = vmul.f32 %v1292_v41, %v1292_v41  ;;  %v1321_v52 = vsel %vm1304_vm0, %v1294_v47, 0.0  ;;  %v1343_v55 = vmul.f32 %v1294_v47, %v1294_v47 }
 0x199   : > { %1301 = vst [vmem:[%s2132_s29 + $0x28] sm:$0x1] %v1293_v42  ;;  %v1313_v46 = vsel %vm1304_vm0, %v1293_v42, 0.0  ;;  %v1295_v48 = vld [vmem:[#allocation2 + $0x38] sm:$0x1]  ;;  %v1306_v49 = vadd.f32 %v1305_v44, %v1288_v34  ;;  %v1342_v51 = vmul.f32 %v1293_v42, %v1293_v42  ;;  %v1322_v54 = vadd.f32 %v1321_v52, %v1290_v36 }
 0x19a   : > { %v1314_v50 = vadd.f32 %v1313_v46, %v1289_v35  ;;  %1302 = vst [vmem:[%s2132_s29 + $0x30] sm:$0x1] %v1294_v47  ;;  %1303 = vst [vmem:[%s2132_s29 + $0x38] sm:$0x1] %v1295_v48  ;;  %v1345_v53 = vsel %vm1304_vm0, %v1341_v45, 0.0  ;;  %v1329_v56 = vsel %vm1304_vm0, %v1295_v48, 0.0  ;;  %v1344_v8 = vmul.f32 %v1295_v48, %v1295_v48 }
 0x19b   : > { %v1307_v57 = vrot.slane %v1306_v49, 4  ;;  %v1346_v58 = vadd.f32 %v1345_v53, %v1337_v37  ;;  %v1353_v60 = vsel %vm1304_vm0, %v1342_v51, 0.0  ;;  %v1323_v62 = vrot.slane %v1322_v54, 4 }
 0x19c   : > { %v1315_v59 = vrot.slane %v1314_v50, 4  ;;  %v1354_v61 = vadd.f32 %v1353_v60, %v1338_v38  ;;  %v1361_v63 = vsel %vm1304_vm0, %v1343_v55, 0.0  ;;  %v1330_v0 = vadd.f32 %v1329_v56, %v1291_v40 }
 0x19d   : > { %v1308_v1 = vadd.f32 %v1307_v57, %v1306_v49  ;;  %v1347_v2 = vrot.slane %v1346_v58, 4  ;;  %v1362_v4 = vadd.f32 %v1361_v63, %v1339_v39  ;;  %v1324_v6 = vadd.f32 %v1323_v62, %v1322_v54 }
 0x19e   : > { %v1316_v3 = vadd.f32 %v1315_v59, %v1314_v50  ;;  %v1355_v5 = vrot.slane %v1354_v61, 4  ;;  %v1331_v7 = vrot.slane %v1330_v0, 4  ;;  %v1369_v16 = vsel %vm1304_vm0, %v1344_v8, 0.0 }
 0x19f   : > { %v1309_v9 = vrot.slane %v1308_v1, 2  ;;  %v1348_v10 = vadd.f32 %v1347_v2, %v1346_v58  ;;  %v1363_v12 = vrot.slane %v1362_v4, 4  ;;  %v1325_v14 = vrot.slane %v1324_v6, 2 }
 0x1a0   : > { %v1317_v11 = vrot.slane %v1316_v3, 2  ;;  %v1356_v13 = vadd.f32 %v1355_v5, %v1354_v61  ;;  %v1332_v15 = vadd.f32 %v1331_v7, %v1330_v0  ;;  %v1370_v24 = vadd.f32 %v1369_v16, %v1340_v43  ;;  %v1377_v0 = vld [vmem:[%s2137_s5] sm:$0xff] }
 0x1a1   : > { %v1310_v17 = vadd.f32 %v1309_v9, %v1308_v1  ;;  %v1349_v18 = vrot.slane %v1348_v10, 2  ;;  %v1364_v20 = vadd.f32 %v1363_v12, %v1362_v4  ;;  %v1326_v22 = vadd.f32 %v1325_v14, %v1324_v6 }
 0x1a2   : > { %v1318_v19 = vadd.f32 %v1317_v11, %v1316_v3  ;;  %v1357_v21 = vrot.slane %v1356_v13, 2  ;;  %v1333_v23 = vrot.slane %v1332_v15, 2  ;;  %v1371_v31 = vrot.slane %v1370_v24, 4 }
 0x1a3   : > { %v1311_v25 = vrot.slane %v1310_v17, 1  ;;  %v1350_v26 = vadd.f32 %v1349_v18, %v1348_v10  ;;  %v1365_v28 = vrot.slane %v1364_v20, 2  ;;  %v1327_v34 = vrot.slane %v1326_v22, 1 }
 0x1a4   : > { %v1319_v27 = vrot.slane %v1318_v19, 1  ;;  %v1358_v29 = vadd.f32 %v1357_v21, %v1356_v13  ;;  %v1334_v30 = vadd.f32 %v1333_v23, %v1332_v15  ;;  %v2036_v36 = vmov 1983009808  }
 0x1a5   : > { %v1351_v33 = vrot.slane %v1350_v26, 1  ;;  %v1366_v35 = vadd.f32 %v1365_v28, %v1364_v20  ;;  %v1389_v37 = vunpack.c.l.s4 %v2036_v36  ;;  %v1312_v38 = vadd.f32 %v1311_v25, %v1310_v17 }
 0x1a6   : > { %v1320_v39 = vadd.f32 %v1319_v27, %v1318_v19  ;;  %v1359_v40 = vrot.slane %v1358_v29, 1  ;;  %v1372_v41 = vadd.f32 %v1371_v31, %v1370_v24  ;;  %v1335_v43 = vrot.slane %v1334_v30, 1 }
 0x1a7   : > { %v1367_v42 = vrot.slane %v1366_v35, 1  ;;  %v1352_v44 = vadd.f32 %v1351_v33, %v1350_v26  ;;  %v1328_v47 = vadd.f32 %v1327_v34, %v1326_v22  ;;  %v1390_v48 = vunpack.c.0.s8 %v1389_v37 }
 0x1a8   : > { %v1373_v45 = vrot.slane %v1372_v41, 2  ;;  %v1360_v46 = vadd.f32 %v1359_v40, %v1358_v29  ;;  %v1392_v49 = vshrl.u32 %v1391_v32, 7  ;;  %v1336_v54 = vadd.f32 %v1335_v43, %v1334_v30 }
 0x1a9   : > { %v1368_v51 = vadd.f32 %v1367_v42, %v1366_v35  ;;  %v1378_v52 = vsel %vm1304_vm0, %v1312_v38, %v1352_v44 }
 0x1aa   : > { %v1374_v50 = vadd.f32 %v1373_v45, %v1372_v41  ;;  %v1379_v53 = vsel %vm1304_vm0, %v1320_v39, %v1360_v46  ;;  %v1393_v57 = vsub.s32 %v1390_v48, %v1392_v49 }
 0x1ab   : > { %v1386_v56 = vcombine.low %v1378_v52, %v1379_v53  ;;  %v1380_v59 = vsel %vm1304_vm0, %v1328_v47, %v1368_v51 }
 0x1ac   : > { %v1375_v55 = vrot.slane %v1374_v50, 1 }
 0x1ad   : > { %v1394_v62 = vrot.slane %v1386_v56, %v1393_v57 }
 0x1ae   : > { %v1376_v58 = vadd.f32 %v1375_v55, %v1374_v50 }
 0x1b0   : > { %v1381_v60 = vsel %vm1304_vm0, %v1336_v54, %v1376_v58 }
 0x1b1   : > { %v1387_v61 = vcombine.low %v1380_v59, %v1381_v60 }
 0x1b3   : > { %v1401_v63 = vrot.slane %v1387_v61, %v1393_v57 }
 0x1b5   : > { %v1402_v1 = vcombine.low %v1394_v62, %v1401_v63 }
 0x1b7   : > { %v1404_v2 = vadd.f32 %v1402_v1, %v1377_v0 }
 0x1b9   : > { %1405 = vst [vmem:[%s2137_s5] sm:$0xff] %v1404_v2 }
 0x1ba PF: > { %s14_s18 = sadd.s32 1, %s2032_s18   ;;  %s2325_s12 = smov %s2012_s13 }
 0x1bb   : > { %p11_p1 = scmp.ge.s32.totalorder %s14_s18, 18   ;;  %s2326_s13 = smov %s2108_s25 }
 0x1bc   : > { %s2327_s14 = smov %s2024_s16  ;;  %s2328_s15 = smov %s2028_s17 }
 0x1bd   : > { %s2329_s16 = smov %s2332_s19  ;;  %s2330_s17 = smov %s2336_s20 }
 0x1be   :  { %13 = sbr.rel (!%p11_p1) target bundleno = 4 (0x4), region = 113 }

// kernel: discriminator_forward.14
= control target key start
LH: loop header
LB: loop body
LE: loop exit
PB: predicated region body
PF: predicated region fallthrough
CT: control target
= control target key end

     0   :  { %s576_s9 = smov 0   ;;  %s578_s10 = smov 0   ;;  %s634_s0 = inlined_call_operand.vmem [shape: f32[2,9,512], index: 0, kind: input, shape index: {}]   ;;  %s635_s1 = inlined_call_operand.vmem [shape: f32[2,2,512], index: 1, kind: input, shape index: {}]   ;;  %s636_s2 = inlined_call_operand.vmem [shape: bf16[2,9,512], index: 2, kind: output, shape index: {}]  }
   0x1   :  { %s580_s11 = smov 0  }
   0x2 LB: > { %s24_s12 = sadd.s32 1, %s555_s10  ;;  %p491_p0 = scmp.ge.s32.totalorder %s559_s11, 1  ;;  %s559_s11 = sphi %s580_s11, %s12_s11   ;;  %s555_s10 = sphi %s578_s10, %s642_s10   ;;  %s551_s9 = sphi %s576_s9, %s641_s9  }
   0x3   : > { %p26_p1 = scmp.ge.s32.totalorder %s24_s12, 2  ;;  %p144_p2 = scmp.lt.s32.totalorder %s559_s11, 3 }
   0x5   : > { %s644_s12 = smov (%p26_p1, %s24_s12), 0  ;;  %p145_p3 = pnand %p491_p0, %p144_p2 }
   0x6   : > { %p182_p4 = scmp.lt.s32.totalorder (!%p145_p3), %s551_s9, 1  ;;  %v225_v3 = vlaneseq (!%p145_p3)  ;;  %vm366_vm0 = vcmask (!%p145_p3), 1040384   ;;  %vm367_vm1 = vsmask.f32 (!%p145_p3), 256  ;;  %vm369_vm2 = vcmask (!%p145_p3), 1044484  }
   0x7   : > { %148 = sbr.rel (%p145_p3) target bundleno = 59 (0x3b), region = 28  ;;  %vm370_vm3 = vsmask.f32 (!%p145_p3), 4352  ;;  %vm607_vm10 = vmand (!%p145_p3), %vm366_vm0, %vm367_vm1 }
   0x8   : > { %v226_v6 = vshrl.u32 (!%p145_p3), %v225_v3, 7  ;;  %vm616_vm11 = vmand (!%p145_p3), %vm369_vm2, %vm370_vm3 }
   0x9   : > { %vm372_vm14 = vmor (!%p145_p3), %vm616_vm11, %vm607_vm10 }
   0xa   : > { %v227_v8 = vsub.s32 (!%p145_p3), 0, %v226_v6  ;;  %v231_v9 = vsub.s32 (!%p145_p3), 2, %v226_v6  ;;  %v235_v11 = vsub.s32 (!%p145_p3), 4, %v226_v6  ;;  %v239_v12 = vsub.s32 (!%p145_p3), 6, %v226_v6 }
   0xb   : > { %v274_v17 = vsub.s32 (!%p145_p3), 1, %v226_v6  ;;  %v278_v21 = vsub.s32 (!%p145_p3), 3, %v226_v6  ;;  %v282_v22 = vsub.s32 (!%p145_p3), 5, %v226_v6  ;;  %v286_v26 = vsub.s32 (!%p145_p3), 7, %v226_v6 }
   0xe   : > { %s646_s9 = smov (!%p182_p4, %s551_s9), 1 }
   0xf   : > { %s505_s13 = sshll.u32 %s646_s9, 3  ;;  %s504_s17 = sshll.u32 %s646_s9, 6 }
  0x10   : > { %s196_s16 = scalar_lea.vmem %s635_s1, %s505_s13  ;;  %s190_s20 = scalar_lea.vmem %s634_s0, %s504_s17 }
  0x11   : > { %v216_v0 = vld [vmem:[%s196_s16] sm:$0xff]  ;;  %v209_v23 = vld [vmem:[%s190_s20 + $0x8] sm:$0xff]  ;;  %v210_v27 = vld [vmem:[%s190_s20 + $0x10] sm:$0xff]  ;;  %s506_s21 = sshll.u32 %s646_s9, 5 }
  0x12   : > { %v217_v1 = vmul.f32 0.11111111, %v216_v0  ;;  %v208_v18 = vld [vmem:[%s190_s20] sm:$0xff]  ;;  %v213_v25 = vld [vmem:[%s190_s20 + $0x28] sm:$0x1]  ;;  %v211_v30 = vld [vmem:[%s190_s20 + $0x18] sm:$0xff]  ;;  %s206_s24 = scalar_lea.vmem %s636_s2, %s506_s21 }
  0x13   : > { %v212_v24 = vld [vmem:[%s190_s20 + $0x20] sm:$0x1]  ;;  %v214_v31 = vld [vmem:[%s190_s20 + $0x30] sm:$0x1]  ;;  %v215_v32 = vld [vmem:[%s190_s20 + $0x38] sm:$0x1] }
  0x14   : > { %v218_v2 = vmul.f32 %v217_v1, %v217_v1  ;;  %v228_v13 = vrot.slane %v217_v1, %v227_v8  ;;  %v232_v14 = vrot.slane %v217_v1, %v231_v9  ;;  %v236_v15 = vrot.slane %v217_v1, %v235_v11 }
  0x15   : > { %v240_v16 = vrot.slane %v217_v1, %v239_v12  ;;  %v373_v12 = vld [vmem:[%s206_s24 + $0x10] sm:$0x11] }
  0x16   : > { %v220_v4 = vrot.slane %v218_v2, 7  ;;  %v248_v19 = vrot.slane %v228_v13, %v227_v8  ;;  %v252_v20 = vrot.slane %v232_v14, %v227_v8  ;;  %v256_v28 = vrot.slane %v236_v15, %v227_v8 }
  0x17   : > { %v260_v29 = vrot.slane %v240_v16, %v227_v8  ;;  %v376_v16 = vld [vmem:[%s206_s24 + $0x18] sm:$0x11] }
  0x18   : > { %v222_v5 = vsub.f32 %v217_v1, %v220_v4  ;;  %v261_v34 = vsub.f32 %v208_v18, %v248_v19  ;;  %v262_v35 = vsub.f32 %v209_v23, %v252_v20  ;;  %v265_v36 = vsub.f32 %v212_v24, %v248_v19 }
  0x19   : > { %v266_v37 = vsub.f32 %v213_v25, %v252_v20  ;;  %v263_v42 = vsub.f32 %v210_v27, %v256_v28  ;;  %v264_v43 = vsub.f32 %v211_v30, %v260_v29  ;;  %v267_v44 = vsub.f32 %v214_v31, %v256_v28 }
  0x1a   : > { %v223_v7 = vmax.f32 %v222_v5, 0.0  ;;  %v268_v45 = vsub.f32 %v215_v32, %v260_v29 }
  0x1c   : > { %v269_v10 = vadd.f32 1e-05, %v223_v7 }
  0x1e   : > { %535 = vrsqrt.f32 %v269_v10 }
  0x28   : > { %v536_v33 = vpop.eup %535 }
  0x29   : > { %v275_v38 = vrot.slane %v536_v33, %v274_v17  ;;  %v279_v39 = vrot.slane %v536_v33, %v278_v21  ;;  %v283_v40 = vrot.slane %v536_v33, %v282_v22  ;;  %v287_v41 = vrot.slane %v536_v33, %v286_v26 }
  0x2b   : > { %v295_v46 = vrot.slane %v275_v38, %v274_v17  ;;  %v299_v47 = vrot.slane %v279_v39, %v274_v17  ;;  %v303_v48 = vrot.slane %v283_v40, %v274_v17  ;;  %v307_v49 = vrot.slane %v287_v41, %v274_v17 }
  0x2d   : > { %v308_v50 = vmul.f32 %v295_v46, %v261_v34  ;;  %v309_v51 = vmul.f32 %v299_v47, %v262_v35  ;;  %v312_v52 = vmul.f32 %v295_v46, %v265_v36  ;;  %v313_v53 = vmul.f32 %v299_v47, %v266_v37 }
  0x2e   : > { %v310_v54 = vmul.f32 %v303_v48, %v263_v42  ;;  %v311_v55 = vmul.f32 %v307_v49, %v264_v43  ;;  %v314_v56 = vmul.f32 %v303_v48, %v267_v44  ;;  %v315_v57 = vmul.f32 %v307_v49, %v268_v45 }
  0x2f   : > { %vm316_vm4 = vcmp.ge.f32.partialorder %v308_v50, 0.0  ;;  %vm317_vm5 = vcmp.ge.f32.partialorder %v309_v51, 0.0  ;;  %v324_v58 = vmul.f32 0.2, %v308_v50  ;;  %v325_v59 = vmul.f32 0.2, %v309_v51 }
  0x30   : > { %vm318_vm6 = vcmp.ge.f32.partialorder %v310_v54, 0.0  ;;  %vm319_vm7 = vcmp.ge.f32.partialorder %v311_v55, 0.0  ;;  %v326_v60 = vmul.f32 0.2, %v310_v54  ;;  %v327_v61 = vmul.f32 0.2, %v311_v55 }
  0x31   : > { %v332_v62 = vsel %vm316_vm4, %v308_v50, %v324_v58  ;;  %v333_v63 = vsel %vm317_vm5, %v309_v51, %v325_v59  ;;  %vm320_vm8 = vcmp.ge.f32.partialorder %v312_v52, 0.0  ;;  %vm321_vm9 = vcmp.ge.f32.partialorder %v313_v53, 0.0 }
  0x32   : > { %v507_v1 = vpack.c.bf16 %v333_v63, %v332_v62  ;;  %v334_v2 = vsel %vm318_vm6, %v310_v54, %v326_v60  ;;  %v335_v3 = vsel %vm319_vm7, %v311_v55, %v327_v61  ;;  %v328_v4 = vmul.f32 0.2, %v312_v52 }
  0x33   : > { %v508_v6 = vpack.c.bf16 %v335_v3, %v334_v2  ;;  %v329_v7 = vmul.f32 0.2, %v313_v53  ;;  %vm322_vm12 = vcmp.ge.f32.partialorder %v314_v56, 0.0  ;;  %vm323_vm13 = vcmp.ge.f32.partialorder %v315_v57, 0.0 }
  0x34   : > { %364 = vst [vmem:[%s206_s24] sm:$0xff] %v507_v1  ;;  %v336_v8 = vsel %vm320_vm8, %v312_v52, %v328_v4  ;;  %v330_v9 = vmul.f32 0.2, %v314_v56  ;;  %v331_v10 = vmul.f32 0.2, %v315_v57 }
  0x35   : > { %365 = vst [vmem:[%s206_s24 + $0x8] sm:$0xff] %v508_v6  ;;  %v337_v11 = vsel %vm321_vm9, %v313_v53, %v329_v7 }
  0x36   : > { %v509_v13 = vpack.c.bf16 %v337_v11, %v336_v8  ;;  %v338_v14 = vsel %vm322_vm12, %v314_v56, %v330_v9  ;;  %v339_v15 = vsel %vm323_vm13, %v315_v57, %v331_v10 }
  0x37   : > { %v510_v17 = vpack.c.bf16 %v339_v15, %v338_v14 }
  0x38   : > { %v374_v18 = vsel %vm372_vm14, %v509_v13, %v373_v12 }
  0x39   : > { %375 = vst [vmem:[%s206_s24 + $0x10] sm:$0x11] %v374_v18  ;;  %v377_v19 = vsel %vm372_vm14, %v510_v17, %v376_v16 }
  0x3a   : > { %378 = vst [vmem:[%s206_s24 + $0x18] sm:$0x11] %v377_v19 }
  0x3b PF: > { %s12_s11 = sadd.s32 1, %s559_s11   ;;  %s641_s9 = smov %s555_s10 }
  0x3c   : > { %p9_p5 = scmp.ge.s32.totalorder %s12_s11, 4   ;;  %s642_s10 = smov %s644_s12 }
  0x3e   :  { %11 = sbr.rel (!%p9_p5) target bundleno = 2 (0x2), region = 61 }

// kernel: discriminator_forward.15
= control target key start
LH: loop header
LB: loop body
LE: loop exit
PB: predicated region body
PF: predicated region fallthrough
CT: control target
= control target key end

     0   :  { %s526_s9 = smov 0   ;;  %s528_s10 = smov 0   ;;  %s594_s0 = inlined_call_operand.vmem [shape: bf16[2,4,8192], index: 0, kind: input, shape index: {}]   ;;  %s595_s1 = inlined_call_operand.vmem [shape: bf16[1,8192], index: 1, kind: input, shape index: {}]   ;;  %s596_s2 = inlined_call_operand.vmem [shape: f32[2,1,4], index: 2, kind: output, shape index: {}]  }
   0x1   :  { %s530_s11 = smov 0   ;;  %s532_s12 = smov 0  }
   0x2   :  { %s534_s13 = smov 0  }
   0x3 LB: > { %s21_s14 = sadd.s32 1, %s498_s11  ;;  %s24_s15 = sadd.s32 1, %s502_s12  ;;  %s506_s13 = sphi %s534_s13, %s12_s13   ;;  %s502_s12 = sphi %s532_s12, %s600_s12   ;;  %s498_s11 = sphi %s530_s11, %s599_s11   ;;  %s494_s10 = sphi %s528_s10, %s598_s10   ;;  %s490_s9 = sphi %s526_s9, %s597_s9  }
   0x4   : > { %p22_p0 = scmp.ge.s32.totalorder %s21_s14, 16  ;;  %p414_p1 = scmp.ge.s32.totalorder %s506_s13, 1 }
   0x5   : > { %p141_p2 = scmp.lt.s32.totalorder %s506_s13, 33 }
   0x6   : > { %s602_s14 = smov (%p22_p0, %s21_s14), 0  ;;  %s604_s15 = smov (!%p22_p0, %s24_s15), %s502_s12 }
   0x7   : > { %p142_p3 = pnand %p414_p1, %p141_p2  ;;  %p26_p4 = scmp.ge.s32.totalorder %s604_s15, 2 }
   0x8   : > { %s415_s16 = sshll.u32 (!%p142_p3), %s490_s9, 2  ;;  %p170_p5 = scmp.lt.s32.totalorder (!%p142_p3), %s494_s10, 1 }
   0x9   : > { %s606_s15 = smov (%p26_p4, %s604_s15), 0  ;;  %145 = sbr.rel (%p142_p3) target bundleno = 270 (0x10e), region = 28 }
   0xa   : > { %p172_p6 = scmp.lt.s32.totalorder (!%p142_p3), %s415_s16, 63  ;;  %p419_p7 = scmp.ne.s32.totalorder (!%p142_p3), %s490_s9, 0 }
  0x10   : > { %s608_s10 = smov (!%p170_p5, %s494_s10), 1  ;;  %s610_s16 = smov (!%p172_p6, %s415_s16), 63 }
  0x11   : > { %s416_s17 = sshll.u32 %s608_s10, 6  ;;  %s186_s20 = scalar_lea.vmem %s596_s2, %s608_s10  ;;  %vm192_vm0 = vcmask (!%p419_p7), 24576   ;;  %v508_v0 = vmov (!%p419_p7), 0.0  }
  0x12   : > { %s175_s21 = sadd.s32 %s416_s17, %s610_s16  ;;  %s182_s24 = scalar_lea.vmem %s595_s1, %s610_s16  ;;  %193 = vst.msk [vmem:[#allocation2] sm:$0x1] (!%p419_p7), %vm192_vm0, %v508_v0 }
  0x13   : > { %s417_s25 = sshll.u32 %s175_s21, 1  ;;  %191 = sbr.rel (%p419_p7) target bundleno = 26 (0x1a), region = 32 }
  0x14   : > { %s177_s28 = scalar_lea.vmem %s594_s0, %s417_s25 }
  0x1a PF: > { %v196_v1 = vld [vmem:[%s177_s28] sm:$0xff]  ;;  %v209_v2 = vlaneseq  ;;  %v509_v3 = vmov 1983009808   ;;  %v510_v6 = vmov 1966171168   ;;  %vm329_vm1 = vcmask 24576  }
  0x1b   : > { %v229_v4 = vunpack.c.l.s4 %v509_v3  ;;  %v420_v5 = vld.sshfl [vmem:[%s182_s24] sm:$0x33 pattern:$0x75316420]  ;;  %v207_v7 = vunpack.c.l.s4 %v510_v6  ;;  %v227_v10 = vcombine.high %v196_v1, %v196_v1  ;;  %p421_p8 = scmp.ne.s32.totalorder %s490_s9, 15 }
  0x1c   : > { %v210_v8 = vshrl.u32 %v209_v2, 7  ;;  %v205_v11 = vcombine.high %v420_v5, %v420_v5  ;;  %v194_v24 = vld [vmem:[#allocation2] sm:$0x1] }
  0x1d   : > { %v230_v9 = vunpack.c.0.s8 %v229_v4  ;;  %v208_v12 = vunpack.c.0.s8 %v207_v7 }
  0x1f   : > { %v233_v13 = vsub.s32 %v230_v9, %v210_v8  ;;  %v211_v14 = vsub.s32 %v208_v12, %v210_v8 }
  0x21   : > { %v234_v15 = vrot.slane %v196_v1, %v233_v13  ;;  %v241_v16 = vrot.slane %v227_v10, %v233_v13  ;;  %v219_v17 = vrot.slane %v205_v11, %v211_v14  ;;  %v212_v21 = vrot.slane %v420_v5, %v211_v14 }
  0x23   : > { %v242_v18 = vcombine.high %v234_v15, %v234_v15  ;;  %v243_v19 = vcombine.high %v241_v16, %v241_v16  ;;  %280 = vmatprep.mubr.bf16.mxu0 %v219_v17  ;;  %v221_v20 = vcombine.high %v219_v17, %v219_v17  ;;  %v220_v22 = vcombine.high %v212_v21, %v212_v21 }
  0x25   : > { %248 = vmatprep.subr.bf16.mxu0 %v242_v18  ;;  %288 = vmatprep.subr.bf16.mxu1 %v243_v19 }
  0x26   : > { %249 = vmatpush1.bf16.xpose.msra.mxu0 %v234_v15  ;;  %289 = vmatpush1.bf16.xpose.msra.mxu1 %v241_v16 }
  0x27   : > { %320 = vmatprep.mubr.bf16.mxu1 %v221_v20 }
  0x2d   : > { %281 = vmatmul.mubr.bf16.vlgmr.msra.gmra.mrb[0].mxu0 %v212_v21  ;;  %321 = vmatmul.mubr.bf16.vlgmr.msra.gmra.mrb[0].mxu1 %v220_v22 }
  0xff   : > { %334 = sbr.rel (%p421_p8) target bundleno = 270 (0x10e), region = 36 }
 0x100   : > { %v282_v23 = vpop.f32.mrb[0].mxu0  ;;  %v322_v25 = vpop.f32.mrb[0].mxu1 }
 0x101   : > { %v323_v26 = vadd.f32 %v322_v25, %v282_v23  ;;  %v284_v27 = vpop.f32.mrb[1].mxu0  ;;  %v324_v28 = vpop.f32.mrb[1].mxu1 }
 0x102   : > { %v285_v29 = vpop.f32.mrb[2].mxu0  ;;  %v325_v30 = vpop.f32.mrb[2].mxu1 }
 0x103   : > { %v328_v31 = vadd.f32 %v323_v26, %v194_v24  ;;  %v286_v32 = vpop.f32.mrb[3].mxu0  ;;  %v326_v33 = vpop.f32.mrb[3].mxu1 }
 0x105   : > { %330 = vst.msk [vmem:[#allocation2] sm:$0x1] %vm329_vm1, %v328_v31 }
 0x10c   : > { %v335_v34 = vld [vmem:[#allocation2] sm:$0x1] }
 0x10d   : > { %336 = vst.msk [vmem:[%s186_s20] sm:$0x1] %vm329_vm1, %v335_v34 }
 0x10e PF: > { %s12_s13 = sadd.s32 1, %s506_s13   ;;  %s597_s9 = smov %s498_s11 }
 0x10f   : > { %p9_p9 = scmp.ge.s32.totalorder %s12_s13, 34   ;;  %s598_s10 = smov %s502_s12 }
 0x110   : > { %s599_s11 = smov %s602_s14  ;;  %s600_s12 = smov %s606_s15 }
 0x111   :  { %11 = sbr.rel (!%p9_p9) target bundleno = 3 (0x3), region = 69 }

</bundles_post_ra>
